<compile_context>
chip_gen: v7x
topology: tpu7x:2x2x1
jax: 0.10.0
libtpu: 0.0.40
codegen_flags: <defaults>
</compile_context>

<pallas_src>
import functools
import math

import jax
import jax.numpy as jnp
from jax.experimental import pallas as pl
from jax.experimental.pallas import tpu as pltpu

_K_CHUNK = 256  # K sub-chunk for the one-hot matmul (multiple of MXU dim)


def _round_up(x, m):
    return ((x + m - 1) // m) * m


def _vmem_capacity_bytes():
    """Physical VMEM of the attached TPU generation (fallback: v7x's 64 MiB)."""
    try:
        info = pltpu.get_tpu_info()
        cap = getattr(info, "vmem_capacity_bytes", None)
        if cap:
            return int(cap)
    except Exception:
        pass
    return 64 * 1024 * 1024


# --------------------------------------------------------------------------- #
# Kernel
# --------------------------------------------------------------------------- #
def _packed_embed_kernel(idx_ref, w_ref, out_ref, *, k_chunk, single_v):
    # idx_ref: (TILE_BS, D) int32  -- packed-vocab indices for this token tile
    # w_ref:   (TILE_V, E_PAD)     -- bf16 block-diagonal packed table tile
    # out_ref: (TILE_BS, E_PAD)    -- bf16, resident across the vocab axis
    tile_bs, nfeat = idx_ref.shape
    tile_v = w_ref.shape[0]

    if single_v:
        idx_local = idx_ref[...]
    else:
        v = pl.program_id(1)

        @pl.when(v == 0)
        def _init():
            out_ref[...] = jnp.zeros_like(out_ref)

        # Shift the vocab-tile offset onto the small (TILE_BS, D) index tile so
        # the large iota below stays loop-invariant (VALU relief).
        idx_local = idx_ref[...] - v * tile_v

    # Loop-invariant lane ids for one K-chunk.
    lanes = jax.lax.broadcasted_iota(jnp.int32, (tile_bs, k_chunk), 1)

    n_chunks = tile_v // k_chunk
    for c in range(n_chunks):  # static unroll; bounds live multi-hot to one chunk
        idx_c = idx_local if c == 0 else idx_local - c * k_chunk
        hot = lanes == idx_c[:, 0:1]
        for d in range(1, nfeat):  # vocab ranges are disjoint -> multi-hot via OR
            hot = jnp.logical_or(hot, lanes == idx_c[:, d:d + 1])

        part = jnp.dot(hot.astype(w_ref.dtype),
                       w_ref[pl.ds(c * k_chunk, k_chunk), :],
                       preferred_element_type=jnp.float32)

        # Exact in bf16: each output element receives its (single) bf16 table
        # value from exactly one (chunk, vocab-tile); everything else adds 0.
        if single_v and c == 0:
            out_ref[...] = part.astype(out_ref.dtype)
        else:
            out_ref[...] += part.astype(out_ref.dtype)


def _packed_embedding_lookup(idx_packed, w_packed, tile_bs, tile_v, vmem_limit):
    """idx_packed: (tokens_pad, D) int32 packed-vocab ids; w_packed: (V_pad, E_pad)
    bf16 block-diagonal table.  Returns (tokens_pad, E_pad) in w_packed.dtype with
    every feature's embedding already concatenated along the lane axis."""
    tokens_pad, D = idx_packed.shape
    V_pad, E_pad = w_packed.shape
    assert tokens_pad % tile_bs == 0 and V_pad % tile_v == 0
    assert tile_v % _K_CHUNK == 0
    n_token_tiles = tokens_pad // tile_bs
    n_vocab_tiles = V_pad // tile_v
    out_dtype = w_packed.dtype

    if n_vocab_tiles >= 4:
        # v5e: deepen the table stream so the (tile_v, E_pad) DMA stays hidden
        # behind the (weaker) MXU.
        w_spec = pl.BlockSpec((tile_v, E_pad), lambda t, v: (v, 0),
                              pipeline_mode=pl.Buffered(3))
    else:
        w_spec = pl.BlockSpec((tile_v, E_pad), lambda t, v: (v, 0))

    itemsize = jnp.dtype(out_dtype).itemsize
    table_bytes = V_pad * E_pad * jnp.dtype(w_packed.dtype).itemsize
    cost = pl.CostEstimate(
        flops=int(2 * tokens_pad * V_pad * E_pad),
        transcendentals=0,
        bytes_accessed=int(tokens_pad * D * 4
                           + tokens_pad * E_pad * itemsize
                           + table_bytes * (n_token_tiles if n_vocab_tiles > 1 else 1)),
    )

    kernel = functools.partial(_packed_embed_kernel,
                               k_chunk=_K_CHUNK,
                               single_v=(n_vocab_tiles == 1))

    return pl.pallas_call(
        kernel,
        out_shape=jax.ShapeDtypeStruct((tokens_pad, E_pad), out_dtype),
        grid_spec=pltpu.PrefetchScalarGridSpec(
            num_scalar_prefetch=0,
            grid=(n_token_tiles, n_vocab_tiles),
            in_specs=[
                # indices: depend only on the token tile -> resident across vocab tiles
                pl.BlockSpec((tile_bs, D), lambda t, v: (t, 0)),
                # packed table: streamed over the vocab (reduction) axis
                w_spec,
            ],
            # lane-dense output block, constant across the reduction axis
            out_specs=pl.BlockSpec((tile_bs, E_pad), lambda t, v: (t, 0)),
        ),
        compiler_params=pltpu.CompilerParams(
            dimension_semantics=("parallel", "arbitrary"),
            vmem_limit_bytes=vmem_limit,
        ),
        cost_estimate=cost,
    )(idx_packed, w_packed)


# --------------------------------------------------------------------------- #
# Module
# --------------------------------------------------------------------------- #
class Embeddings:
    """JAX/Pallas port of deepseries Embeddings.

    embeds_size: list of (num_embeddings, embedding_dim) per categorical feature.
    Out-of-range indices are clipped per feature (jnp.take semantics).
    """

    def __init__(self, embeds_size=None, seq_last=False, key=None,
                 table_dtype=jnp.bfloat16, max_tile_v=None):
        self.embeds_size = embeds_size
        self.seq_last = seq_last
        self.output_size = sum(e for _, e in embeds_size) if embeds_size is not None else 0
        self.table_dtype = table_dtype
        self.weights = None
        if embeds_size:
            if key is None:
                key = jax.random.PRNGKey(0)
            keys = jax.random.split(key, len(embeds_size))
            self.weights = []
            for (v, e), k in zip(embeds_size, keys):
                # xavier_normal_ on a (V, E) weight: std = sqrt(2 / (V + E))
                std = math.sqrt(2.0 / (v + e))
                self.weights.append(std * jax.random.normal(k, (v, e), jnp.float32))
            self._build_packed_table(max_tile_v)   # built ONCE, not per forward call

    # --- packed block-diagonal table (cached) -------------------------------
    def _build_packed_table(self, max_tile_v=None):
        vocabs = [v for v, _ in self.embeds_size]
        dims = [e for _, e in self.embeds_size]
        v_sum, e_sum = sum(vocabs), sum(dims)
        self._E_pad = _round_up(e_sum, 128)                  # lane-dense output width

        # Generation-aware VMEM budget (v7x 64 MiB vs 128 MiB on v5e/v6e).
        self._vmem_limit = min(int(0.75 * _vmem_capacity_bytes()), 100 * 1024 * 1024)

        itemsize = jnp.dtype(self.table_dtype).itemsize
        v_single = _round_up(v_sum, _K_CHUNK)                # avoid 751->1024-style waste
        single_ok = 2 * v_single * self._E_pad * itemsize <= self._vmem_limit // 3
        if max_tile_v is not None:                           # test / tuning override
            tile_v = _round_up(min(max_tile_v, v_single), _K_CHUNK)
        elif single_ok:
            tile_v = v_single                                # collapse the reduction axis
        else:
            tile_v = 2 * _K_CHUNK
        self._tile_v = tile_v
        self._V_pad = _round_up(v_sum, tile_v)

        w = jnp.zeros((self._V_pad, self._E_pad), jnp.float32)
        voffs = []
        vo = eo = 0
        for (vsz, esz), tbl in zip(self.embeds_size, self.weights):
            w = w.at[vo:vo + vsz, eo:eo + esz].set(tbl)
            voffs.append(vo)
            vo += vsz
            eo += esz
        self._w_packed = w.astype(self.table_dtype)
        self._voffs = jnp.asarray(voffs, jnp.int32)
        self._vocab_sizes = jnp.asarray(vocabs, jnp.int32)

    # --- forward -------------------------------------------------------------
    def __call__(self, inputs=None, force_pallas=None):
        if inputs is None:
            return None
        if self.seq_last:
            idx = jnp.transpose(inputs, (0, 2, 1))   # (B, D, S) -> (B, S, D)
        else:
            idx = inputs                             # (B, S, D)
        idx = idx.astype(jnp.int32)
        B, S, D = idx.shape
        assert D == len(self.embeds_size)
        tokens = B * S

        if force_pallas is None:
            # tiny problems: pallas_call / per-step overhead dwarfs the work
            use_pallas = tokens * self._V_pad >= (1 << 18)
        else:
            use_pallas = force_pallas

        idx2d = idx.reshape(tokens, D)
        out2d = self._forward_pallas(idx2d) if use_pallas else self._forward_xla(idx2d)

        out = out2d.reshape(B, S, self.output_size)
        if self.seq_last:
            # concat of (B, E_d, S) along dim 1 == transpose of (B, S, sum(E_d))
            out = jnp.transpose(out, (0, 2, 1))
        return out

    def _forward_pallas(self, idx2d):
        tokens, D = idx2d.shape
        # Clip per feature (jnp.take semantics), then map into the packed vocab.
        idx2d = jnp.clip(idx2d, 0, self._vocab_sizes[None, :] - 1)
        idx_packed = idx2d + self._voffs[None, :]

        n_vocab_tiles = self._V_pad // self._tile_v
        if n_vocab_tiles == 1:
            # Table is resident across token tiles (index_map constant in t), so
            # favor low padding waste and >=2 token tiles for the v7x megacore.
            tile_bs = min(256, _round_up(tokens, 128))
        else:
            # Table is re-streamed per token tile: bigger M tiles cut HBM reads.
            tile_bs = min(512, _round_up(tokens, 256))
        tokens_pad = _round_up(tokens, tile_bs)
        if tokens_pad != tokens:
            # Padded rows become (feature-0, id-0) lookups after the voff shift;
            # they are sliced off below and never observed.
            idx_packed = jnp.pad(idx_packed, ((0, tokens_pad - tokens), (0, 0)))

        out = _packed_embedding_lookup(idx_packed, self._w_packed,
                                       tile_bs, self._tile_v, self._vmem_limit)
        # bf16 kernel output is an exact gather of the bf16 table; cast outside.
        return out[:tokens, :self.output_size].astype(jnp.float32)

    def _forward_xla(self, idx2d):
        # plain-XLA gather fallback (same table_dtype rounding as the kernel path)
        pieces = [
            jnp.take(self.weights[d].astype(self.table_dtype).astype(jnp.float32),
                     idx2d[:, d], axis=0)
            for d in range(idx2d.shape[1])
        ]
        return jnp.concatenate(pieces, axis=1)


if __name__ == "__main__":
    key = jax.random.PRNGKey(0)
    k_w, k_i = jax.random.split(key)

    # (vocab, embed_dim) per feature; sized to exercise >1 token tile
    embeds_size = [(700, 8), (40, 16), (11, 4)]
    B, S = 2, 384
    D = len(embeds_size)

    # seq_last=False: inputs are (B, S, D) integer category ids
    idx_keys = jax.random.split(k_i, D)
    cols = [
        jax.random.randint(idx_keys[d], (B, S, 1), 0, embeds_size[d][0], jnp.int32)
        for d in range(D)
    ]
    inputs = jnp.concatenate(cols, axis=2)    # (B, S, D)

    module = Embeddings(embeds_size=embeds_size, seq_last=False, key=k_w)
    out = jax.block_until_ready(module(inputs, force_pallas=True))
    assert out.shape == (B, S, module.output_size), out.shape

    # exact check vs an XLA gather of the same (bf16-rounded) tables
    ref_exact = module._forward_xla(inputs.reshape(B * S, D)).reshape(B, S, module.output_size)
    assert jnp.allclose(out, ref_exact, atol=1e-6, rtol=1e-6)

    # close to the full-f32 gather (only bf16 table rounding differs)
    ref_f32 = jnp.concatenate(
        [jnp.take(module.weights[d], inputs[:, :, d], axis=0) for d in range(D)], axis=2)
    assert jnp.allclose(out, ref_f32, atol=1e-2, rtol=1e-2)

    # multi-vocab-tile (reduction / accumulation) path, forced via max_tile_v
    module_mt = Embeddings(embeds_size=embeds_size, seq_last=False, key=k_w, max_tile_v=256)
    out_mt = jax.block_until_ready(module_mt(inputs, force_pallas=True))
    assert jnp.allclose(out_mt, ref_exact, atol=1e-6, rtol=1e-6)

    # also exercise the seq_last=True path: inputs (B, D, S)
    module_sl = Embeddings(embeds_size=embeds_size, seq_last=True, key=k_w)
    inputs_sl = jnp.transpose(inputs, (0, 2, 1))  # (B, D, S)
    out_sl = jax.block_until_ready(module_sl(inputs_sl, force_pallas=True))
    assert out_sl.shape == (B, module_sl.output_size, S), out_sl.shape
    assert jnp.allclose(out_sl, jnp.transpose(ref_exact, (0, 2, 1)), atol=1e-6, rtol=1e-6)

    # auto-dispatch smoke test (tiny problem -> jnp.take path, same semantics)
    small = inputs[:, :8, :]
    out_small = jax.block_until_ready(module(small))
    ref_small = module._forward_xla(small.reshape(-1, D)).reshape(B, 8, module.output_size)
    assert jnp.allclose(out_small, ref_small, atol=1e-6, rtol=1e-6)

    print("KERNEL_OK")
</pallas_src>

<mosaic_0001>
module attributes {stable_mosaic.version = 11 : i64} {
  func.func @_packed_embed_kernel(%arg0: i32, %arg1: i32, %arg2: memref<256x3xi32, #tpu.memory_space<vmem>>, %arg3: memref<768x128xbf16, #tpu.memory_space<vmem>>, %arg4: memref<256x128xbf16, #tpu.memory_space<vmem>>) attributes {dimension_semantics = [#tpu.dimension_semantics<parallel>, #tpu.dimension_semantics<arbitrary>], iteration_bounds = array<i64: 3, 1>, scalar_prefetch = 0 : i64, scratch_operands = 0 : i64, tpu.core_type = #tpu.core_type<tc>, window_params = [{transform_indices = @transform_0, window_bounds = array<i64: 256, 3>}, {transform_indices = @transform_1, window_bounds = array<i64: 768, 128>}, {transform_indices = @transform_2, window_bounds = array<i64: 256, 128>}]} {
    %c0 = arith.constant 0 : index
    %c0_0 = arith.constant 0 : index
    %0 = vector.load %arg2[%c0, %c0_0] : memref<256x3xi32, #tpu.memory_space<vmem>>, vector<256x3xi32>
    %1 = tpu.iota {dimensions = array<i32: 1>} : vector<256x256xi32>
    %2 = vector.extract_strided_slice %0 {offsets = [0, 0], sizes = [256, 1], strides = [1, 1]} : vector<256x3xi32> to vector<256x1xi32>
    %3 = vector.broadcast %2 : vector<256x1xi32> to vector<256x256xi32>
    %4 = arith.cmpi eq, %1, %3 : vector<256x256xi32>
    %5 = vector.extract_strided_slice %0 {offsets = [0, 1], sizes = [256, 1], strides = [1, 1]} : vector<256x3xi32> to vector<256x1xi32>
    %6 = vector.broadcast %5 : vector<256x1xi32> to vector<256x256xi32>
    %7 = arith.cmpi eq, %1, %6 : vector<256x256xi32>
    %8 = arith.ori %4, %7 : vector<256x256xi1>
    %9 = vector.extract_strided_slice %0 {offsets = [0, 2], sizes = [256, 1], strides = [1, 1]} : vector<256x3xi32> to vector<256x1xi32>
    %10 = vector.broadcast %9 : vector<256x1xi32> to vector<256x256xi32>
    %11 = arith.cmpi eq, %1, %10 : vector<256x256xi32>
    %12 = arith.ori %8, %11 : vector<256x256xi1>
    %13 = arith.extui %12 : vector<256x256xi1> to vector<256x256xi32>
    %14 = arith.sitofp %13 : vector<256x256xi32> to vector<256x256xf32>
    %15 = arith.truncf %14 : vector<256x256xf32> to vector<256x256xbf16>
    %c0_1 = arith.constant 0 : index
    %c0_2 = arith.constant 0 : index
    %16 = vector.load %arg3[%c0_1, %c0_2] : memref<768x128xbf16, #tpu.memory_space<vmem>>, vector<256x128xbf16>
    %cst = arith.constant dense<0.000000e+00> : vector<256x128xf32>
    %17 = tpu.matmul %15, %16, %cst {dimension_numbers = #tpu.dot_dimension_numbers<[1], [0], [0], [1], [0, 0, 1, 1], [], []>} : vector<256x256xbf16>, vector<256x128xbf16>, vector<256x128xf32> -> vector<256x128xf32>
    %18 = arith.truncf %17 : vector<256x128xf32> to vector<256x128xbf16>
    %c0_3 = arith.constant 0 : index
    %c0_4 = arith.constant 0 : index
    %19 = vector.load %arg4[%c0_3, %c0_4] : memref<256x128xbf16, #tpu.memory_space<vmem>>, vector<256x128xbf16>
    tpu.vector_store %arg4[%c0_3, %c0_4], %18 {strides = array<i32>} : memref<256x128xbf16, #tpu.memory_space<vmem>>, vector<256x128xbf16>,
    %c256_i32 = arith.constant 256 : i32
    %20 = vector.broadcast %c256_i32 : i32 to vector<256x3xi32>
    %21 = arith.subi %0, %20 : vector<256x3xi32>
    %22 = vector.extract_strided_slice %21 {offsets = [0, 0], sizes = [256, 1], strides = [1, 1]} : vector<256x3xi32> to vector<256x1xi32>
    %23 = vector.broadcast %22 : vector<256x1xi32> to vector<256x256xi32>
    %24 = arith.cmpi eq, %1, %23 : vector<256x256xi32>
    %25 = vector.extract_strided_slice %21 {offsets = [0, 1], sizes = [256, 1], strides = [1, 1]} : vector<256x3xi32> to vector<256x1xi32>
    %26 = vector.broadcast %25 : vector<256x1xi32> to vector<256x256xi32>
    %27 = arith.cmpi eq, %1, %26 : vector<256x256xi32>
    %28 = arith.ori %24, %27 : vector<256x256xi1>
    %29 = vector.extract_strided_slice %21 {offsets = [0, 2], sizes = [256, 1], strides = [1, 1]} : vector<256x3xi32> to vector<256x1xi32>
    %30 = vector.broadcast %29 : vector<256x1xi32> to vector<256x256xi32>
    %31 = arith.cmpi eq, %1, %30 : vector<256x256xi32>
    %32 = arith.ori %28, %31 : vector<256x256xi1>
    %33 = arith.extui %32 : vector<256x256xi1> to vector<256x256xi32>
    %34 = arith.sitofp %33 : vector<256x256xi32> to vector<256x256xf32>
    %35 = arith.truncf %34 : vector<256x256xf32> to vector<256x256xbf16>
    %c256 = arith.constant 256 : index
    %c0_5 = arith.constant 0 : index
    %36 = vector.load %arg3[%c256, %c0_5] : memref<768x128xbf16, #tpu.memory_space<vmem>>, vector<256x128xbf16>
    %cst_6 = arith.constant dense<0.000000e+00> : vector<256x128xf32>
    %37 = tpu.matmul %35, %36, %cst_6 {dimension_numbers = #tpu.dot_dimension_numbers<[1], [0], [0], [1], [0, 0, 1, 1], [], []>} : vector<256x256xbf16>, vector<256x128xbf16>, vector<256x128xf32> -> vector<256x128xf32>
    %c0_7 = arith.constant 0 : index
    %c0_8 = arith.constant 0 : index
    %38 = vector.load %arg4[%c0_7, %c0_8] : memref<256x128xbf16, #tpu.memory_space<vmem>>, vector<256x128xbf16>
    %39 = arith.truncf %37 : vector<256x128xf32> to vector<256x128xbf16>
    %40 = arith.addf %38, %39 : vector<256x128xbf16>
    %c0_9 = arith.constant 0 : index
    %c0_10 = arith.constant 0 : index
    %41 = vector.load %arg4[%c0_9, %c0_10] : memref<256x128xbf16, #tpu.memory_space<vmem>>, vector<256x128xbf16>
    tpu.vector_store %arg4[%c0_9, %c0_10], %40 {strides = array<i32>} : memref<256x128xbf16, #tpu.memory_space<vmem>>, vector<256x128xbf16>,
    %c512_i32 = arith.constant 512 : i32
    %42 = vector.broadcast %c512_i32 : i32 to vector<256x3xi32>
    %43 = arith.subi %0, %42 : vector<256x3xi32>
    %44 = vector.extract_strided_slice %43 {offsets = [0, 0], sizes = [256, 1], strides = [1, 1]} : vector<256x3xi32> to vector<256x1xi32>
    %45 = vector.broadcast %44 : vector<256x1xi32> to vector<256x256xi32>
    %46 = arith.cmpi eq, %1, %45 : vector<256x256xi32>
    %47 = vector.extract_strided_slice %43 {offsets = [0, 1], sizes = [256, 1], strides = [1, 1]} : vector<256x3xi32> to vector<256x1xi32>
    %48 = vector.broadcast %47 : vector<256x1xi32> to vector<256x256xi32>
    %49 = arith.cmpi eq, %1, %48 : vector<256x256xi32>
    %50 = arith.ori %46, %49 : vector<256x256xi1>
    %51 = vector.extract_strided_slice %43 {offsets = [0, 2], sizes = [256, 1], strides = [1, 1]} : vector<256x3xi32> to vector<256x1xi32>
    %52 = vector.broadcast %51 : vector<256x1xi32> to vector<256x256xi32>
    %53 = arith.cmpi eq, %1, %52 : vector<256x256xi32>
    %54 = arith.ori %50, %53 : vector<256x256xi1>
    %55 = arith.extui %54 : vector<256x256xi1> to vector<256x256xi32>
    %56 = arith.sitofp %55 : vector<256x256xi32> to vector<256x256xf32>
    %57 = arith.truncf %56 : vector<256x256xf32> to vector<256x256xbf16>
    %c512 = arith.constant 512 : index
    %c0_11 = arith.constant 0 : index
    %58 = vector.load %arg3[%c512, %c0_11] : memref<768x128xbf16, #tpu.memory_space<vmem>>, vector<256x128xbf16>
    %cst_12 = arith.constant dense<0.000000e+00> : vector<256x128xf32>
    %59 = tpu.matmul %57, %58, %cst_12 {dimension_numbers = #tpu.dot_dimension_numbers<[1], [0], [0], [1], [0, 0, 1, 1], [], []>} : vector<256x256xbf16>, vector<256x128xbf16>, vector<256x128xf32> -> vector<256x128xf32>
    %c0_13 = arith.constant 0 : index
    %c0_14 = arith.constant 0 : index
    %60 = vector.load %arg4[%c0_13, %c0_14] : memref<256x128xbf16, #tpu.memory_space<vmem>>, vector<256x128xbf16>
    %61 = arith.truncf %59 : vector<256x128xf32> to vector<256x128xbf16>
    %62 = arith.addf %60, %61 : vector<256x128xbf16>
    %c0_15 = arith.constant 0 : index
    %c0_16 = arith.constant 0 : index
    %63 = vector.load %arg4[%c0_15, %c0_16] : memref<256x128xbf16, #tpu.memory_space<vmem>>, vector<256x128xbf16>
    tpu.vector_store %arg4[%c0_15, %c0_16], %62 {strides = array<i32>} : memref<256x128xbf16, #tpu.memory_space<vmem>>, vector<256x128xbf16>,
    return
  }
  func.func @transform_0(%arg0: i32, %arg1: i32) -> (i32, i32) {
    %c0_i32 = arith.constant 0 : i32
    %c0_i32_0 = arith.constant 0 : i32
    return %arg0, %c0_i32 : i32, i32
  }
  func.func @transform_1(%arg0: i32, %arg1: i32) -> (i32, i32) {
    %c0_i32 = arith.constant 0 : i32
    %c0_i32_0 = arith.constant 0 : i32
    return %arg1, %c0_i32 : i32, i32
  }
  func.func @transform_2(%arg0: i32, %arg1: i32) -> (i32, i32) {
    %c0_i32 = arith.constant 0 : i32
    %c0_i32_0 = arith.constant 0 : i32
    return %arg0, %c0_i32 : i32, i32
  }
}

</mosaic_0001>

<bundles_post_ra>
// kernel: tpu_custom_call.1
= control target key start
LH: loop header
LB: loop body
LE: loop exit
PB: predicated region body
PF: predicated region fallthrough
CT: control target
= control target key end

     0   :  { %7 = vsyncpa [#allocation3], 0  ;;  %s10234_s0 = inlined_call_operand.vmem [shape: s32[768,3], index: 0, kind: input, shape index: {}]   ;;  %s10235_s1 = inlined_call_operand.vmem [shape: bf16[768,128], index: 1, kind: input, shape index: {}]   ;;  %s10236_s2 = inlined_call_operand.hbm [shape: bf16[768,128], index: 2, kind: output, shape index: {}]  }
   0x1   :  { %9 = vsyncpa [#allocation3 + $0x1], 0  ;;  %s5827_s9 = smov 0   ;;  %s5829_s10 = smov 0  }
   0x2   :  { %s5831_s11 = smov 0   ;;  %s5833_s12 = smov 0  }
   0x3   :  { %s5835_s13 = smov 0   ;;  %s5837_s14 = smov 0  }
   0x4 LB: > { %s4157_s15 = sadd.s32 4294967295, %s5803_s14   ;;  %s4158_s16 = sadd.s32 4294967294, %s5803_s14   ;;  %s5803_s14 = sphi %s5837_s14, %s15_s14   ;;  %s5799_s13 = sphi %s5835_s13, %s11141_s13   ;;  %s5795_s12 = sphi %s5833_s12, %s11140_s12   ;;  %s5791_s11 = sphi %s5831_s11, %s11139_s11   ;;  %s5787_s10 = sphi %s5829_s10, %s11138_s10   ;;  %s5783_s9 = sphi %s5827_s9, %s11137_s9  }
   0x5   : > { %s27_s17 = sadd.s32 1, %s5799_s13  ;;  %s86_s18 = sadd.s32 1, %s5791_s11 }
   0x6   : > { %p29_p0 = scmp.ge.s32.totalorder %s27_s17, 3  ;;  %p96_p1 = scmp.ne.s32.totalorder %s5791_s11, %s5787_s10 }
   0x7   : > { %p97_p2 = scmp.eq.s32.totalorder %s4157_s15, 2  ;;  %p102_p3 = scmp.ne.s32.totalorder %s5787_s10, %s5783_s9 }
   0x8   : > { %s11143_s17 = smov (%p29_p0, %s27_s17), 0  ;;  %p103_p5 = scmp.eq.s32.totalorder %s4158_s16, 2 }
   0x9   : > { %p5867_p4 = por %p97_p2, %p96_p1  ;;  %s83_s20 = ssub.s32 %s5799_s13, %s11143_s17 }
   0xa   : > { %p4162_p6 = scmp.ge.s32.totalorder %s5803_s14, 1  ;;  %p84_p7 = scmp.eq.s32.totalorder %s83_s20, 0 }
   0xb   : > { %p5874_p8 = por %p103_p5, %p102_p3  ;;  %p139_p9 = scmp.lt.s32.totalorder %s5803_s14, 4 }
   0xc   : > { %s5880_s22 = scalar_select %p84_p7, %s5791_s11, %s86_s18  }
   0xd   : > { %p140_p10 = pnand %p4162_p6, %p139_p9 }
   0xf   : > { %143 = sbr.rel (%p140_p10) target bundleno = 1141 (0x475), region = 28 }
  0x16   : > { %s4164_s23 = sshll.u32 %s5795_s12, 5  ;;  %v10237_v0 = vmov 2   ;;  %v10241_v1 = vmov 0   ;;  %v10239_v36 = vmov 1   ;;  %s163_s18 = sand.u32 1, %s5787_s10  }
  0x17   : > { %5593 = vset.pattern.permute.xlu0 %v10237_v0  ;;  %5590 = vset.pattern.permute.xlu1 %v10241_v1  ;;  %p167_p11 = scmp.lt.s32.totalorder %s4164_s23, 95  ;;  %s4163_s20 = sshll.u32 %s163_s18, 7 }
  0x18   : > { %s10188_s29 = scalar_lea.sflag [#allocation3], %s163_s18  ;;  %s5809_s30 = smov [#allocation2]  }
  0x19   : > { %s11145_s23 = smov (!%p167_p11, %s4164_s23), 95  ;;  %s5729_s3 = sshll.u32 %s5809_s30, 4  ;;  %s5730_s3 = int_to_ptr.vmem [resolvable:$false] %s5729_s3 }
  0x1a   : > { %s4165_s24 = sshll.u32 %s11145_s23, 3  ;;  %s8884_s23 = scalar_lea.vmem [#allocation2], %s4163_s20 }
  0x1b   : > { %s5888_s27 = scalar_lea.vmem %s10234_s0, %s4165_s24  ;;  %s4072_s24 = sshll.u32 %s8884_s23, 4  ;;  %s10183_s24 = int_to_ptr.vmem [resolvable:$true] %s4072_s24 }
  0x1c   : > { %v5891_v2 = vld [vmem:[%s5888_s27 + $0x10] sm:$0xff]  ;;  %v5894_v3 = vld [vmem:[%s5888_s27 + $0x8] sm:$0xff]  ;;  %v5899_v4 = vld [vmem:[%s5888_s27 + $0x18] sm:$0xff]  ;;  %s5731_s4 = scalar_lea.vmem %s5730_s3, 4096  ;;  %p5732_p1 = scmp.lt.s32.totalorder %s10183_s24, %s5730_s3 }
  0x1d   : > { %222 = vperm.xlu1 %5590, %v5891_v2   ;;  %603 = vperm.xlu0 %5593, %v5894_v3   ;;  %v5902_v5 = vld [vmem:[%s5888_s27 + $0x20] sm:$0xff]  ;;  %v5907_v6 = vld [vmem:[%s5888_s27 + $0x28] sm:$0xff]  ;;  %v5910_v7 = vld [vmem:[%s5888_s27 + $0x30] sm:$0xff]  ;;  %v6022_v35 = vadd.s32 4294967040, %v5899_v4 }
  0x1e   : > { %v5915_v8 = vld [vmem:[%s5888_s27 + $0x38] sm:$0xff]  ;;  %v5918_v9 = vld [vmem:[%s5888_s27 + $0x40] sm:$0xff]  ;;  %v5921_v10 = vld [vmem:[%s5888_s27 + $0x48] sm:$0xff]  ;;  %v6027_v37 = vadd.s32 4294967040, %v5907_v6 }
  0x1f   : > { %v5924_v11 = vld [vmem:[%s5888_s27 + $0x50] sm:$0xff]  ;;  %v5929_v12 = vld [vmem:[%s5888_s27 + $0x58] sm:$0xff]  ;;  %v5932_v13 = vld [vmem:[%s5888_s27 + $0x60] sm:$0xff]  ;;  %v6032_v38 = vadd.s32 4294967040, %v5915_v8  ;;  %v6037_v39 = vadd.s32 4294967040, %v5921_v10 }
  0x20   : > { %v5937_v14 = vld [vmem:[%s5888_s27 + $0x68] sm:$0xff]  ;;  %v5940_v15 = vld [vmem:[%s5888_s27 + $0x70] sm:$0xff]  ;;  %v5945_v16 = vld [vmem:[%s5888_s27 + $0x78] sm:$0xff]  ;;  %v6042_v40 = vadd.s32 4294967040, %v5929_v12 }
  0x21   : > { %225 = vperm.xlu1 %5590, %v5899_v4   ;;  %612 = vperm.xlu0 %5593, %v5902_v5   ;;  %v5948_v17 = vld [vmem:[%s5888_s27 + $0x80] sm:$0xff]  ;;  %v5953_v18 = vld [vmem:[%s5888_s27 + $0x88] sm:$0xff]  ;;  %v5956_v19 = vld [vmem:[%s5888_s27 + $0x90] sm:$0xff]  ;;  %v6047_v41 = vadd.s32 4294967040, %v5937_v14  ;;  %v6052_v42 = vadd.s32 4294967040, %v5945_v16 }
  0x22   : > { %v5961_v20 = vld [vmem:[%s5888_s27 + $0x98] sm:$0xff]  ;;  %v5964_v21 = vld [vmem:[%s5888_s27 + $0xa0] sm:$0xff]  ;;  %v5971_v22 = vld [vmem:[%s5888_s27 + $0xa8] sm:$0xff]  ;;  %v6057_v43 = vadd.s32 4294967040, %v5953_v18 }
  0x23   : > { %v5974_v23 = vld [vmem:[%s5888_s27 + $0xb0] sm:$0xff]  ;;  %v5979_v24 = vld [vmem:[%s5888_s27 + $0xb8] sm:$0xff]  ;;  %v5982_v25 = vld [vmem:[%s5888_s27 + $0xc0] sm:$0xff]  ;;  %v6062_v44 = vadd.s32 4294967040, %v5961_v20  ;;  %v6067_v45 = vadd.s32 4294967040, %v5971_v22 }
  0x24   : > { %v5987_v26 = vld [vmem:[%s5888_s27 + $0xc8] sm:$0xff]  ;;  %v5990_v27 = vld [vmem:[%s5888_s27 + $0xd0] sm:$0xff]  ;;  %v5995_v28 = vld [vmem:[%s5888_s27 + $0xd8] sm:$0xff] }
  0x25   : > { %231 = vperm.xlu1 %5590, %v5907_v6   ;;  %618 = vperm.xlu0 %5593, %v5910_v7   ;;  %v5998_v29 = vld [vmem:[%s5888_s27 + $0xe0] sm:$0xff]  ;;  %v6003_v30 = vld [vmem:[%s5888_s27 + $0xe8] sm:$0xff]  ;;  %v6006_v31 = vld [vmem:[%s5888_s27 + $0xf0] sm:$0xff] }
  0x26   : > { %v6009_v32 = vld [vmem:[%s5888_s27] sm:$0xff]  ;;  %v6017_v34 = vld [vmem:[%s5888_s27 + $0xf8] sm:$0xff] }
  0x27   : > { %v6014_v33 = vadd.s32 4294967040, %v6009_v32 }
  0x29   : > { %237 = vperm.xlu1 %5590, %v5915_v8   ;;  %624 = vperm.xlu0 %5593, %v5918_v9  }
  0x2d   : > { %243 = vperm.xlu1 %5590, %v5921_v10   ;;  %630 = vperm.xlu0 %5593, %v5924_v11  }
  0x31   : > { %249 = vperm.xlu1 %5590, %v5929_v12   ;;  %636 = vperm.xlu0 %5593, %v5932_v13  }
  0x35   : > { %255 = vperm.xlu1 %5590, %v5937_v14   ;;  %642 = vperm.xlu0 %5593, %v5940_v15  }
  0x39   : > { %261 = vperm.xlu1 %5590, %v5945_v16   ;;  %648 = vperm.xlu0 %5593, %v5948_v17  }
  0x3d   : > { %267 = vperm.xlu1 %5590, %v5953_v18   ;;  %654 = vperm.xlu0 %5593, %v5956_v19  }
  0x41   : > { %273 = vperm.xlu1 %5590, %v5961_v20   ;;  %660 = vperm.xlu0 %5593, %v5964_v21  }
  0x45   : > { %279 = vperm.xlu1 %5590, %v5971_v22   ;;  %666 = vperm.xlu0 %5593, %v5974_v23  }
  0x49   : > { %285 = vperm.xlu1 %5590, %v5979_v24   ;;  %672 = vperm.xlu0 %5593, %v5982_v25  }
  0x4d   : > { %291 = vperm.xlu1 %5590, %v5987_v26   ;;  %678 = vperm.xlu0 %5593, %v5990_v27  }
  0x51   : > { %297 = vperm.xlu1 %5590, %v5995_v28   ;;  %684 = vperm.xlu0 %5593, %v5998_v29  }
  0x55   : > { %303 = vperm.xlu1 %5590, %v6003_v30   ;;  %690 = vperm.xlu0 %5593, %v6006_v31  }
  0x59   : > { %309 = vperm.xlu1 %5590, %v6017_v34   ;;  %1849 = vperm.xlu0 %5593, %v6014_v33  }
  0x5d   : > { %5591 = vset.pattern.permute.xlu1 %v10239_v36  ;;  %1858 = vperm.xlu0 %5593, %v6022_v35  }
  0x5e   : > { %379 = vperm.xlu1 %5591, %v5894_v3  }
  0x61   : > { %1864 = vperm.xlu0 %5593, %v6027_v37  }
  0x62   : > { %382 = vperm.xlu1 %5591, %v5891_v2  }
  0x65   : > { %1870 = vperm.xlu0 %5593, %v6032_v38  }
  0x66   : > { %388 = vperm.xlu1 %5591, %v5902_v5  }
  0x69   : > { %1876 = vperm.xlu0 %5593, %v6037_v39  }
  0x6a   : > { %394 = vperm.xlu1 %5591, %v5910_v7  }
  0x6d   : > { %1882 = vperm.xlu0 %5593, %v6042_v40  }
  0x6e   : > { %400 = vperm.xlu1 %5591, %v5918_v9  }
  0x71   : > { %1888 = vperm.xlu0 %5593, %v6047_v41  }
  0x72   : > { %406 = vperm.xlu1 %5591, %v5924_v11  }
  0x75   : > { %1894 = vperm.xlu0 %5593, %v6052_v42  }
  0x76   : > { %412 = vperm.xlu1 %5591, %v5932_v13  }
  0x79   : > { %1900 = vperm.xlu0 %5593, %v6057_v43  }
  0x7a   : > { %418 = vperm.xlu1 %5591, %v5940_v15  }
  0x7d   : > { %1906 = vperm.xlu0 %5593, %v6062_v44  }
  0x7e   : > { %424 = vperm.xlu1 %5591, %v5948_v17  }
  0x81   : > { %1912 = vperm.xlu0 %5593, %v6067_v45  }
  0x82   : > { %430 = vperm.xlu1 %5591, %v5956_v19  }
  0x85   : > { %5597 = vset.pattern.permute.xlu0 %v10241_v1 }
  0x86   : > { %436 = vperm.xlu1 %5591, %v5964_v21   ;;  %216 = vperm.xlu0 %5597, %v6009_v32  }
  0x8a   : > { %442 = vperm.xlu1 %5591, %v5974_v23   ;;  %219 = vperm.xlu0 %5597, %v5894_v3  }
  0x8e   : > { %448 = vperm.xlu1 %5591, %v5982_v25   ;;  %228 = vperm.xlu0 %5597, %v5902_v5  }
  0x92   : > { %454 = vperm.xlu1 %5591, %v5990_v27   ;;  %234 = vperm.xlu0 %5597, %v5910_v7  }
  0x96   : > { %460 = vperm.xlu1 %5591, %v5998_v29   ;;  %240 = vperm.xlu0 %5597, %v5918_v9  }
  0x9a   : > { %466 = vperm.xlu1 %5591, %v6006_v31   ;;  %246 = vperm.xlu0 %5597, %v5924_v11  }
  0x9c   : > { %v6085_v46 = vpop.permute.xlu1 %222  ;;  %v6087_v47 = vpop.permute.xlu0 %603 }
  0x9d   : > { %10397 = vst [vmem:[#allocation5_spill] sm:$0xff] %v6085_v46  ;;  %v6303_v46 = vadd.s32 4294966784, %v5891_v2 }
  0x9e   : > { %5592 = vset.pattern.permute.xlu1 %v10237_v0  ;;  %252 = vperm.xlu0 %5597, %v5932_v13  }
  0x9f   : > { %600 = vperm.xlu1 %5592, %v6009_v32   ;;  %10452 = vst [vmem:[#allocation59_spill] sm:$0xff] %v6303_v46 }
  0xa0   : > { %v6092_v48 = vpop.permute.xlu1 %225  ;;  %v6094_v49 = vpop.permute.xlu0 %612 }
  0xa1   : > { %10398 = vst [vmem:[#allocation6_spill] sm:$0xff] %v6092_v48  ;;  %10399 = vst [vmem:[#allocation7_spill] sm:$0xff] %v6094_v49 }
  0xa2   : > { %258 = vperm.xlu0 %5597, %v5940_v15  }
  0xa3   : > { %606 = vperm.xlu1 %5592, %v5891_v2  }
  0xa4   : > { %v6098_v50 = vpop.permute.xlu1 %231  ;;  %v6100_v51 = vpop.permute.xlu0 %618 }
  0xa5   : > { %10400 = vst [vmem:[#allocation8_spill] sm:$0xff] %v6098_v50  ;;  %10401 = vst [vmem:[#allocation9_spill] sm:$0xff] %v6100_v51  ;;  %v6243_v51 = vadd.s32 4294967040, %v5924_v11  ;;  %v6267_v50 = vadd.s32 4294967040, %v5940_v15  ;;  %v6285_v15 = vadd.s32 4294966784, %v6009_v32 }
  0xa6   : > { %264 = vperm.xlu0 %5597, %v5948_v17  }
  0xa7   : > { %609 = vperm.xlu1 %5592, %v5899_v4   ;;  %10450 = vst [vmem:[#allocation57_spill] sm:$0xff] %v6285_v15 }
  0xa8   : > { %v6104_v52 = vpop.permute.xlu1 %237  ;;  %v6106_v53 = vpop.permute.xlu0 %624 }
  0xa9   : > { %10402 = vst [vmem:[#allocation10_spill] sm:$0xff] %v6104_v52  ;;  %10403 = vst [vmem:[#allocation11_spill] sm:$0xff] %v6106_v53 }
  0xaa   : > { %270 = vperm.xlu0 %5597, %v5956_v19  }
  0xab   : > { %615 = vperm.xlu1 %5592, %v5907_v6  }
  0xac   : > { %v6110_v54 = vpop.permute.xlu1 %243  ;;  %v6112_v55 = vpop.permute.xlu0 %630 }
  0xad   : > { %10404 = vst [vmem:[#allocation12_spill] sm:$0xff] %v6110_v54  ;;  %10405 = vst [vmem:[#allocation13_spill] sm:$0xff] %v6112_v55  ;;  %v6219_v55 = vadd.s32 4294967040, %v5910_v7  ;;  %v6231_v54 = vadd.s32 4294967040, %v5918_v9 }
  0xae   : > { %276 = vperm.xlu0 %5597, %v5964_v21  }
  0xaf   : > { %621 = vperm.xlu1 %5592, %v5915_v8  }
  0xb0   : > { %v6116_v56 = vpop.permute.xlu1 %249  ;;  %v6118_v57 = vpop.permute.xlu0 %636 }
  0xb1   : > { %10406 = vst [vmem:[#allocation14_spill] sm:$0xff] %v6116_v56  ;;  %10407 = vst [vmem:[#allocation15_spill] sm:$0xff] %v6118_v57 }
  0xb2   : > { %282 = vperm.xlu0 %5597, %v5974_v23  }
  0xb3   : > { %627 = vperm.xlu1 %5592, %v5921_v10  }
  0xb4   : > { %v6122_v58 = vpop.permute.xlu1 %255  ;;  %v6124_v59 = vpop.permute.xlu0 %642 }
  0xb5   : > { %10408 = vst [vmem:[#allocation16_spill] sm:$0xff] %v6122_v58  ;;  %10409 = vst [vmem:[#allocation17_spill] sm:$0xff] %v6124_v59 }
  0xb6   : > { %288 = vperm.xlu0 %5597, %v5982_v25  }
  0xb7   : > { %633 = vperm.xlu1 %5592, %v5929_v12  }
  0xb8   : > { %v6128_v60 = vpop.permute.xlu1 %261  ;;  %v6130_v61 = vpop.permute.xlu0 %648 }
  0xb9   : > { %10410 = vst [vmem:[#allocation18_spill] sm:$0xff] %v6128_v60  ;;  %10411 = vst [vmem:[#allocation19_spill] sm:$0xff] %v6130_v61 }
  0xba   : > { %294 = vperm.xlu0 %5597, %v5990_v27  }
  0xbb   : > { %639 = vperm.xlu1 %5592, %v5937_v14  }
  0xbc   : > { %v6134_v62 = vpop.permute.xlu1 %267  ;;  %v6136_v63 = vpop.permute.xlu0 %654 }
  0xbd   : > { %10412 = vst [vmem:[#allocation20_spill] sm:$0xff] %v6134_v62  ;;  %10413 = vst [vmem:[#allocation21_spill] sm:$0xff] %v6136_v63  ;;  %v6201_v63 = vadd.s32 4294967040, %v5891_v2  ;;  %v6321_v2 = vadd.s32 4294966784, %v5902_v5 }
  0xbe   : > { %300 = vperm.xlu0 %5597, %v5998_v29  }
  0xbf   : > { %645 = vperm.xlu1 %5592, %v5945_v16   ;;  %10454 = vst [vmem:[#allocation61_spill] sm:$0xff] %v6321_v2 }
  0xc0   : > { %v6140_v0 = vpop.permute.xlu1 %273  ;;  %v6142_v36 = vpop.permute.xlu0 %660 }
  0xc1   : > { %10414 = vst [vmem:[#allocation22_spill] sm:$0xff] %v6140_v0  ;;  %10415 = vst [vmem:[#allocation23_spill] sm:$0xff] %v6142_v36 }
  0xc2   : > { %306 = vperm.xlu0 %5597, %v6006_v31  }
  0xc3   : > { %651 = vperm.xlu1 %5592, %v5953_v18  }
  0xc4   : > { %v6146_v1 = vpop.permute.xlu1 %279  ;;  %v6148_v60 = vpop.permute.xlu0 %666 }
  0xc5   : > { %10416 = vst [vmem:[#allocation24_spill] sm:$0xff] %v6146_v1  ;;  %10417 = vst [vmem:[#allocation25_spill] sm:$0xff] %v6148_v60 }
  0xc6   : > { %1465 = vperm.xlu0 %5597, %v6014_v33  }
  0xc7   : > { %657 = vperm.xlu1 %5592, %v5961_v20  }
  0xc8   : > { %v6152_v59 = vpop.permute.xlu1 %285  ;;  %v6154_v58 = vpop.permute.xlu0 %672 }
  0xc9   : > { %10418 = vst [vmem:[#allocation26_spill] sm:$0xff] %v6152_v59  ;;  %10419 = vst [vmem:[#allocation27_spill] sm:$0xff] %v6154_v58 }
  0xca   : > { %1474 = vperm.xlu0 %5597, %v6022_v35  }
  0xcb   : > { %663 = vperm.xlu1 %5592, %v5971_v22  }
  0xcc   : > { %v6158_v36 = vpop.permute.xlu1 %291  ;;  %v6160_v57 = vpop.permute.xlu0 %678 }
  0xcd   : > { %10420 = vst [vmem:[#allocation28_spill] sm:$0xff] %v6158_v36  ;;  %10421 = vst [vmem:[#allocation29_spill] sm:$0xff] %v6160_v57 }
  0xce   : > { %1480 = vperm.xlu0 %5597, %v6027_v37  }
  0xcf   : > { %669 = vperm.xlu1 %5592, %v5979_v24  }
  0xd0   : > { %v6164_v60 = vpop.permute.xlu1 %297  ;;  %v6166_v1 = vpop.permute.xlu0 %684 }
  0xd1   : > { %10422 = vst [vmem:[#allocation30_spill] sm:$0xff] %v6164_v60  ;;  %10423 = vst [vmem:[#allocation31_spill] sm:$0xff] %v6166_v1 }
  0xd2   : > { %1486 = vperm.xlu0 %5597, %v6032_v38  }
  0xd3   : > { %675 = vperm.xlu1 %5592, %v5987_v26  }
  0xd4   : > { %v6170_v58 = vpop.permute.xlu1 %303  ;;  %v6172_v59 = vpop.permute.xlu0 %690 }
  0xd5   : > { %10424 = vst [vmem:[#allocation32_spill] sm:$0xff] %v6170_v58  ;;  %10425 = vst [vmem:[#allocation33_spill] sm:$0xff] %v6172_v59  ;;  %v6191_v58 = vadd.s32 4294967040, %v5894_v3 }
  0xd6   : > { %1492 = vperm.xlu0 %5597, %v6037_v39  }
  0xd7   : > { %681 = vperm.xlu1 %5592, %v5995_v28  }
  0xd8   : > { %v6176_v57 = vpop.permute.xlu1 %309  ;;  %v6178_v36 = vpop.permute.xlu0 %1849 }
  0xd9   : > { %10426 = vst [vmem:[#allocation34_spill] sm:$0xff] %v6176_v57  ;;  %10427 = vst [vmem:[#allocation35_spill] sm:$0xff] %v6178_v36  ;;  %v10431_v36 = vmov 0  }
  0xda   : > { %1498 = vperm.xlu0 %5597, %v6042_v40  }
  0xdb   : > { %687 = vperm.xlu1 %5592, %v6003_v30  }
  0xdc   : > { %v6182_v1 = vpop.permute.xlu0 %1858 }
  0xdd   : > { %10428 = vst [vmem:[#allocation36_spill] sm:$0xff] %v6182_v1  ;;  %v6184_v60 = vpop.permute.xlu1 %379 }
  0xde   : > { %1504 = vperm.xlu0 %5597, %v6047_v41  }
  0xdf   : > { %693 = vperm.xlu1 %5592, %v6017_v34  }
  0xe0   : > { %v6188_v59 = vpop.permute.xlu0 %1864 }
  0xe1   : > { %10429 = vst [vmem:[#allocation37_spill] sm:$0xff] %v6188_v59  ;;  %v6193_v57 = vpop.permute.xlu1 %382  ;;  %v6210_v59 = vadd.s32 4294967040, %v5902_v5  ;;  %v6339_v5 = vadd.s32 4294966784, %v5910_v7  ;;  %v6357_v7 = vadd.s32 4294966784, %v5918_v9  ;;  %v6375_v9 = vadd.s32 4294966784, %v5924_v11  ;;  %v5663_v11 = vld [vmem:[%s10235_s1 + $0x70] sm:$0xff]  }
  0xe2   : > { %10430 = vst [vmem:[#allocation38_spill] sm:$0xff] %v6193_v57  ;;  %1510 = vperm.xlu0 %5597, %v6052_v42   ;;  %v6310_v57 = vadd.s32 4294967040, %v5964_v21  ;;  %v5655_v21 = vld [vmem:[%s10235_s1 + $0x50] sm:$0xff]  }
  0xe3   : > { %5594 = vset.pattern.permute.xlu1 %v10431_v36  ;;  %10456 = vst [vmem:[#allocation63_spill] sm:$0xff] %v6339_v5  ;;  %10458 = vst [vmem:[#allocation65_spill] sm:$0xff] %v6357_v7 }
  0xe4   : > { %1468 = vperm.xlu1 %5594, %v6191_v58   ;;  %v6198_v1 = vpop.permute.xlu0 %1870  ;;  %10461 = vst [vmem:[#allocation68_spill] sm:$0xff] %v6375_v9 }
  0xe5   : > { %10432 = vst [vmem:[#allocation39_spill] sm:$0xff] %v6198_v1  ;;  %v6203_v0 = vpop.permute.xlu1 %388 }
  0xe6   : > { %10433 = vst [vmem:[#allocation40_spill] sm:$0xff] %v6203_v0  ;;  %1516 = vperm.xlu0 %5597, %v6057_v43  }
  0xe8   : > { %1471 = vperm.xlu1 %5594, %v6201_v63   ;;  %v6207_v3 = vpop.permute.xlu0 %1876 }
  0xe9   : > { %10434 = vst [vmem:[#allocation41_spill] sm:$0xff] %v6207_v3  ;;  %v6212_v62 = vpop.permute.xlu1 %394  ;;  %v6225_v3 = vadd.s32 4294967040, %v5979_v24 }
  0xea   : > { %10435 = vst [vmem:[#allocation42_spill] sm:$0xff] %v6212_v62  ;;  %1522 = vperm.xlu0 %5597, %v6062_v44   ;;  %v6255_v62 = vadd.s32 4294967040, %v5932_v13  ;;  %v6273_v13 = vadd.s32 4294967040, %v6017_v34 }
  0xec   : > { %1477 = vperm.xlu1 %5594, %v6210_v59   ;;  %v6216_v1 = vpop.permute.xlu0 %1882 }
  0xed   : > { %10436 = vst [vmem:[#allocation43_spill] sm:$0xff] %v6216_v1  ;;  %v6221_v56 = vpop.permute.xlu1 %400  ;;  %v6237_v1 = vadd.s32 4294967040, %v5987_v26 }
  0xee   : > { %10437 = vst [vmem:[#allocation44_spill] sm:$0xff] %v6221_v56  ;;  %1528 = vperm.xlu0 %5597, %v6067_v45  }
  0xf0   : > { %1483 = vperm.xlu1 %5594, %v6219_v55   ;;  %v6228_v61 = vpop.permute.xlu0 %1888 }
  0xf1   : > { %10438 = vst [vmem:[#allocation45_spill] sm:$0xff] %v6228_v61  ;;  %v6233_v53 = vpop.permute.xlu1 %406  ;;  %v6249_v61 = vadd.s32 4294967040, %v5995_v28 }
  0xf2   : > { %10439 = vst [vmem:[#allocation46_spill] sm:$0xff] %v6233_v53  ;;  %1534 = vperm.xlu0 %5597, %v6225_v3  }
  0xf3   : > { %10442 = vst [vmem:[#allocation49_spill] sm:$0xff] %v6249_v61 }
  0xf4   : > { %1489 = vperm.xlu1 %5594, %v6231_v54   ;;  %v6240_v56 = vpop.permute.xlu0 %1894 }
  0xf5   : > { %10440 = vst [vmem:[#allocation47_spill] sm:$0xff] %v6240_v56  ;;  %v6245_v52 = vpop.permute.xlu1 %412  ;;  %v6261_v56 = vadd.s32 4294967040, %v6003_v30 }
  0xf6   : > { %10441 = vst [vmem:[#allocation48_spill] sm:$0xff] %v6245_v52  ;;  %1540 = vperm.xlu0 %5597, %v6237_v1  }
  0xf7   : > { %10445 = vst [vmem:[#allocation52_spill] sm:$0xff] %v6261_v56 }
  0xf8   : > { %1495 = vperm.xlu1 %5594, %v6243_v51   ;;  %v6252_v53 = vpop.permute.xlu0 %1900 }
  0xf9   : > { %10443 = vst [vmem:[#allocation50_spill] sm:$0xff] %v6252_v53  ;;  %v6257_v49 = vpop.permute.xlu1 %418 }
  0xfa   : > { %10444 = vst [vmem:[#allocation51_spill] sm:$0xff] %v6257_v49  ;;  %1546 = vperm.xlu0 %5597, %v6249_v61   ;;  %v6279_v49 = vadd.s32 4294967040, %v5948_v17  ;;  %v5652_v17 = vld [vmem:[%s10235_s1] sm:$0xff]  }
  0xfc   : > { %1501 = vperm.xlu1 %5594, %v6255_v62   ;;  %v6264_v52 = vpop.permute.xlu0 %1906 }
  0xfd   : > { %10446 = vst [vmem:[#allocation53_spill] sm:$0xff] %v6264_v52  ;;  %v6269_v0 = vpop.permute.xlu1 %424  ;;  %v5651_v52 = vld [vmem:[%s10235_s1 + $0x40] sm:$0xff]  }
  0xfe   : > { %10447 = vst [vmem:[#allocation54_spill] sm:$0xff] %v6269_v0  ;;  %1552 = vperm.xlu0 %5597, %v6261_v56   ;;  %v6292_v0 = vadd.s32 4294967040, %v5956_v19  ;;  %5177 = vmatprep.subr.bf16.mxu0 %v5651_v52  ;;  %v5653_v19 = vld [vmem:[%s10235_s1 + $0x48] sm:$0xff]  }
  0xff   : > { %5513 = vmatprep.subr.bf16.mxu1 %v5651_v52  ;;  %5178 = vmatpush3.bf16.msra.mxu0 %v5652_v17  ;;  %v5654_v52 = vld [vmem:[%s10235_s1 + $0x8] sm:$0xff]  }
 0x100   : > { %1507 = vperm.xlu1 %5594, %v6267_v50   ;;  %v6276_v53 = vpop.permute.xlu0 %1912  ;;  %5521 = vmatpush3.bf16.msra.mxu1 %v5652_v17  ;;  %v6328_v17 = vadd.s32 4294967040, %v5974_v23  ;;  %v5657_v23 = vld [vmem:[%s10235_s1 + $0x58] sm:$0xff]  }
 0x101   : > { %10448 = vst [vmem:[#allocation55_spill] sm:$0xff] %v6276_v53  ;;  %v6281_v48 = vpop.permute.xlu1 %430  ;;  %5179 = vmatprep.subr.bf16.mxu0 %v5653_v19  ;;  %5514 = vmatprep.subr.bf16.mxu1 %v5653_v19  ;;  %v5656_v19 = vld [vmem:[%s10235_s1 + $0x10] sm:$0xff]  }
 0x102   : > { %10449 = vst [vmem:[#allocation56_spill] sm:$0xff] %v6281_v48  ;;  %1558 = vperm.xlu0 %5597, %v6273_v13  }
 0x103   : > { %5180 = vmatpush3.bf16.msra.mxu0 %v5654_v52 }
 0x104   : > { %1513 = vperm.xlu1 %5594, %v6279_v49   ;;  %5522 = vmatpush3.bf16.msra.mxu1 %v5654_v52  ;;  %v6346_v52 = vadd.s32 4294967040, %v5982_v25  ;;  %v5659_v25 = vld [vmem:[%s10235_s1 + $0x60] sm:$0xff]  }
 0x105   : > { %v6297_v53 = vpop.permute.xlu1 %436  ;;  %v6299_v48 = vpop.permute.xlu0 %216  ;;  %5181 = vmatprep.subr.bf16.mxu0 %v5655_v21  ;;  %5515 = vmatprep.subr.bf16.mxu1 %v5655_v21  ;;  %v5658_v21 = vld [vmem:[%s10235_s1 + $0x18] sm:$0xff]  }
 0x106   : > { %10451 = vst [vmem:[#allocation58_spill] sm:$0xff] %v6297_v53  ;;  %2778 = vperm.xlu0 %5597, %v6285_v15  }
 0x107   : > { %5182 = vmatpush3.bf16.msra.mxu0 %v5656_v19 }
 0x108   : > { %1519 = vperm.xlu1 %5594, %v6292_v0   ;;  %5523 = vmatpush3.bf16.msra.mxu1 %v5656_v19  ;;  %v6364_v19 = vadd.s32 4294967040, %v5990_v27  ;;  %v5661_v27 = vld [vmem:[%s10235_s1 + $0x68] sm:$0xff]  }
 0x109   : > { %v6315_v53 = vpop.permute.xlu1 %442  ;;  %v6317_v15 = vpop.permute.xlu0 %219  ;;  %5183 = vmatprep.subr.bf16.mxu0 %v5657_v23  ;;  %5516 = vmatprep.subr.bf16.mxu1 %v5657_v23  ;;  %v5660_v23 = vld [vmem:[%s10235_s1 + $0x20] sm:$0xff]  }
 0x10a   : > { %10453 = vst [vmem:[#allocation60_spill] sm:$0xff] %v6315_v53  ;;  %2784 = vperm.xlu0 %5597, %v6303_v46   ;;  %10459 = vst [vmem:[#allocation66_spill] sm:$0xff] %v6364_v19 }
 0x10b   : > { %5184 = vmatpush3.bf16.msra.mxu0 %v5658_v21 }
 0x10c   : > { %1525 = vperm.xlu1 %5594, %v6310_v57   ;;  %5524 = vmatpush3.bf16.msra.mxu1 %v5658_v21  ;;  %v6382_v21 = vadd.s32 4294967040, %v5998_v29  ;;  %v6397_v29 = vadd.s32 4294967040, %v6006_v31  ;;  %v5665_v31 = vld [vmem:[%s10235_s1 + $0x78] sm:$0xff]  }
 0x10d   : > { %v6333_v53 = vpop.permute.xlu1 %448  ;;  %v6335_v46 = vpop.permute.xlu0 %228  ;;  %5185 = vmatprep.subr.bf16.mxu0 %v5659_v25  ;;  %5517 = vmatprep.subr.bf16.mxu1 %v5659_v25  ;;  %v5662_v25 = vld [vmem:[%s10235_s1 + $0x28] sm:$0xff]  }
 0x10e   : > { %10455 = vst [vmem:[#allocation62_spill] sm:$0xff] %v6333_v53  ;;  %2790 = vperm.xlu0 %5597, %v6321_v2   ;;  %10464 = vst [vmem:[#allocation71_spill] sm:$0xff] %v6397_v29 }
 0x10f   : > { %5186 = vmatpush3.bf16.msra.mxu0 %v5660_v23 }
 0x110   : > { %1531 = vperm.xlu1 %5594, %v6328_v17   ;;  %5525 = vmatpush3.bf16.msra.mxu1 %v5660_v23  ;;  %v5664_v23 = vld [vmem:[%s10235_s1 + $0x30] sm:$0xff]  }
 0x111   : > { %v6351_v53 = vpop.permute.xlu1 %454  ;;  %v6353_v2 = vpop.permute.xlu0 %234  ;;  %5187 = vmatprep.subr.bf16.mxu0 %v5661_v27  ;;  %5518 = vmatprep.subr.bf16.mxu1 %v5661_v27 }
 0x112   : > { %10457 = vst [vmem:[#allocation64_spill] sm:$0xff] %v6351_v53  ;;  %2796 = vperm.xlu0 %5597, %v6339_v5  }
 0x113   : > { %5188 = vmatpush3.bf16.msra.mxu0 %v5662_v25 }
 0x114   : > { %1537 = vperm.xlu1 %5594, %v6346_v52   ;;  %5526 = vmatpush3.bf16.msra.mxu1 %v5662_v25  ;;  %v5666_v25 = vld [vmem:[%s10235_s1 + $0x38] sm:$0xff]  }
 0x115   : > { %v6369_v53 = vpop.permute.xlu1 %460  ;;  %v6371_v5 = vpop.permute.xlu0 %240  ;;  %5189 = vmatprep.subr.bf16.mxu0 %v5663_v11  ;;  %5519 = vmatprep.subr.bf16.mxu1 %v5663_v11 }
 0x116   : > { %10460 = vst [vmem:[#allocation67_spill] sm:$0xff] %v6369_v53  ;;  %2802 = vperm.xlu0 %5597, %v6357_v7  }
 0x117   : > { %5190 = vmatpush3.bf16.msra.mxu0 %v5664_v23 }
 0x118   : > { %1543 = vperm.xlu1 %5594, %v6364_v19   ;;  %5527 = vmatpush3.bf16.msra.mxu1 %v5664_v23 }
 0x119   : > { %v6387_v53 = vpop.permute.xlu1 %466  ;;  %v6389_v7 = vpop.permute.xlu0 %246  ;;  %5191 = vmatprep.subr.bf16.mxu0 %v5665_v31  ;;  %5520 = vmatprep.subr.bf16.mxu1 %v5665_v31 }
 0x11a   : > { %10462 = vst [vmem:[#allocation69_spill] sm:$0xff] %v6387_v53  ;;  %10463 = vst [vmem:[#allocation70_spill] sm:$0xff] %v6389_v7  ;;  %2808 = vperm.xlu0 %5597, %v6375_v9   ;;  %v10466_v9 = vmov 1  }
 0x11b   : > { %5192 = vmatpush3.bf16.msra.mxu0 %v5666_v25 }
 0x11c   : > { %1549 = vperm.xlu1 %5594, %v6382_v21   ;;  %5528 = vmatpush3.bf16.msra.mxu1 %v5666_v25 }
 0x11d   : > { %v6402_v53 = vpop.permute.xlu0 %252 }
 0x11e   : > { %10465 = vst [vmem:[#allocation72_spill] sm:$0xff] %v6402_v53  ;;  %v6404_v27 = vpop.permute.xlu1 %600  ;;  %5613 = vset.pattern.permute.xlu0 %v10466_v9 }
 0x11f   : > { %376 = vperm.xlu0 %5613, %v6009_v32  }
 0x120   : > { %1555 = vperm.xlu1 %5594, %v6397_v29  }
 0x121   : > { %v6415_v53 = vpop.permute.xlu0 %258 }
 0x122   : > { %10467 = vst [vmem:[#allocation73_spill] sm:$0xff] %v6415_v53  ;;  %v6417_v11 = vpop.permute.xlu1 %606 }
 0x123   : > { %385 = vperm.xlu0 %5613, %v5899_v4  }
 0x124   : > { %5595 = vset.pattern.permute.xlu1 %v10466_v9 }
 0x125   : > { %v6421_v32 = vpop.permute.xlu0 %264  ;;  %1625 = vperm.xlu1 %5595, %v6014_v33  }
 0x126   : > { %v6424_v7 = vpop.permute.xlu1 %609 }
 0x127   : > { %391 = vperm.xlu0 %5613, %v5907_v6  }
 0x129   : > { %v6427_v23 = vpop.permute.xlu0 %270  ;;  %1631 = vperm.xlu1 %5595, %v6201_v63  }
 0x12a   : > { %v6430_v31 = vpop.permute.xlu1 %615 }
 0x12b   : > { %397 = vperm.xlu0 %5613, %v5915_v8  }
 0x12d   : > { %v6433_v4 = vpop.permute.xlu0 %276  ;;  %1634 = vperm.xlu1 %5595, %v6022_v35  }
 0x12e   : > { %v6436_v25 = vpop.permute.xlu1 %621 }
 0x12f   : > { %403 = vperm.xlu0 %5613, %v5921_v10  }
 0x131   : > { %v6439_v33 = vpop.permute.xlu0 %282  ;;  %1640 = vperm.xlu1 %5595, %v6027_v37  }
 0x132   : > { %v6442_v6 = vpop.permute.xlu1 %627 }
 0x133   : > { %409 = vperm.xlu0 %5613, %v5929_v12  }
 0x135   : > { %v6445_v53 = vpop.permute.xlu0 %288  ;;  %1646 = vperm.xlu1 %5595, %v6032_v38  }
 0x136   : > { %v6448_v8 = vpop.permute.xlu1 %633 }
 0x137   : > { %415 = vperm.xlu0 %5613, %v5937_v14  }
 0x139   : > { %v6451_v35 = vpop.permute.xlu0 %294  ;;  %1652 = vperm.xlu1 %5595, %v6037_v39  }
 0x13a   : > { %v6454_v10 = vpop.permute.xlu1 %639 }
 0x13b   : > { %421 = vperm.xlu0 %5613, %v5945_v16  }
 0x13d   : > { %v6457_v37 = vpop.permute.xlu0 %300  ;;  %1658 = vperm.xlu1 %5595, %v6042_v40  }
 0x13e   : > { %v6460_v12 = vpop.permute.xlu1 %645 }
 0x13f   : > { %427 = vperm.xlu0 %5613, %v5953_v18  }
 0x141   : > { %v6463_v38 = vpop.permute.xlu0 %306  ;;  %1664 = vperm.xlu1 %5595, %v6047_v41  }
 0x142   : > { %v6466_v14 = vpop.permute.xlu1 %651 }
 0x143   : > { %433 = vperm.xlu0 %5613, %v5961_v20  }
 0x145   : > { %1670 = vperm.xlu1 %5595, %v6052_v42   ;;  %v6470_v39 = vpop.permute.xlu0 %1465 }
 0x146   : > { %v6472_v16 = vpop.permute.xlu1 %657 }
 0x147   : > { %439 = vperm.xlu0 %5613, %v5971_v22  }
 0x149   : > { %1676 = vperm.xlu1 %5595, %v6057_v43   ;;  %v6476_v40 = vpop.permute.xlu0 %1474 }
 0x14a   : > { %10468 = vst [vmem:[#allocation74_spill] sm:$0xff] %v6476_v40  ;;  %v6478_v18 = vpop.permute.xlu1 %663 }
 0x14b   : > { %445 = vperm.xlu0 %5613, %v5979_v24  }
 0x14d   : > { %1682 = vperm.xlu1 %5595, %v6062_v44   ;;  %v6482_v41 = vpop.permute.xlu0 %1480 }
 0x14e   : > { %10469 = vst [vmem:[#allocation75_spill] sm:$0xff] %v6482_v41  ;;  %v6484_v20 = vpop.permute.xlu1 %669 }
 0x14f   : > { %451 = vperm.xlu0 %5613, %v5987_v26  }
 0x151   : > { %1688 = vperm.xlu1 %5595, %v6067_v45   ;;  %v6488_v42 = vpop.permute.xlu0 %1486 }
 0x152   : > { %10470 = vst [vmem:[#allocation76_spill] sm:$0xff] %v6488_v42  ;;  %v6490_v22 = vpop.permute.xlu1 %675 }
 0x153   : > { %457 = vperm.xlu0 %5613, %v5995_v28  }
 0x155   : > { %1694 = vperm.xlu1 %5595, %v6225_v3   ;;  %v6494_v43 = vpop.permute.xlu0 %1492 }
 0x156   : > { %10471 = vst [vmem:[#allocation77_spill] sm:$0xff] %v6494_v43  ;;  %v6496_v24 = vpop.permute.xlu1 %681 }
 0x157   : > { %463 = vperm.xlu0 %5613, %v6003_v30  }
 0x159   : > { %1700 = vperm.xlu1 %5595, %v6237_v1   ;;  %v6500_v44 = vpop.permute.xlu0 %1498 }
 0x15a   : > { %10472 = vst [vmem:[#allocation78_spill] sm:$0xff] %v6500_v44  ;;  %v6502_v26 = vpop.permute.xlu1 %687 }
 0x15b   : > { %469 = vperm.xlu0 %5613, %v6017_v34  }
 0x15d   : > { %1706 = vperm.xlu1 %5595, %v6249_v61   ;;  %v6506_v45 = vpop.permute.xlu0 %1504  ;;  %v10478_v61 = vmov 2  }
 0x15e   : > { %10473 = vst [vmem:[#allocation79_spill] sm:$0xff] %v6506_v45  ;;  %v6508_v28 = vpop.permute.xlu1 %693 }
 0x15f   : > { %1628 = vperm.xlu0 %5613, %v6191_v58  }
 0x161   : > { %1712 = vperm.xlu1 %5595, %v6261_v56   ;;  %v6512_v43 = vpop.permute.xlu0 %1510 }
 0x162   : > { %10474 = vst [vmem:[#allocation80_spill] sm:$0xff] %v6512_v43 }
 0x163   : > { %v6514_v30 = vpop.permute.xlu1 %1468  ;;  %1637 = vperm.xlu0 %5613, %v6210_v59  }
 0x164   : > { %10475 = vst [vmem:[#allocation81_spill] sm:$0xff] %v6514_v30  ;;  %v10596_v30 = vld [vmem:[#allocation20_spill] sm:$0xff] }
 0x165   : > { %1718 = vperm.xlu1 %5595, %v6273_v13   ;;  %v6518_v44 = vpop.permute.xlu0 %1516 }
 0x166   : > { %10476 = vst [vmem:[#allocation82_spill] sm:$0xff] %v6518_v44 }
 0x167   : > { %v6520_v34 = vpop.permute.xlu1 %1471  ;;  %1643 = vperm.xlu0 %5613, %v6219_v55  }
 0x168   : > { %10477 = vst [vmem:[#allocation83_spill] sm:$0xff] %v6520_v34  ;;  %v5688_v34 = vld [vmem:[%s10235_s1 + $0x110] sm:$0xff]  }
 0x169   : > { %5596 = vset.pattern.permute.xlu1 %v10478_v61  ;;  %v6524_v45 = vpop.permute.xlu0 %1522 }
 0x16a   : > { %10479 = vst [vmem:[#allocation84_spill] sm:$0xff] %v6524_v45  ;;  %1852 = vperm.xlu1 %5596, %v6191_v58  }
 0x16b   : > { %v6527_v56 = vpop.permute.xlu1 %1477  ;;  %1649 = vperm.xlu0 %5613, %v6231_v54  }
 0x16c   : > { %10480 = vst [vmem:[#allocation85_spill] sm:$0xff] %v6527_v56  ;;  %v5709_v56 = vld [vmem:[%s5888_s27 + $0xa8] sm:$0xff] }
 0x16d   : > { %v6530_v43 = vpop.permute.xlu0 %1528 }
 0x16e   : > { %10481 = vst [vmem:[#allocation86_spill] sm:$0xff] %v6530_v43  ;;  %1855 = vperm.xlu1 %5596, %v6201_v63  }
 0x16f   : > { %v6533_v42 = vpop.permute.xlu1 %1483  ;;  %1655 = vperm.xlu0 %5613, %v6243_v51  }
 0x170   : > { %10482 = vst [vmem:[#allocation87_spill] sm:$0xff] %v6533_v42 }
 0x171   : > { %v6536_v44 = vpop.permute.xlu0 %1534 }
 0x172   : > { %10483 = vst [vmem:[#allocation88_spill] sm:$0xff] %v6536_v44  ;;  %1861 = vperm.xlu1 %5596, %v6210_v59  }
 0x173   : > { %v6539_v41 = vpop.permute.xlu1 %1489  ;;  %1661 = vperm.xlu0 %5613, %v6255_v62  }
 0x174   : > { %10484 = vst [vmem:[#allocation89_spill] sm:$0xff] %v6539_v41  ;;  %v10543_v41 = vld [vmem:[#allocation10_spill] sm:$0xff] }
 0x175   : > { %v6542_v58 = vpop.permute.xlu0 %1540 }
 0x176   : > { %10485 = vst [vmem:[#allocation90_spill] sm:$0xff] %v6542_v58  ;;  %1867 = vperm.xlu1 %5596, %v6219_v55  }
 0x177   : > { %v6545_v45 = vpop.permute.xlu1 %1495  ;;  %1667 = vperm.xlu0 %5613, %v6267_v50  }
 0x178   : > { %10486 = vst [vmem:[#allocation91_spill] sm:$0xff] %v6545_v45  ;;  %v5706_v45 = vld [vmem:[%s5888_s27 + $0x78] sm:$0xff] }
 0x179   : > { %v6548_v63 = vpop.permute.xlu0 %1546 }
 0x17a   : > { %10487 = vst [vmem:[#allocation92_spill] sm:$0xff] %v6548_v63  ;;  %1873 = vperm.xlu1 %5596, %v6231_v54  }
 0x17b   : > { %v6551_v43 = vpop.permute.xlu1 %1501  ;;  %1673 = vperm.xlu0 %5613, %v6279_v49  }
 0x17c   : > { %10488 = vst [vmem:[#allocation93_spill] sm:$0xff] %v6551_v43  ;;  %v10526_v43 = vld [vmem:[#allocation8_spill] sm:$0xff] }
 0x17d   : > { %v6554_v59 = vpop.permute.xlu0 %1552 }
 0x17e   : > { %10489 = vst [vmem:[#allocation94_spill] sm:$0xff] %v6554_v59  ;;  %1879 = vperm.xlu1 %5596, %v6243_v51  }
 0x17f   : > { %v6557_v44 = vpop.permute.xlu1 %1507  ;;  %1679 = vperm.xlu0 %5613, %v6292_v0  }
 0x180   : > { %10490 = vst [vmem:[#allocation95_spill] sm:$0xff] %v6557_v44 }
 0x181   : > { %v6560_v55 = vpop.permute.xlu0 %1558 }
 0x182   : > { %10491 = vst [vmem:[#allocation96_spill] sm:$0xff] %v6560_v55  ;;  %1885 = vperm.xlu1 %5596, %v6255_v62   ;;  %v212_v55 = vlaneseq }
 0x183   : > { %v6563_v58 = vpop.permute.xlu1 %1513  ;;  %1685 = vperm.xlu0 %5613, %v6310_v57  }
 0x184   : > { %10492 = vst [vmem:[#allocation97_spill] sm:$0xff] %v6563_v58 }
 0x185   : > { %v6566_v54 = vpop.permute.xlu0 %2778 }
 0x186   : > { %10493 = vst [vmem:[#allocation98_spill] sm:$0xff] %v6566_v54  ;;  %1891 = vperm.xlu1 %5596, %v6267_v50  }
 0x187   : > { %v6569_v63 = vpop.permute.xlu1 %1519  ;;  %1691 = vperm.xlu0 %5613, %v6328_v17  }
 0x188   : > { %10494 = vst [vmem:[#allocation99_spill] sm:$0xff] %v6569_v63  ;;  %v6587_v63 = vand.u32 127, %v212_v55 }
 0x189   : > { %v6572_v51 = vpop.permute.xlu0 %2784 }
 0x18a   : > { %10495 = vst [vmem:[#allocation100_spill] sm:$0xff] %v6572_v51  ;;  %1897 = vperm.xlu1 %5596, %v6279_v49   ;;  %vm313_vm1 = vcmp.eq.s32.totalorder %v6587_v63, %v6317_v15  ;;  %vm473_vm5 = vcmp.eq.s32.totalorder %v6587_v63, %v6184_v60  ;;  %vm311_vm6 = vcmp.eq.s32.totalorder %v6587_v63, %v6299_v48 }
 0x18b   : > { %v6575_v59 = vpop.permute.xlu1 %1525  ;;  %1697 = vperm.xlu0 %5613, %v6346_v52   ;;  %vm6632_vm7 = vmor %vm313_vm1, %vm473_vm5  ;;  %vm697_vm15 = vcmp.eq.s32.totalorder %v6587_v63, %v6087_v47 }
 0x18c   : > { %10496 = vst [vmem:[#allocation101_spill] sm:$0xff] %v6575_v59  ;;  %v10518_v59 = vld [vmem:[#allocation6_spill] sm:$0xff] }
 0x18d   : > { %v6578_v62 = vpop.permute.xlu0 %2790 }
 0x18e   : > { %10497 = vst [vmem:[#allocation102_spill] sm:$0xff] %v6578_v62  ;;  %1903 = vperm.xlu1 %5596, %v6292_v0   ;;  %v5667_v0 = vld [vmem:[%s10235_s1 + $0xc0] sm:$0xff]  }
 0x18f   : > { %v6581_v58 = vpop.permute.xlu1 %1531  ;;  %1703 = vperm.xlu0 %5613, %v6364_v19   ;;  %5289 = vmatprep.subr.bf16.mxu1 %v5667_v0  ;;  %v5702_v0 = vld [vmem:[%s5888_s27 + $0x38] sm:$0xff]  ;;  %v10531_v19 = vld [vmem:[#allocation7_spill] sm:$0xff] }
 0x190   : > { %10498 = vst [vmem:[#allocation103_spill] sm:$0xff] %v6581_v58  ;;  %v6599_v58 = vadd.s32 128, %v6587_v63 }
 0x191   : > { %v6584_v50 = vpop.permute.xlu0 %2796 }
 0x192   : > { %10499 = vst [vmem:[#allocation104_spill] sm:$0xff] %v6584_v50  ;;  %1909 = vperm.xlu1 %5596, %v6310_v57   ;;  %v5699_v57 = vld [vmem:[%s5888_s27 + $0x8] sm:$0xff]  ;;  %vm314_vm0 = vcmp.eq.s32.totalorder %v6599_v58, %v6317_v15  ;;  %vm474_vm2 = vcmp.eq.s32.totalorder %v6599_v58, %v6184_v60  ;;  %vm698_vm4 = vcmp.eq.s32.totalorder %v6599_v58, %v6087_v47  ;;  %v10516_v15 = vmov 1.0|1.0  }
 0x193   : > { %v6589_v49 = vpop.permute.xlu1 %1537  ;;  %1709 = vperm.xlu0 %5613, %v6382_v21   ;;  %v6605_v55 = vadd.s32 4294966784, %v5699_v57  ;;  %vm6622_vm3 = vmor %vm314_vm0, %vm474_vm2  ;;  %vm312_vm8 = vcmp.eq.s32.totalorder %v6599_v58, %v6299_v48  ;;  %v5701_v60 = vld [vmem:[%s5888_s27 + $0x28] sm:$0xff]  ;;  %vm696_vm14 = vcmp.eq.s32.totalorder %v6599_v58, %v6404_v27  ;;  %vm695_vm2 = vcmp.eq.s32.totalorder %v6587_v63, %v6404_v27  ;;  %v10515_v27 = vld [vmem:[#allocation5_spill] sm:$0xff] }
 0x194   : > { %10500 = vst [vmem:[#allocation105_spill] sm:$0xff] %v6589_v49  ;;  %v6645_v57 = vadd.s32 4294966784, %v5701_v60  ;;  %vm762_vm11 = vmor %vm6622_vm3, %vm698_vm4  ;;  %v10341_v60 = vmov 1.0|1.0   ;;  %v10514_v47 = vld [vmem:[#allocation38_spill] sm:$0xff] }
 0x195   : > { %v6592_v62 = vpop.permute.xlu0 %2802  ;;  %vm761_vm3 = vmor %vm6632_vm7, %vm697_vm15  ;;  %vm475_vm4 = vcmp.eq.s32.totalorder %v6587_v63, %v10514_v47  ;;  %vm315_vm7 = vcmp.eq.s32.totalorder %v6587_v63, %v10515_v27 }
 0x196   : > { %10501 = vst [vmem:[#allocation106_spill] sm:$0xff] %v6592_v62  ;;  %1915 = vperm.xlu1 %5596, %v6328_v17  }
 0x197   : > { %v6601_v50 = vpop.permute.xlu1 %1543  ;;  %1715 = vperm.xlu0 %5613, %v6397_v29  }
 0x198   : > { %10502 = vst [vmem:[#allocation107_spill] sm:$0xff] %v6601_v50  ;;  %v5700_v50 = vld [vmem:[%s5888_s27 + $0x18] sm:$0xff] }
 0x199   : > { %v6607_v49 = vpop.permute.xlu0 %2808  ;;  %v6618_v29 = vadd.s32 4294966784, %v5700_v50 }
 0x19a   : > { %10503 = vst [vmem:[#allocation108_spill] sm:$0xff] %v6607_v49  ;;  %1921 = vperm.xlu1 %5596, %v6346_v52  }
 0x19b   : > { %v6614_v17 = vpop.permute.xlu1 %1549  ;;  %2941 = vperm.xlu0 %5613, %v6605_v55  }
 0x19c   : > { %10504 = vst [vmem:[#allocation109_spill] sm:$0xff] %v6614_v17 }
 0x19e   : > { %v377_v52 = vpop.permute.xlu0 %376  ;;  %5598 = vset.pattern.permute.xlu1 %v10431_v36 }
 0x19f   : > { %vm471_vm9 = vcmp.eq.s32.totalorder %v6587_v63, %v377_v52  ;;  %v6640_v50 = vpop.permute.xlu1 %1555  ;;  %2947 = vperm.xlu0 %5613, %v6618_v29   ;;  %2781 = vperm.xlu1 %5598, %v6605_v55   ;;  %vm472_vm10 = vcmp.eq.s32.totalorder %v6599_v58, %v377_v52  ;;  %v6661_v52 = vadd.s32 4294966784, %v5702_v0 }
 0x1a0   : > { %10509 = vst [vmem:[#allocation110_spill] sm:$0xff] %v6640_v50  ;;  %vm6650_vm12 = vmor %vm311_vm6, %vm471_vm9  ;;  %v10512_v50 = vld [vmem:[#allocation57_spill] sm:$0xff]  ;;  %vm476_vm9 = vcmp.eq.s32.totalorder %v6599_v58, %v10514_v47  ;;  %v5704_v47 = vld [vmem:[%s5888_s27 + $0x58] sm:$0xff] }
 0x1a1   : > { %vm536_vm13 = vmor %vm312_vm8, %vm472_vm10  ;;  %vm318_vm10 = vcmp.eq.s32.totalorder %v6599_v58, %v10518_v59  ;;  %v6707_v51 = vadd.s32 4294966784, %v5704_v47 }
 0x1a2   : > { %v386_v48 = vpop.permute.xlu0 %385  ;;  %vm760_vm0 = vmor %vm536_vm13, %vm696_vm14  ;;  %vm316_vm13 = vcmp.eq.s32.totalorder %v6599_v58, %v10515_v27  ;;  %v10522_v27 = vld [vmem:[#allocation40_spill] sm:$0xff] }
 0x1a3   : > { %2953 = vperm.xlu0 %5613, %v6645_v57   ;;  %vm4246_vm1 = vmpackc.low %vm762_vm11, %vm760_vm0  ;;  %5599 = vset.pattern.permute.xlu1 %v10466_v9  ;;  %vm478_vm6 = vcmp.eq.s32.totalorder %v6599_v58, %v386_v48  ;;  %vm320_vm0 = vcmp.eq.s32.totalorder %v6599_v58, %v6335_v46 }
 0x1a4   : > { %4247 = vmatprep.mubr.msk.bf16.mxu0 %vm4246_vm1, %v10341_v60  ;;  %2938 = vperm.xlu1 %5599, %v10512_v50   ;;  %v6665_v49 = vpop.permute.xlu1 %1625  ;;  %vm759_vm5 = vmor %vm6650_vm12, %vm695_vm2  ;;  %v5703_v60 = vld [vmem:[%s5888_s27 + $0x48] sm:$0xff]  ;;  %vm700_vm12 = vcmp.eq.s32.totalorder %v6599_v58, %v6417_v11  ;;  %vm702_vm1 = vcmp.eq.s32.totalorder %v6599_v58, %v6424_v7 }
 0x1a5   : > { %10513 = vst [vmem:[#allocation57_spill] sm:$0xff] %v6665_v49  ;;  %vm4248_vm8 = vmpackc.low %vm761_vm3, %vm759_vm5  ;;  %v6680_v62 = vadd.s32 4294966784, %v5703_v60  ;;  %vm477_vm3 = vcmp.eq.s32.totalorder %v6587_v63, %v386_v48  ;;  %vm480_vm5 = vcmp.eq.s32.totalorder %v6599_v58, %v10522_v27 }
 0x1a6   : > { %v6675_v0 = vpop.permute.xlu0 %391  ;;  %4249 = vmatmul.mubr.msk.bf16.vlgmr.msra.gmra.mrb[0].mxu0 %vm4248_vm8, %v10516_v15  ;;  %vm6692_vm11 = vmor %vm315_vm7, %vm475_vm4  ;;  %vm317_vm7 = vcmp.eq.s32.totalorder %v6587_v63, %v10518_v59  ;;  %v5707_v59 = vld [vmem:[%s5888_s27 + $0x88] sm:$0xff] }
 0x1a7   : > { %2959 = vperm.xlu0 %5613, %v6661_v52   ;;  %vm542_vm14 = vmor %vm318_vm10, %vm478_vm6  ;;  %vm699_vm6 = vcmp.eq.s32.totalorder %v6587_v63, %v6417_v11  ;;  %vm482_vm10 = vcmp.eq.s32.totalorder %v6599_v58, %v6675_v0  ;;  %v6787_v42 = vadd.s32 4294966784, %v5707_v59 }
 0x1a8   : > { %5600 = vset.pattern.permute.xlu1 %v10478_v61  ;;  %v6688_v17 = vpop.permute.xlu1 %1631  ;;  %vm540_vm15 = vmor %vm316_vm13, %vm476_vm9  ;;  %vm322_vm13 = vcmp.eq.s32.totalorder %v6599_v58, %v10526_v43 }
 0x1a9   : > { %10517 = vst [vmem:[#allocation38_spill] sm:$0xff] %v6688_v17  ;;  %3162 = vperm.xlu1 %5600, %v10512_v50   ;;  %vm764_vm2 = vmor %vm540_vm15, %vm700_vm12  ;;  %vm319_vm15 = vcmp.eq.s32.totalorder %v6587_v63, %v6335_v46  ;;  %v6762_v46 = vadd.s32 4294966784, %v5706_v45 }
 0x1aa   : > { %v6703_v60 = vpop.permute.xlu0 %397  ;;  %vm766_vm4 = vmor %vm542_vm14, %vm702_vm1  ;;  %10536 = vst [vmem:[#allocation8_spill] sm:$0xff] %v6787_v42 }
 0x1ab   : > { %2965 = vperm.xlu0 %5613, %v6680_v62   ;;  %vm4250_vm8 = vmpackc.low %vm766_vm4, %vm764_vm2 }
 0x1ac   : > { %v6713_v50 = vpop.permute.xlu1 %1634  ;;  %vm6725_vm9 = vmor %vm320_vm0, %vm480_vm5  ;;  %4251 = vmatprep.mubr.msk.bf16.mxu0 %vm4250_vm8, %v10516_v15  ;;  %vm701_vm0 = vcmp.eq.s32.totalorder %v6587_v63, %v6424_v7 }
 0x1ad   : > { %10521 = vst [vmem:[#allocation5_spill] sm:$0xff] %v6713_v50  ;;  %3165 = vperm.xlu1 %5600, %v6605_v55   ;;  %v5705_v55 = vld [vmem:[%s5888_s27 + $0x68] sm:$0xff]  ;;  %vm541_vm12 = vmor %vm317_vm7, %vm477_vm3  ;;  %vm479_vm3 = vcmp.eq.s32.totalorder %v6587_v63, %v10522_v27  ;;  %v10535_v27 = vld [vmem:[#allocation59_spill] sm:$0xff] }
 0x1ae   : > { %v6721_v47 = vpop.permute.xlu0 %403  ;;  %v6734_v11 = vadd.s32 4294966784, %v5705_v55  ;;  %vm6742_vm14 = vmor %vm6692_vm11, %vm699_vm6  ;;  %vm704_vm11 = vcmp.eq.s32.totalorder %v6599_v58, %v10531_v19  ;;  %vm706_vm6 = vcmp.eq.s32.totalorder %v6599_v58, %v6430_v31  ;;  %v5712_v50 = vld [vmem:[%s5888_s27 + $0x60] sm:$0xff] }
 0x1af   : > { %2971 = vperm.xlu0 %5613, %v6707_v51   ;;  %vm6751_vm1 = vmor %vm322_vm13, %vm482_vm10  ;;  %vm703_vm10 = vcmp.eq.s32.totalorder %v6587_v63, %v10531_v19  ;;  %vm324_vm13 = vcmp.eq.s32.totalorder %v6599_v58, %v6353_v2  ;;  %v5684_v19 = vld [vmem:[%s10235_s1 + $0x100] sm:$0xff]   ;;  %v6968_v40 = vadd.s32 4294966784, %v5712_v50  ;;  %v10575_v50 = vld [vmem:[#allocation70_spill] sm:$0xff] }
 0x1b0   : > { %v6736_v48 = vpop.permute.xlu1 %1640  ;;  %vm765_vm2 = vmor %vm541_vm12, %vm701_vm0 }
 0x1b1   : > { %10525 = vst [vmem:[#allocation6_spill] sm:$0xff] %v6736_v48  ;;  %5601 = vset.pattern.permute.xlu1 %v10431_v36  ;;  %vm4252_vm4 = vmpackc.low %vm765_vm2, %vm6742_vm14  ;;  %vm321_vm14 = vcmp.eq.s32.totalorder %v6587_v63, %v10526_v43  ;;  %vm326_vm2 = vcmp.eq.s32.totalorder %v6599_v58, %v10543_v41  ;;  %v10557_v48 = vld [vmem:[#allocation44_spill] sm:$0xff] }
 0x1b2   : > { %v6755_v54 = vpop.permute.xlu0 %409  ;;  %2787 = vperm.xlu1 %5601, %v6618_v29   ;;  %vm6770_vm5 = vmor %vm319_vm15, %vm479_vm3  ;;  %4253 = vmatmul.mubr.msk.bf16.gmra.mrb[4].mxu0 %vm4252_vm4, %v10516_v15  ;;  %vm486_vm15 = vcmp.eq.s32.totalorder %v6599_v58, %v6703_v60  ;;  %vm323_vm4 = vcmp.eq.s32.totalorder %v6587_v63, %v6353_v2 }
 0x1b3   : > { %2977 = vperm.xlu0 %5613, %v6734_v11   ;;  %vm768_vm8 = vmor %vm6725_vm9, %vm704_vm11  ;;  %vm481_vm9 = vcmp.eq.s32.totalorder %v6587_v63, %v6675_v0  ;;  %v5708_v0 = vld [vmem:[%s5888_s27 + $0x98] sm:$0xff] }
 0x1b4   : > { %v6768_v7 = vpop.permute.xlu1 %1646  ;;  %vm770_vm7 = vmor %vm6751_vm1, %vm706_vm6  ;;  %v6813_v59 = vadd.s32 4294966784, %v5708_v0  ;;  %v5669_v0 = vld [vmem:[%s10235_s1 + $0xc8] sm:$0xff]  }
 0x1b5   : > { %10532 = vst [vmem:[#allocation40_spill] sm:$0xff] %v6768_v7  ;;  %vm4254_vm12 = vmpackc.low %vm770_vm7, %vm768_vm8  ;;  %v5710_v7 = vld [vmem:[%s5888_s27 + $0xb0] sm:$0xff] }
 0x1b6   : > { %v6779_v45 = vpop.permute.xlu0 %415  ;;  %5602 = vset.pattern.permute.xlu1 %v10466_v9  ;;  %4255 = vmatprep.mubr.msk.bf16.mxu0 %vm4254_vm12, %v10516_v15  ;;  %vm6806_vm0 = vmor %vm6770_vm5, %vm703_vm10  ;;  %10540 = vst [vmem:[#allocation59_spill] sm:$0xff] %v6813_v59  ;;  %vm705_vm5 = vcmp.eq.s32.totalorder %v6587_v63, %v6430_v31 }
 0x1b7   : > { %2983 = vperm.xlu0 %5613, %v6762_v46   ;;  %2944 = vperm.xlu1 %5602, %v10535_v27   ;;  %vm545_vm11 = vmor %vm321_vm14, %vm481_vm9  ;;  %vm710_vm14 = vcmp.eq.s32.totalorder %v6599_v58, %v6436_v25 }
 0x1b8   : > { %v6791_v44 = vpop.permute.xlu1 %1652  ;;  %vm6830_vm6 = vmor %vm326_vm2, %vm486_vm15 }
 0x1b9   : > { %10537 = vst [vmem:[#allocation7_spill] sm:$0xff] %v6791_v44  ;;  %v10541_v44 = vld [vmem:[#allocation42_spill] sm:$0xff]  ;;  %vm769_vm7 = vmor %vm545_vm11, %vm705_vm5  ;;  %vm327_vm11 = vcmp.eq.s32.totalorder %v6587_v63, %v6371_v5 }
 0x1ba   : > { %v6798_v55 = vpop.permute.xlu0 %421  ;;  %vm484_vm1 = vcmp.eq.s32.totalorder %v6599_v58, %v10541_v44  ;;  %vm483_vm10 = vcmp.eq.s32.totalorder %v6587_v63, %v10541_v44  ;;  %vm4256_vm12 = vmpackc.low %vm769_vm7, %vm6806_vm0  ;;  %v5683_v44 = vld [vmem:[%s10235_s1 + $0x140] sm:$0xff]   ;;  %vm328_vm0 = vcmp.eq.s32.totalorder %v6599_v58, %v6371_v5  ;;  %v10590_v5 = vld [vmem:[#allocation14_spill] sm:$0xff] }
 0x1bb   : > { %2989 = vperm.xlu0 %5613, %v6787_v42   ;;  %5603 = vset.pattern.permute.xlu1 %v10478_v61  ;;  %vm6822_vm3 = vmor %vm324_vm13, %vm484_vm1  ;;  %v6840_v42 = vadd.s32 4294966784, %v5709_v56  ;;  %v10560_v56 = vld [vmem:[#allocation11_spill] sm:$0xff] }
 0x1bc   : > { %3168 = vperm.xlu1 %5603, %v10535_v27   ;;  %v6818_v43 = vpop.permute.xlu1 %1658  ;;  %vm6849_vm9 = vmor %vm323_vm4, %vm483_vm10  ;;  %4257 = vmatmul.mubr.msk.bf16.gmra.mrb[8].mxu0 %vm4256_vm12, %v10516_v15  ;;  %vm485_vm4 = vcmp.eq.s32.totalorder %v6587_v63, %v6703_v60  ;;  %vm325_vm10 = vcmp.eq.s32.totalorder %v6587_v63, %v10543_v41 }
 0x1bd   : > { %10542 = vst [vmem:[#allocation42_spill] sm:$0xff] %v6818_v43  ;;  %v10548_v43 = vld [vmem:[#allocation9_spill] sm:$0xff]  ;;  %10549 = vst [vmem:[#allocation10_spill] sm:$0xff] %v6840_v42  ;;  %5401 = vmatprep.subr.bf16.mxu0 %v5683_v44 }
 0x1be   : > { %v6834_v27 = vpop.permute.xlu0 %427  ;;  %vm708_vm8 = vcmp.eq.s32.totalorder %v6599_v58, %v10548_v43  ;;  %vm707_vm13 = vcmp.eq.s32.totalorder %v6587_v63, %v10548_v43  ;;  %vm774_vm1 = vmor %vm6830_vm6, %vm710_vm14  ;;  %vm712_vm6 = vcmp.eq.s32.totalorder %v6599_v58, %v10560_v56  ;;  %5402 = vmatpush3.bf16.msra.mxu0 %v5684_v19  ;;  %v10565_v19 = vld [vmem:[#allocation12_spill] sm:$0xff] }
 0x1bf   : > { %2995 = vperm.xlu0 %5613, %v6813_v59   ;;  %vm6860_vm15 = vmor %vm6822_vm3, %vm708_vm8  ;;  %vm488_vm3 = vcmp.eq.s32.totalorder %v6599_v58, %v10557_v48  ;;  %vm487_vm8 = vcmp.eq.s32.totalorder %v6587_v63, %v10557_v48  ;;  %v5711_v48 = vld [vmem:[%s5888_s27 + $0xc8] sm:$0xff]  ;;  %vm330_vm14 = vcmp.eq.s32.totalorder %v6599_v58, %v10565_v19  ;;  %v5689_v43 = vld [vmem:[%s10235_s1 + $0x158] sm:$0xff]  }
 0x1c0   : > { %3171 = vperm.xlu1 %5603, %v6618_v29   ;;  %v6847_v2 = vpop.permute.xlu1 %1664  ;;  %vm4258_vm2 = vmpackc.low %vm774_vm1, %vm6860_vm15  ;;  %v6924_v31 = vadd.s32 4294966784, %v5711_v48  ;;  %vm709_vm1 = vcmp.eq.s32.totalorder %v6587_v63, %v6436_v25  ;;  %v10571_v25 = vld [vmem:[#allocation54_spill] sm:$0xff] }
 0x1c1   : > { %10550 = vst [vmem:[#allocation9_spill] sm:$0xff] %v6847_v2  ;;  %v6878_v2 = vadd.s32 4294966784, %v5710_v7  ;;  %4259 = vmatprep.mubr.msk.bf16.mxu0 %vm4258_vm2, %v10516_v15  ;;  %vm6897_vm5 = vmor %vm6849_vm9, %vm707_vm13  ;;  %vm490_vm9 = vcmp.eq.s32.totalorder %v6599_v58, %v6721_v47  ;;  %v5685_v7 = vld [vmem:[%s10235_s1 + $0x148] sm:$0xff]  }
 0x1c2   : > { %v6864_v29 = vpop.permute.xlu0 %433  ;;  %vm552_vm7 = vmor %vm328_vm0, %vm488_vm3  ;;  %10563 = vst [vmem:[#allocation44_spill] sm:$0xff] %v6924_v31  ;;  %vm343_vm0 = vcmp.eq.s32.totalorder %v6587_v63, %v6421_v32  ;;  %vm344_vm3 = vcmp.eq.s32.totalorder %v6599_v58, %v6421_v32  ;;  %5403 = vmatprep.subr.bf16.mxu0 %v5685_v7  ;;  %v10581_v32 = vld [vmem:[#allocation46_spill] sm:$0xff]  ;;  %v10597_v7 = vmov 0 }
 0x1c3   : > { %3001 = vperm.xlu0 %5613, %v6840_v42   ;;  %10555 = vst [vmem:[#allocation111_spill] sm:$0xff] %v6878_v2  ;;  %vm6916_vm12 = vmor %vm327_vm11, %vm487_vm8 }
 0x1c4   : > { %5604 = vset.pattern.permute.xlu1 %v10431_v36  ;;  %v6885_v59 = vpop.permute.xlu1 %1670  ;;  %vm549_vm13 = vmor %vm325_vm10, %vm485_vm4  ;;  %vm503_vm4 = vcmp.eq.s32.totalorder %v6587_v63, %v10571_v25  ;;  %vm332_vm10 = vcmp.eq.s32.totalorder %v6599_v58, %v10575_v50 }
 0x1c5   : > { %10556 = vst [vmem:[#allocation112_spill] sm:$0xff] %v6885_v59  ;;  %2793 = vperm.xlu1 %5604, %v6645_v57   ;;  %vm6933_vm15 = vmor %vm552_vm7, %vm712_vm6  ;;  %v5687_v59 = vld [vmem:[%s10235_s1 + $0x150] sm:$0xff]   ;;  %vm711_vm7 = vcmp.eq.s32.totalorder %v6587_v63, %v10560_v56 }
 0x1c6   : > { %v6909_v44 = vpop.permute.xlu0 %439  ;;  %vm6945_vm11 = vmor %vm330_vm14, %vm490_vm9  ;;  %vm714_vm9 = vcmp.eq.s32.totalorder %v6599_v58, %v6442_v6 }
 0x1c7   : > { %3004 = vperm.xlu0 %5613, %v6878_v2   ;;  %v10570_v2 = vld [vmem:[#allocation61_spill] sm:$0xff]  ;;  %vm773_vm2 = vmor %vm549_vm13, %vm709_vm1 }
 0x1c8   : > { %v6929_v41 = vpop.permute.xlu1 %1676  ;;  %vm4260_vm6 = vmpackc.low %vm773_vm2, %vm6897_vm5  ;;  %vm504_vm5 = vcmp.eq.s32.totalorder %v6599_v58, %v10571_v25  ;;  %v10580_v25 = vld [vmem:[#allocation19_spill] sm:$0xff]  ;;  %vm492_vm2 = vcmp.eq.s32.totalorder %v6599_v58, %v10581_v32 }
 0x1c9   : > { %10564 = vst [vmem:[#allocation11_spill] sm:$0xff] %v6929_v41  ;;  %5605 = vset.pattern.permute.xlu1 %v10466_v9  ;;  %v5686_v41 = vld [vmem:[%s10235_s1 + $0x108] sm:$0xff]   ;;  %vm6976_vm8 = vmor %vm343_vm0, %vm503_vm4  ;;  %4261 = vmatmul.mubr.msk.bf16.gmra.mrb[12].mxu0 %vm4260_vm6, %v10516_v15  ;;  %vm728_vm0 = vcmp.eq.s32.totalorder %v6599_v58, %v10580_v25  ;;  %vm727_vm1 = vcmp.eq.s32.totalorder %v6587_v63, %v10580_v25  ;;  %v5714_v25 = vld [vmem:[%s5888_s27 + $0x80] sm:$0xff] }
 0x1ca   : > { %v6949_v48 = vpop.permute.xlu0 %445  ;;  %2950 = vperm.xlu1 %5605, %v10570_v2   ;;  %5404 = vmatpush3.bf16.msra.mxu0 %v5686_v41  ;;  %vm6992_vm13 = vmor %vm344_vm3, %vm504_vm5  ;;  %vm489_vm3 = vcmp.eq.s32.totalorder %v6587_v63, %v6721_v47  ;;  %vm494_vm6 = vcmp.eq.s32.totalorder %v6599_v58, %v6755_v54  ;;  %vm329_vm5 = vcmp.eq.s32.totalorder %v6587_v63, %v10565_v19  ;;  %v5690_v19 = vld [vmem:[%s10235_s1 + $0x118] sm:$0xff]   ;;  %v5691_v47 = vld [vmem:[%s10235_s1 + $0x160] sm:$0xff]   ;;  %v7106_v17 = vadd.s32 4294966784, %v5714_v25 }
 0x1cb   : > { %3013 = vperm.xlu0 %5613, %v6924_v31   ;;  %5405 = vmatprep.subr.bf16.mxu0 %v5687_v59  ;;  %vm7001_vm14 = vmor %vm6945_vm11, %vm714_vm9  ;;  %v5713_v31 = vld [vmem:[%s5888_s27 + $0x70] sm:$0xff] }
 0x1cc   : > { %v6965_v42 = vpop.permute.xlu1 %1682  ;;  %vm4262_vm11 = vmpackc.low %vm7001_vm14, %vm6933_vm15  ;;  %vm506_vm14 = vcmp.eq.s32.totalorder %v6599_v58, %v6834_v27  ;;  %10600 = vst [vmem:[#allocation19_spill] sm:$0xff] %v7106_v17 }
 0x1cd   : > { %10572 = vst [vmem:[#allocation12_spill] sm:$0xff] %v6965_v42  ;;  %vm7028_vm4 = vmor %vm332_vm10, %vm492_vm2  ;;  %4263 = vmatprep.mubr.msk.bf16.mxu0 %vm4262_vm11, %v10516_v15  ;;  %vm505_vm10 = vcmp.eq.s32.totalorder %v6587_v63, %v6834_v27 }
 0x1ce   : > { %v6996_v41 = vpop.permute.xlu0 %451  ;;  %5606 = vset.pattern.permute.xlu1 %v10478_v61  ;;  %5406 = vmatpush3.bf16.msra.mxu0 %v5688_v34  ;;  %vm7040_vm15 = vmor %vm6916_vm12, %vm711_vm7  ;;  %vm334_vm12 = vcmp.eq.s32.totalorder %v6599_v58, %v10590_v5  ;;  %vm331_vm7 = vcmp.eq.s32.totalorder %v6587_v63, %v10575_v50  ;;  %v5668_v34 = vld [vmem:[%s10235_s1 + $0x80] sm:$0xff]   ;;  %v10654_v50 = vld [vmem:[#allocation24_spill] sm:$0xff] }
 0x1cf   : > { %5637 = vset.pattern.permute.xlu0 %v10431_v36  ;;  %3174 = vperm.xlu1 %5606, %v10570_v2   ;;  %v7023_v2 = vadd.s32 4294966784, %v5713_v31  ;;  %vm7053_vm9 = vmor %vm6992_vm13, %vm728_vm0  ;;  %v5694_v31 = vld [vmem:[%s10235_s1 + $0x128] sm:$0xff]  }
 0x1d0   : > { %2814 = vperm.xlu0 %5637, %v6968_v40   ;;  %v7020_v60 = vpop.permute.xlu1 %1688  ;;  %vm7072_vm13 = vmor %vm329_vm5, %vm489_vm3  ;;  %vm345_vm3 = vcmp.eq.s32.totalorder %v6587_v63, %v10596_v30  ;;  %5407 = vmatprep.subr.bf16.mxu0 %v5689_v43  ;;  %vm346_vm5 = vcmp.eq.s32.totalorder %v6599_v58, %v10596_v30  ;;  %v5692_v43 = vld [vmem:[%s10235_s1 + $0x120] sm:$0xff]  }
 0x1d1   : > { %10582 = vst [vmem:[#allocation61_spill] sm:$0xff] %v7020_v60  ;;  %10583 = vst [vmem:[#allocation54_spill] sm:$0xff] %v7023_v2  ;;  %v10595_v60 = vld [vmem:[#allocation13_spill] sm:$0xff] }
 0x1d2   : > { %v7057_v56 = vpop.permute.xlu0 %457  ;;  %vm7083_vm0 = vmor %vm6976_vm8, %vm727_vm1  ;;  %vm491_vm8 = vcmp.eq.s32.totalorder %v6587_v63, %v10581_v32  ;;  %vm347_vm1 = vcmp.eq.s32.totalorder %v6587_v63, %v6427_v23  ;;  %5408 = vmatpush3.bf16.msra.mxu0 %v5690_v19  ;;  %v10605_v19 = vld [vmem:[#allocation56_spill] sm:$0xff] }
 0x1d3   : > { %3177 = vperm.xlu1 %5606, %v6645_v57   ;;  %vm7098_vm11 = vmor %vm334_vm12, %vm494_vm6  ;;  %5409 = vmatprep.subr.bf16.mxu0 %v5691_v47  ;;  %vm507_vm2 = vcmp.eq.s32.totalorder %v6587_v63, %v10605_v19  ;;  %v5715_v47 = vld [vmem:[%s5888_s27 + $0x90] sm:$0xff] }
 0x1d4   : > { %v10598_v7 = vsel %vm7098_vm11, 4294967295, %v10597_v7  ;;  %2820 = vperm.xlu0 %5637, %v7023_v2   ;;  %v7103_v57 = vpop.permute.xlu1 %1694  ;;  %vm7115_vm6 = vmor %vm345_vm3, %vm505_vm10  ;;  %vm730_vm3 = vcmp.eq.s32.totalorder %v6599_v58, %v6466_v14  ;;  %v7163_v25 = vadd.s32 4294966784, %v5715_v47  ;;  %v5671_v2 = vld [vmem:[%s10235_s1 + $0xd0] sm:$0xff]  }
 0x1d5   : > { %10599 = vst [vmem:[#allocation70_spill] sm:$0xff] %v7103_v57  ;;  %vm7127_vm12 = vmor %vm331_vm7, %vm491_vm8  ;;  %vm10606_vm7 = vcmp.eq.s32.totalorder %v6599_v58, %v10595_v60  ;;  %v10614_v57 = vld [vmem:[#allocation22_spill] sm:$0xff] }
 0x1d6   : > { %vm570_vm10 = vmor %vm346_vm5, %vm506_vm14  ;;  %v7136_v30 = vpop.permute.xlu0 %463  ;;  %vm713_vm5 = vcmp.eq.s32.totalorder %v6587_v63, %v6442_v6  ;;  %10612 = vst [vmem:[#allocation14_spill] sm:$0xff] %v7163_v25  ;;  %5410 = vmatpush3.bf16.msra.mxu0 %v5692_v43  ;;  %v5716_v43 = vld [vmem:[%s5888_s27 + $0xa0] sm:$0xff] }
 0x1d7   : > { %vm794_vm11 = vmor %vm570_vm10, %vm730_vm3  ;;  %5607 = vset.pattern.permute.xlu1 %v10431_v36  ;;  %v7202_v47 = vadd.s32 4294966784, %v5716_v43  ;;  %v10618_v43 = vld [vmem:[#allocation72_spill] sm:$0xff] }
 0x1d8   : > { %vm7145_vm8 = vmor %vm7028_vm4, %vm10606_vm7  ;;  %2826 = vperm.xlu0 %5637, %v7106_v17   ;;  %2799 = vperm.xlu1 %5607, %v6661_v52   ;;  %v7160_v42 = vpop.permute.xlu1 %1700  ;;  %vm715_vm7 = vcmp.eq.s32.totalorder %v6587_v63, %v10595_v60  ;;  %v10622_v17 = vld [vmem:[#allocation21_spill] sm:$0xff]  ;;  %v5678_v60 = vld [vmem:[%s10235_s1 + $0xa8] sm:$0xff]  }
 0x1d9   : > { %vm7150_vm14 = vmor %vm347_vm1, %vm507_vm2  ;;  %10611 = vst [vmem:[#allocation46_spill] sm:$0xff] %v7160_v42  ;;  %vm348_vm2 = vcmp.eq.s32.totalorder %v6599_v58, %v6427_v23  ;;  %v5695_v42 = vld [vmem:[%s10235_s1 + $0x170] sm:$0xff]  }
 0x1da   : > { %vm4278_vm10 = vmpackc.low %vm794_vm11, %vm7053_vm9  ;;  %vm729_vm9 = vcmp.eq.s32.totalorder %v6587_v63, %v6466_v14  ;;  %v7174_v6 = vpop.permute.xlu0 %469  ;;  %v5693_v14 = vld [vmem:[%s10235_s1 + $0x168] sm:$0xff]   ;;  %v10636_v23 = vld [vmem:[#allocation15_spill] sm:$0xff] }
 0x1db   : > { %4279 = vmatprep.mubr.msk.bf16.mxu1 %vm4278_vm10, %v10516_v15  ;;  %vm777_vm4 = vmor %vm7072_vm13, %vm713_vm5  ;;  %vm510_vm13 = vcmp.eq.s32.totalorder %v6599_v58, %v6864_v29  ;;  %vm336_vm5 = vcmp.eq.s32.totalorder %v6599_v58, %v10618_v43  ;;  %vm718_vm10 = vcmp.eq.s32.totalorder %v6599_v58, %v6448_v8  ;;  %5411 = vmatprep.subr.bf16.mxu0 %v5693_v14  ;;  %v10624_v14 = vld [vmem:[#allocation48_spill] sm:$0xff] }
 0x1dc   : > { %vm4264_vm11 = vmpackc.low %vm777_vm4, %vm7040_vm15  ;;  %vm508_vm15 = vcmp.eq.s32.totalorder %v6599_v58, %v10605_v19  ;;  %2832 = vperm.xlu0 %5637, %v7163_v25   ;;  %5608 = vset.pattern.permute.xlu1 %v10466_v9  ;;  %v7199_v49 = vpop.permute.xlu1 %1706  ;;  %v10617_v19 = vld [vmem:[#allocation63_spill] sm:$0xff]  ;;  %v5670_v25 = vld [vmem:[%s10235_s1 + $0x88] sm:$0xff]  }
 0x1dd   : > { %4265 = vmatmul.mubr.msk.bf16.gmra.mrb[16].mxu0 %vm4264_vm11, %v10516_v15  ;;  %vm793_vm1 = vmor %vm7115_vm6, %vm729_vm9  ;;  %10613 = vst [vmem:[#allocation13_spill] sm:$0xff] %v7199_v49  ;;  %vm350_vm6 = vcmp.eq.s32.totalorder %v6599_v58, %v10614_v57  ;;  %2956 = vperm.xlu1 %5608, %v10617_v19   ;;  %vm10623_vm9 = vnez %v10598_v7 }
 0x1de   : > { %vm4280_vm3 = vmpackc.low %vm793_vm1, %vm7083_vm0  ;;  %v7231_v49 = vpop.permute.xlu0 %1628  ;;  %5412 = vmatpush3.bf16.msra.mxu0 %v5694_v31  ;;  %vm496_vm1 = vcmp.eq.s32.totalorder %v6599_v58, %v10624_v14  ;;  %v10651_v31 = vld [vmem:[#allocation23_spill] sm:$0xff] }
 0x1df   : > { %vm7212_vm0 = vmor %vm348_vm2, %vm508_vm15  ;;  %4281 = vmatmul.mubr.msk.bf16.vlgmr.msra.gmra.mrb[0].mxu1 %vm4280_vm3, %v10516_v15  ;;  %10621 = vst [vmem:[#allocation20_spill] sm:$0xff] %v7231_v49  ;;  %vm732_vm2 = vcmp.eq.s32.totalorder %v6599_v58, %v10622_v17  ;;  %5413 = vmatprep.subr.bf16.mxu0 %v5695_v42  ;;  %v5697_v42 = vld [vmem:[%s10235_s1 + $0x178] sm:$0xff]  }
 0x1e0   : > { %vm7227_vm4 = vmor %vm350_vm6, %vm510_vm13  ;;  %5290 = vmatpush3.bf16.msra.mxu1 %v5668_v34  ;;  %v5696_v34 = vld [vmem:[%s10235_s1 + $0x130] sm:$0xff]   ;;  %vm731_vm13 = vcmp.eq.s32.totalorder %v6587_v63, %v10622_v17  ;;  %2838 = vperm.xlu0 %5637, %v7202_v47   ;;  %v7253_v7 = vpop.permute.xlu1 %1712  ;;  %vm352_vm6 = vcmp.eq.s32.totalorder %v6599_v58, %v6433_v4 }
 0x1e1   : > { %vm782_vm11 = vmor %vm10623_vm9, %vm718_vm10  ;;  %5291 = vmatprep.subr.bf16.mxu1 %v5669_v0  ;;  %10625 = vst [vmem:[#allocation56_spill] sm:$0xff] %v7253_v7  ;;  %v5717_v0 = vld [vmem:[%s5888_s27 + $0xc0] sm:$0xff]  ;;  %5609 = vset.pattern.permute.xlu1 %v10478_v61  ;;  %v10637_v7 = vld [vmem:[#allocation58_spill] sm:$0xff]  ;;  %vm498_vm9 = vcmp.eq.s32.totalorder %v6599_v58, %v6779_v45 }
 0x1e2   : > { %vm4266_vm15 = vmpackc.low %vm782_vm11, %vm7145_vm8  ;;  %v7256_v49 = vadd.s32 4294966784, %v5717_v0  ;;  %v7292_v32 = vpop.permute.xlu0 %1637  ;;  %3180 = vperm.xlu1 %5609, %v10617_v19   ;;  %v5672_v0 = vld [vmem:[%s10235_s1 + $0x90] sm:$0xff]   ;;  %v5673_v19 = vld [vmem:[%s10235_s1 + $0xd8] sm:$0xff]   ;;  %5414 = vmatpush3.bf16.msra.mxu0 %v5696_v34  ;;  %vm333_vm11 = vcmp.eq.s32.totalorder %v6587_v63, %v10590_v5 }
 0x1e3   : > { %vm7261_vm3 = vmor %vm336_vm5, %vm496_vm1  ;;  %4267 = vmatprep.mubr.msk.bf16.mxu0 %vm4266_vm15, %v10516_v15  ;;  %vm734_vm5 = vcmp.eq.s32.totalorder %v6599_v58, %v6472_v16  ;;  %5415 = vmatprep.subr.bf16.mxu0 %v5697_v42  ;;  %v5698_v34 = vld [vmem:[%s10235_s1 + $0x138] sm:$0xff]   ;;  %vm509_vm1 = vcmp.eq.s32.totalorder %v6587_v63, %v6864_v29  ;;  %v10657_v5 = vld [vmem:[#allocation65_spill] sm:$0xff] }
 0x1e4   : > { %vm7271_vm8 = vmor %vm7127_vm12, %vm715_vm7  ;;  %5292 = vmatpush3.bf16.msra.mxu1 %v5670_v25  ;;  %vm493_vm7 = vcmp.eq.s32.totalorder %v6587_v63, %v6755_v54  ;;  %2850 = vperm.xlu0 %5637, %v7256_v49   ;;  %v7329_v17 = vpop.permute.xlu1 %1718  ;;  %v10642_v42 = vld [vmem:[#allocation16_spill] sm:$0xff] }
 0x1e5   : > { %vm7288_vm12 = vmor %vm7212_vm0, %vm732_vm2  ;;  %5293 = vmatprep.subr.bf16.mxu1 %v5671_v2  ;;  %vm512_vm2 = vcmp.eq.s32.totalorder %v6599_v58, %v10637_v7  ;;  %10638 = vst [vmem:[#allocation22_spill] sm:$0xff] %v7329_v17  ;;  %v5718_v2 = vld [vmem:[%s5888_s27 + $0xd8] sm:$0xff]  ;;  %vm338_vm15 = vcmp.eq.s32.totalorder %v6599_v58, %v10642_v42  ;;  %v5720_v17 = vld [vmem:[%s5888_s27 + $0xd0] sm:$0xff] }
 0x1e6   : > { %vm7302_vm10 = vmor %vm7227_vm4, %vm734_vm5  ;;  %vm720_vm4 = vcmp.eq.s32.totalorder %v6599_v58, %v10636_v23  ;;  %v7332_v27 = vadd.s32 4294966784, %v5718_v2  ;;  %v7358_v59 = vpop.permute.xlu0 %1643  ;;  %3183 = vperm.xlu1 %5609, %v6661_v52   ;;  %v5674_v2 = vld [vmem:[%s10235_s1 + $0x98] sm:$0xff]   ;;  %5416 = vmatpush3.bf16.msra.mxu0 %v5698_v34 }
 0x1e7   : > { %vm7311_vm0 = vmor %vm7150_vm14, %vm731_vm13  ;;  %v5719_v54 = vld [vmem:[%s5888_s27 + $0xb8] sm:$0xff] }
 0x1e8   : > { %vm4282_vm14 = vmpackc.low %vm7302_vm10, %vm7288_vm12  ;;  %10639 = vst [vmem:[#allocation63_spill] sm:$0xff] %v7332_v27  ;;  %5294 = vmatpush3.bf16.msra.mxu1 %v5672_v0  ;;  %vm335_vm12 = vcmp.eq.s32.totalorder %v6587_v63, %v10618_v43  ;;  %2859 = vperm.xlu0 %5637, %v7332_v27   ;;  %v5675_v43 = vld [vmem:[%s10235_s1 + $0xe0] sm:$0xff]   ;;  %v5682_v29 = vld [vmem:[%s10235_s1 + $0xb8] sm:$0xff]   ;;  %v7585_v27 = vadd.s32 4294966784, %v5720_v17 }
 0x1e9   : > { %vm7342_vm13 = vmor %vm352_vm6, %vm512_vm2  ;;  %4283 = vmatprep.mubr.msk.bf16.mxu1 %vm4282_vm14, %v10516_v15  ;;  %vm349_vm6 = vcmp.eq.s32.totalorder %v6587_v63, %v10614_v57  ;;  %5295 = vmatprep.subr.bf16.mxu1 %v5673_v19  ;;  %vm717_vm2 = vcmp.eq.s32.totalorder %v6587_v63, %v6448_v8  ;;  %v7401_v8 = vpop.permute.xlu1 %1852  ;;  %vm736_vm14 = vcmp.eq.s32.totalorder %v6599_v58, %v10651_v31  ;;  %v7471_v57 = vadd.s32 4294966784, %v5719_v54  ;;  %v10692_v19 = vld [vmem:[#allocation62_spill] sm:$0xff] }
 0x1ea   : > { %vm7354_vm5 = vmor %vm333_vm11, %vm493_vm7  ;;  %v7413_v0 = vpop.permute.xlu0 %1649  ;;  %5610 = vset.pattern.permute.xlu1 %v10431_v36 }
 0x1eb   : > { %vm7371_vm7 = vmor %vm338_vm15, %vm498_vm9  ;;  %2805 = vperm.xlu1 %5610, %v6680_v62  }
 0x1ec   : > { %vm7380_vm10 = vmor %vm7261_vm3, %vm720_vm4  ;;  %vm495_vm3 = vcmp.eq.s32.totalorder %v6587_v63, %v10624_v14  ;;  %5296 = vmatpush3.bf16.msra.mxu1 %v5674_v2  ;;  %v5676_v14 = vld [vmem:[%s10235_s1 + $0xa0] sm:$0xff]   ;;  %5640 = vset.pattern.permute.xlu0 %v10478_v61 }
 0x1ed   : > { %vm7389_vm9 = vmor %vm349_vm6, %vm509_vm1  ;;  %vm733_vm1 = vcmp.eq.s32.totalorder %v6587_v63, %v6472_v16  ;;  %v5677_v16 = vld [vmem:[%s10235_s1 + $0xe8] sm:$0xff]   ;;  %5297 = vmatprep.subr.bf16.mxu1 %v5675_v43  ;;  %1918 = vperm.xlu0 %5640, %v6225_v3   ;;  %v7444_v25 = vpop.permute.xlu1 %1855  ;;  %v5679_v3 = vld [vmem:[%s10235_s1 + $0xf0] sm:$0xff]  }
 0x1ee   : > { %vm781_vm4 = vmor %vm7354_vm5, %vm717_vm2  ;;  %vm514_vm5 = vcmp.eq.s32.totalorder %v6599_v58, %v6909_v44  ;;  %v7448_v34 = vpop.permute.xlu0 %1655  ;;  %v5680_v43 = vld [vmem:[%s10235_s1 + $0xb0] sm:$0xff]  }
 0x1ef   : > { %vm7405_vm11 = vmor %vm335_vm12, %vm495_vm3  ;;  %vm354_vm12 = vcmp.eq.s32.totalorder %v6599_v58, %v10654_v50  ;;  %5611 = vset.pattern.permute.xlu1 %v10466_v9  ;;  %vm738_vm3 = vcmp.eq.s32.totalorder %v6599_v58, %v6478_v18 }
 0x1f0   : > { %vm4268_vm15 = vmpackc.low %vm781_vm4, %vm7271_vm8  ;;  %5298 = vmatpush3.bf16.msra.mxu1 %v5676_v14  ;;  %2962 = vperm.xlu1 %5611, %v10657_v5   ;;  %v5681_v14 = vld [vmem:[%s10235_s1 + $0xf8] sm:$0xff]  }
 0x1f1   : > { %4269 = vmatmul.mubr.msk.bf16.gmra.mrb[20].mxu0 %vm4268_vm15, %v10516_v15  ;;  %vm797_vm6 = vmor %vm7389_vm9, %vm733_vm1  ;;  %5299 = vmatprep.subr.bf16.mxu1 %v5677_v16  ;;  %v7468_v2 = vpop.permute.xlu1 %1861  ;;  %vm719_vm1 = vcmp.eq.s32.totalorder %v6587_v63, %v10636_v23  ;;  %vm511_vm15 = vcmp.eq.s32.totalorder %v6587_v63, %v10637_v7  ;;  %v10661_v7 = vld [vmem:[#allocation51_spill] sm:$0xff]  ;;  %v10676_v16 = vmov 0 }
 0x1f2   : > { %vm4284_vm8 = vmpackc.low %vm797_vm6, %vm7311_vm0  ;;  %vm722_vm0 = vcmp.eq.s32.totalorder %v6599_v58, %v6454_v10  ;;  %1924 = vperm.xlu0 %5640, %v6237_v1   ;;  %v7477_v52 = vpop.permute.xlu0 %1661  ;;  %v10658_v1 = vld [vmem:[#allocation73_spill] sm:$0xff]  ;;  %vm735_vm6 = vcmp.eq.s32.totalorder %v6587_v63, %v10651_v31  ;;  %v10701_v31 = vld [vmem:[#allocation28_spill] sm:$0xff] }
 0x1f3   : > { %4285 = vmatmul.mubr.msk.bf16.gmra.mrb[4].mxu1 %vm4284_vm8, %v10516_v15  ;;  %vm7439_vm2 = vmor %vm7342_vm13, %vm736_vm14  ;;  %vm351_vm14 = vcmp.eq.s32.totalorder %v6587_v63, %v6433_v4 }
 0x1f4   : > { %vm578_vm9 = vmor %vm354_vm12, %vm514_vm5  ;;  %5300 = vmatpush3.bf16.msra.mxu1 %v5678_v60  ;;  %vm340_vm5 = vcmp.eq.s32.totalorder %v6599_v58, %v10658_v1  ;;  %5612 = vset.pattern.permute.xlu1 %v10478_v61  ;;  %vm500_vm12 = vcmp.eq.s32.totalorder %v6599_v58, %v10661_v7  ;;  %v10664_v60 = vld [vmem:[#allocation17_spill] sm:$0xff] }
 0x1f5   : > { %vm786_vm13 = vmor %vm7371_vm7, %vm722_vm0  ;;  %5301 = vmatprep.subr.bf16.mxu1 %v5679_v3  ;;  %3186 = vperm.xlu1 %5612, %v10657_v5   ;;  %v7515_v4 = vpop.permute.xlu1 %1867  ;;  %v10667_v5 = vld [vmem:[#allocation60_spill] sm:$0xff]  ;;  %v10705_v3 = vmov 0 }
 0x1f6   : > { %vm4270_vm4 = vmpackc.low %vm786_vm13, %vm7380_vm10  ;;  %3231 = vperm.xlu0 %5640, %v7471_v57   ;;  %v7525_v23 = vpop.permute.xlu0 %1667 }
 0x1f7   : > { %4271 = vmatprep.mubr.msk.bf16.mxu0 %vm4270_vm4, %v10516_v15  ;;  %vm802_vm7 = vmor %vm578_vm9, %vm738_vm3  ;;  %vm724_vm9 = vcmp.eq.s32.totalorder %v6599_v58, %v10664_v60  ;;  %vm497_vm3 = vcmp.eq.s32.totalorder %v6587_v63, %v6779_v45  ;;  %vm502_vm4 = vcmp.eq.s32.totalorder %v6599_v58, %v6798_v55 }
 0x1f8   : > { %vm4286_vm10 = vmpackc.low %vm802_vm7, %vm7439_vm2  ;;  %vm356_vm2 = vcmp.eq.s32.totalorder %v6599_v58, %v6439_v33  ;;  %5302 = vmatpush3.bf16.msra.mxu1 %v5680_v43  ;;  %vm337_vm7 = vcmp.eq.s32.totalorder %v6587_v63, %v10642_v42  ;;  %v10670_v43 = vld [vmem:[#allocation25_spill] sm:$0xff]  ;;  %v10703_v42 = vmov 0 }
 0x1f9   : > { %4287 = vmatprep.mubr.msk.bf16.mxu1 %vm4286_vm10, %v10516_v15  ;;  %vm7495_vm8 = vmor %vm351_vm14, %vm511_vm15  ;;  %5303 = vmatprep.subr.bf16.mxu1 %v5681_v14  ;;  %vm339_vm10 = vcmp.eq.s32.totalorder %v6587_v63, %v10658_v1  ;;  %v10673_v14 = vld [vmem:[#allocation18_spill] sm:$0xff]  ;;  %v7582_v45 = vpop.permute.xlu1 %1873 }
 0x1fa   : > { %vm7509_vm0 = vmor %vm7405_vm11, %vm719_vm1  ;;  %vm516_vm11 = vcmp.eq.s32.totalorder %v6599_v58, %v10667_v5  ;;  %vm740_vm1 = vcmp.eq.s32.totalorder %v6599_v58, %v10670_v43  ;;  %1933 = vperm.xlu0 %5640, %v6382_v21   ;;  %3189 = vperm.xlu1 %5612, %v6680_v62   ;;  %v7598_v21 = vpop.permute.xlu0 %1673  ;;  %v10680_v62 = vld [vmem:[#allocation26_spill] sm:$0xff] }
 0x1fb   : > { %vm7519_vm13 = vmor %vm340_vm5, %vm500_vm12  ;;  %vm513_vm5 = vcmp.eq.s32.totalorder %v6587_v63, %v6909_v44  ;;  %v10719_v1 = vld [vmem:[#allocation30_spill] sm:$0xff] }
 0x1fc   : > { %vm7539_vm14 = vmor %vm7495_vm8, %vm735_vm6  ;;  %vm342_vm6 = vcmp.eq.s32.totalorder %v6599_v58, %v10673_v14  ;;  %5304 = vmatpush3.bf16.msra.mxu1 %v5682_v29  ;;  %v10764_v29 = vld [vmem:[#allocation81_spill] sm:$0xff] }
 0x1fd   : > { %vm7552_vm15 = vmor %vm356_vm2, %vm516_vm11  ;;  %vm515_vm2 = vcmp.eq.s32.totalorder %v6587_v63, %v10667_v5  ;;  %v10696_v5 = vld [vmem:[#allocation27_spill] sm:$0xff] }
 0x1fe   : > { %vm7565_vm12 = vmor %vm337_vm7, %vm497_vm3  ;;  %vm353_vm3 = vcmp.eq.s32.totalorder %v6587_v63, %v10654_v50  ;;  %vm499_vm7 = vcmp.eq.s32.totalorder %v6587_v63, %v10661_v7  ;;  %3240 = vperm.xlu0 %5640, %v7585_v27   ;;  %5614 = vset.pattern.permute.xlu1 %v10431_v36 }
 0x1ff   : > { %vm7576_vm11 = vmor %vm7519_vm13, %vm724_vm9  ;;  %vm358_vm13 = vcmp.eq.s32.totalorder %v6599_v58, %v10680_v62  ;;  %2811 = vperm.xlu1 %5614, %v6707_v51  }
 0x200   : > { %v10677_v16 = vsel %vm7576_vm11, 4294967295, %v10676_v16  ;;  %vm7594_vm9 = vmor %vm342_vm6, %vm502_vm4  ;;  %vm10685_vm11 = vcmp.eq.s32.totalorder %v6587_v63, %v6439_v33  ;;  %v7643_v33 = vpop.permute.xlu1 %1879 }
 0x201   : > { %vm7607_vm8 = vmor %vm339_vm10, %vm499_vm7  ;;  %vm721_vm7 = vcmp.eq.s32.totalorder %v6587_v63, %v6454_v10  ;;  %v7649_v10 = vpop.permute.xlu0 %1679 }
 0x202   : > { %vm577_vm4 = vmor %vm353_vm3, %vm513_vm5  ;;  %vm10688_vm5 = vcmp.eq.s32.totalorder %v6599_v58, %v6949_v48  ;;  %1942 = vperm.xlu0 %5640, %v6273_v13   ;;  %v10693_v13 = vld [vmem:[#allocation68_spill] sm:$0xff] }
 0x203   : > { %vm7619_vm6 = vmor %vm7552_vm15, %vm740_vm1  ;;  %vm737_vm15 = vcmp.eq.s32.totalorder %v6587_v63, %v6478_v18  ;;  %5615 = vset.pattern.permute.xlu1 %v10466_v9 }
 0x204   : > { %vm7626_vm10 = vmor %vm10685_vm11, %vm515_vm2  ;;  %v7663_v18 = vpop.permute.xlu1 %1885  ;;  %2968 = vperm.xlu1 %5615, %v10693_v13  }
 0x205   : > { %vm7635_vm3 = vmor %vm358_vm13, %vm10688_vm5  ;;  %vm742_vm5 = vcmp.eq.s32.totalorder %v6599_v58, %v6484_v20  ;;  %v7671_v7 = vpop.permute.xlu0 %1685 }
 0x206   : > { %vm785_vm1 = vmor %vm7565_vm12, %vm721_vm7  ;;  %vm726_vm12 = vcmp.eq.s32.totalorder %v6599_v58, %v6460_v12  ;;  %vm359_vm7 = vcmp.eq.s32.totalorder %v6587_v63, %v6445_v53 }
 0x207   : > { %vm4272_vm2 = vmpackc.low %vm785_vm1, %vm7509_vm0 }
 0x208   : > { %4273 = vmatmul.mubr.msk.bf16.gmra.mrb[24].mxu0 %vm4272_vm2, %v10516_v15  ;;  %vm801_vm11 = vmor %vm577_vm4, %vm737_vm15  ;;  %vm360_vm4 = vcmp.eq.s32.totalorder %v6599_v58, %v6445_v53  ;;  %vm519_vm15 = vcmp.eq.s32.totalorder %v6587_v63, %v10692_v19  ;;  %v7701_v54 = vpop.permute.xlu1 %1891  ;;  %v10699_v53 = vmov 0  ;;  %5616 = vset.pattern.permute.xlu1 %v10478_v61 }
 0x209   : > { %vm4288_vm13 = vmpackc.low %vm801_vm11, %vm7539_vm14  ;;  %vm10691_vm14 = vnez %v10677_v16  ;;  %vm739_vm11 = vcmp.eq.s32.totalorder %v6587_v63, %v10670_v43  ;;  %v7735_v16 = vpop.permute.xlu0 %1691  ;;  %3192 = vperm.xlu1 %5616, %v10693_v13   ;;  %v10768_v43 = vld [vmem:[#allocation35_spill] sm:$0xff]  ;;  %v10789_v13 = vld [vmem:[#allocation76_spill] sm:$0xff] }
 0x20a   : > { %4289 = vmatmul.mubr.msk.bf16.gmra.mrb[8].mxu1 %vm4288_vm13, %v10516_v15  ;;  %vm790_vm0 = vmor %vm7594_vm9, %vm726_vm12  ;;  %vm723_vm9 = vcmp.eq.s32.totalorder %v6587_v63, %v10664_v60  ;;  %vm520_vm12 = vcmp.eq.s32.totalorder %v6599_v58, %v10692_v19  ;;  %v10702_v60 = vld [vmem:[#allocation64_spill] sm:$0xff] }
 0x20b   : > { %vm4274_vm1 = vmpackc.low %vm790_vm0, %vm10691_vm14  ;;  %vm522_vm14 = vcmp.eq.s32.totalorder %v6599_v58, %v6996_v41 }
 0x20c   : > { %4275 = vmatprep.mubr.msk.bf16.mxu0 %vm4274_vm1, %v10516_v15  ;;  %vm806_vm2 = vmor %vm7635_vm3, %vm742_vm5  ;;  %vm744_vm3 = vcmp.eq.s32.totalorder %v6599_v58, %v10696_v5 }
 0x20d   : > { %vm7689_vm13 = vmor %vm359_vm7, %vm519_vm15  ;;  %vm364_vm7 = vcmp.eq.s32.totalorder %v6599_v58, %v6451_v35  ;;  %vm362_vm15 = vcmp.eq.s32.totalorder %v6599_v58, %v10701_v31  ;;  %3195 = vperm.xlu1 %5616, %v6707_v51   ;;  %v10713_v51 = vld [vmem:[#allocation67_spill] sm:$0xff] }
 0x20e   : > { %vm4290_vm0 = vmpackc.low %vm806_vm2, %vm7619_vm6 }
 0x20f   : > { %vm584_vm5 = vmor %vm360_vm4, %vm520_vm12  ;;  %4291 = vmatprep.mubr.msk.bf16.mxu1 %vm4290_vm0, %v10516_v15  ;;  %vm501_vm4 = vcmp.eq.s32.totalorder %v6587_v63, %v6798_v55 }
 0x210   : > { %vm7712_vm6 = vmor %vm7607_vm8, %vm723_vm9  ;;  %vm524_vm8 = vcmp.eq.s32.totalorder %v6599_v58, %v10702_v60  ;;  %vm517_vm9 = vcmp.eq.s32.totalorder %v6587_v63, %v6949_v48  ;;  %v7746_v48 = vpop.permute.xlu1 %1897 }
 0x211   : > { %vm7720_vm1 = vmor %vm7626_vm10, %vm739_vm11  ;;  %vm341_vm10 = vcmp.eq.s32.totalorder %v6587_v63, %v10673_v14  ;;  %vm363_vm11 = vcmp.eq.s32.totalorder %v6587_v63, %v6451_v35  ;;  %5617 = vset.pattern.permute.xlu1 %v10431_v36 }
 0x212   : > { %v10700_v53 = vsel %vm7720_vm1, 4294967295, %v10699_v53  ;;  %vm7731_vm2 = vmor %vm584_vm5, %vm744_vm3  ;;  %vm357_vm3 = vcmp.eq.s32.totalorder %v6587_v63, %v10680_v62  ;;  %vm746_vm1 = vcmp.eq.s32.totalorder %v6599_v58, %v6490_v22  ;;  %v7778_v62 = vpop.permute.xlu0 %1697  ;;  %2817 = vperm.xlu1 %5617, %v6734_v11  }
 0x213   : > { %v10704_v42 = vsel %vm7731_vm2, 4294967295, %v10703_v42  ;;  %vm7742_vm12 = vmor %vm364_vm7, %vm524_vm8  ;;  %vm523_vm2 = vcmp.eq.s32.totalorder %v6587_v63, %v10702_v60  ;;  %vm743_vm8 = vcmp.eq.s32.totalorder %v6587_v63, %v10696_v5  ;;  %v10731_v5 = vld [vmem:[#allocation69_spill] sm:$0xff] }
 0x214   : > { %v10706_v3 = vsel %vm7742_vm12, 4294967295, %v10705_v3  ;;  %vm586_vm0 = vmor %vm362_vm15, %vm522_vm14  ;;  %vm725_vm15 = vcmp.eq.s32.totalorder %v6587_v63, %v6460_v12  ;;  %v7770_v14 = vpop.permute.xlu1 %1903 }
 0x215   : > { %vm565_vm5 = vmor %vm341_vm10, %vm501_vm4 }
 0x216   : > { %vm581_vm7 = vmor %vm357_vm3, %vm517_vm9  ;;  %vm368_vm9 = vcmp.eq.s32.totalorder %v6599_v58, %v6457_v37  ;;  %vm528_vm3 = vcmp.eq.s32.totalorder %v6599_v58, %v10713_v51  ;;  %v7845_v44 = vpop.permute.xlu0 %1703  ;;  %5618 = vset.pattern.permute.xlu1 %v10466_v9 }
 0x217   : > { %vm7759_vm14 = vmor %vm363_vm11, %vm523_vm2  ;;  %vm741_vm2 = vcmp.eq.s32.totalorder %v6587_v63, %v6484_v20  ;;  %v10715_v20 = vld [vmem:[#allocation29_spill] sm:$0xff]  ;;  %2974 = vperm.xlu1 %5618, %v6968_v40  }
 0x218   : > { %vm7765_vm12 = vmor %vm586_vm0, %vm746_vm1  ;;  %vm521_vm1 = vcmp.eq.s32.totalorder %v6587_v63, %v6996_v41  ;;  %v7815_v50 = vpop.permute.xlu1 %1909  ;;  %v10761_v41 = vld [vmem:[#allocation20_spill] sm:$0xff] }
 0x219   : > { %vm789_vm4 = vmor %vm565_vm5, %vm725_vm15  ;;  %vm10714_vm5 = vnez %v10700_v53 }
 0x21a   : > { %vm4276_vm10 = vmpackc.low %vm789_vm4, %vm7712_vm6  ;;  %vm526_vm6 = vcmp.eq.s32.totalorder %v6599_v58, %v7057_v56  ;;  %v7901_v60 = vpop.permute.xlu0 %1709 }
 0x21b   : > { %4277 = vmatmul.mubr.msk.bf16.gmra.mrb[28].mxu0 %vm4276_vm10, %v10516_v15  ;;  %vm805_vm11 = vmor %vm581_vm7, %vm741_vm2  ;;  %vm361_vm7 = vcmp.eq.s32.totalorder %v6587_v63, %v10701_v31  ;;  %vm10718_vm2 = vnez %v10704_v42  ;;  %v10735_v31 = vld [vmem:[#allocation32_spill] sm:$0xff]  ;;  %10736 = vst [vmem:[#allocation72_spill] sm:$0xff] %v7901_v60  ;;  %5619 = vset.pattern.permute.xlu1 %v10478_v61 }
 0x21c   : > { %vm7785_vm0 = vmor %vm7689_vm13, %vm743_vm8  ;;  %vm748_vm13 = vcmp.eq.s32.totalorder %v6599_v58, %v10715_v20  ;;  %vm367_vm8 = vcmp.eq.s32.totalorder %v6587_v63, %v6457_v37  ;;  %3198 = vperm.xlu1 %5619, %v6968_v40   ;;  %v10760_v37 = vld [vmem:[#allocation38_spill] sm:$0xff] }
 0x21d   : > { %vm4292_vm15 = vmpackc.low %vm805_vm11, %vm10714_vm5  ;;  %vm366_vm11 = vcmp.eq.s32.totalorder %v6599_v58, %v10719_v1  ;;  %vm747_vm5 = vcmp.eq.s32.totalorder %v6587_v63, %v10715_v20 }
 0x21e   : > { %vm7805_vm4 = vmor %vm368_vm9, %vm528_vm3  ;;  %4293 = vmatmul.mubr.msk.bf16.gmra.mrb[12].mxu1 %vm4292_vm15, %v10516_v15  ;;  %vm527_vm3 = vcmp.eq.s32.totalorder %v6587_v63, %v10713_v51  ;;  %v10754_v51 = vld [vmem:[#allocation57_spill] sm:$0xff] }
 0x21f   : > { %vm4294_vm10 = vmpackc.low %vm7765_vm12, %vm10718_vm2  ;;  %vm745_vm2 = vcmp.eq.s32.totalorder %v6587_v63, %v6490_v22  ;;  %v7854_v22 = vpop.permute.xlu1 %1915 }
 0x220   : > { %vm585_vm9 = vmor %vm361_vm7, %vm521_vm1  ;;  %4295 = vmatprep.mubr.msk.bf16.mxu1 %vm4294_vm10, %v10516_v15  ;;  %vm10722_vm1 = vnez %v10706_v3  ;;  %vm372_vm10 = vcmp.eq.s32.totalorder %v6599_v58, %v6463_v38  ;;  %3201 = vperm.xlu1 %5619, %v6734_v11   ;;  %v7945_v3 = vpop.permute.xlu0 %1715  ;;  %v10747_v11 = vld [vmem:[#allocation34_spill] sm:$0xff] }
 0x221   : > { %vm590_vm12 = vmor %vm366_vm11, %vm526_vm6  ;;  %vm750_vm6 = vcmp.eq.s32.totalorder %v6599_v58, %v6496_v24  ;;  %vm525_vm11 = vcmp.eq.s32.totalorder %v6587_v63, %v7057_v56  ;;  %v10732_v56 = vld [vmem:[#allocation31_spill] sm:$0xff]  ;;  %10745 = vst [vmem:[#allocation21_spill] sm:$0xff] %v7945_v3  ;;  %v10856_v3 = vmov 0 }
 0x222   : > { %vm7830_vm15 = vmor %vm367_vm8, %vm527_vm3  ;;  %vm532_vm3 = vcmp.eq.s32.totalorder %v6599_v58, %v10731_v5 }
 0x223   : > { %vm7841_vm7 = vmor %vm10722_vm1, %vm748_vm13  ;;  %v7894_v53 = vpop.permute.xlu1 %1921 }
 0x224   : > { %vm7849_vm8 = vmor %vm585_vm9, %vm745_vm2  ;;  %5620 = vset.pattern.permute.xlu1 %v10431_v36  ;;  %v7972_v12 = vpop.permute.xlu0 %2941 }
 0x225   : > { %vm7858_vm13 = vmor %vm590_vm12, %vm750_vm6  ;;  %vm371_vm12 = vcmp.eq.s32.totalorder %v6587_v63, %v6463_v38  ;;  %2823 = vperm.xlu1 %5620, %v6762_v46   ;;  %v10799_v38 = vld [vmem:[#allocation19_spill] sm:$0xff] }
 0x226   : > { %vm7867_vm9 = vmor %vm7759_vm14, %vm747_vm5  ;;  %vm365_vm14 = vcmp.eq.s32.totalorder %v6587_v63, %v10719_v1  ;;  %v10757_v1 = vld [vmem:[#allocation54_spill] sm:$0xff] }
 0x227   : > { %vm4296_vm1 = vmpackc.low %vm7849_vm8, %vm7785_vm0  ;;  %vm370_vm0 = vcmp.eq.s32.totalorder %v6599_v58, %v10735_v31  ;;  %vm531_vm8 = vcmp.eq.s32.totalorder %v6587_v63, %v10731_v5  ;;  %v7930_v40 = vpop.permute.xlu1 %2781  ;;  %v10765_v5 = vld [vmem:[#allocation83_spill] sm:$0xff] }
 0x228   : > { %vm7885_vm6 = vmor %vm372_vm10, %vm532_vm3  ;;  %4297 = vmatmul.mubr.msk.bf16.gmra.mrb[16].mxu1 %vm4296_vm1, %v10516_v15  ;;  %vm749_vm3 = vcmp.eq.s32.totalorder %v6587_v63, %v6496_v24  ;;  %vm754_vm1 = vcmp.eq.s32.totalorder %v6599_v58, %v6502_v26  ;;  %v8021_v19 = vpop.permute.xlu0 %2947  ;;  %v10775_v24 = vld [vmem:[#allocation74_spill] sm:$0xff] }
 0x229   : > { %vm4298_vm2 = vmpackc.low %vm7858_vm13, %vm7841_vm7  ;;  %vm10739_vm7 = vcmp.eq.s32.totalorder %v6599_v58, %v7136_v30  ;;  %5621 = vset.pattern.permute.xlu1 %v10466_v9 }
 0x22a   : > { %vm589_vm5 = vmor %vm365_vm14, %vm525_vm11  ;;  %4299 = vmatprep.mubr.msk.bf16.mxu1 %vm4298_vm2, %v10516_v15  ;;  %vm751_vm11 = vcmp.eq.s32.totalorder %v6587_v63, %v10732_v56  ;;  %vm10740_vm2 = vcmp.eq.s32.totalorder %v6599_v58, %v10732_v56  ;;  %2980 = vperm.xlu1 %5621, %v10757_v1   ;;  %v10817_v56 = vld [vmem:[#allocation39_spill] sm:$0xff] }
 0x22b   : > { %vm7907_vm10 = vmor %vm371_vm12, %vm531_vm8  ;;  %vm529_vm8 = vcmp.eq.s32.totalorder %v6587_v63, %v7136_v30  ;;  %v10746_v30 = vld [vmem:[#allocation33_spill] sm:$0xff]  ;;  %v7960_v35 = vpop.permute.xlu1 %2938 }
 0x22c   : > { %vm594_vm13 = vmor %vm370_vm0, %vm10739_vm7 }
 0x22d   : > { %vm7924_vm12 = vmor %vm7805_vm4, %vm10740_vm2  ;;  %vm534_vm4 = vcmp.eq.s32.totalorder %v6599_v58, %v7174_v6 }
 0x22e   : > { %vm813_vm14 = vmor %vm589_vm5, %vm749_vm3  ;;  %vm756_vm3 = vcmp.eq.s32.totalorder %v6599_v58, %v10746_v30  ;;  %5622 = vset.pattern.permute.xlu1 %v10478_v61 }
 0x22f   : > { %vm818_vm0 = vmor %vm594_vm13, %vm754_vm1  ;;  %vm369_vm13 = vcmp.eq.s32.totalorder %v6587_v63, %v10735_v31  ;;  %v8004_v17 = vpop.permute.xlu1 %3162  ;;  %3204 = vperm.xlu1 %5622, %v10757_v1   ;;  %v10820_v31 = vld [vmem:[#allocation78_spill] sm:$0xff] }
 0x230   : > { %vm7936_vm7 = vmor %vm7830_vm15, %vm751_vm11  ;;  %vm374_vm11 = vcmp.eq.s32.totalorder %v6599_v58, %v10747_v11 }
 0x231   : > { %vm4300_vm5 = vmpackc.low %vm813_vm14, %vm7867_vm9  ;;  %vm755_vm9 = vcmp.eq.s32.totalorder %v6587_v63, %v10746_v30  ;;  %vm753_vm14 = vcmp.eq.s32.totalorder %v6587_v63, %v6502_v26  ;;  %v10776_v30 = vld [vmem:[#allocation5_spill] sm:$0xff]  ;;  %v10779_v26 = vmov 0 }
 0x232   : > { %4301 = vmatmul.mubr.msk.bf16.gmra.mrb[20].mxu1 %vm4300_vm5, %v10516_v15  ;;  %vm4302_vm15 = vmpackc.low %vm818_vm0, %vm7924_vm12  ;;  %vm533_vm12 = vcmp.eq.s32.totalorder %v6587_v63, %v7174_v6  ;;  %vm373_vm5 = vcmp.eq.s32.totalorder %v6587_v63, %v10747_v11  ;;  %v8077_v11 = vpop.permute.xlu0 %2953  ;;  %v10806_v6 = vld [vmem:[#allocation77_spill] sm:$0xff] }
 0x233   : > { %vm593_vm2 = vmor %vm369_vm13, %vm529_vm8  ;;  %4303 = vmatprep.mubr.msk.bf16.mxu1 %vm4302_vm15, %v10516_v15  ;;  %vm758_vm8 = vcmp.eq.s32.totalorder %v6599_v58, %v6508_v28  ;;  %vm1720_vm15 = vcmp.eq.s32.totalorder %v6587_v63, %v10754_v51  ;;  %3207 = vperm.xlu1 %5622, %v6762_v46   ;;  %v10783_v46 = vld [vmem:[#allocation36_spill] sm:$0xff] }
 0x234   : > { %vm598_vm1 = vmor %vm374_vm11, %vm534_vm4 }
 0x235   : > { %vm7968_vm0 = vmor %vm7885_vm6, %vm756_vm3  ;;  %vm1560_vm3 = vcmp.eq.s32.totalorder %v6587_v63, %v6470_v39 }
 0x236   : > { %vm817_vm4 = vmor %vm593_vm2, %vm753_vm14  ;;  %vm1561_vm2 = vcmp.eq.s32.totalorder %v6599_v58, %v6470_v39  ;;  %v8130_v20 = vpop.permute.xlu0 %2959  ;;  %v10786_v39 = vld [vmem:[#allocation75_spill] sm:$0xff] }
 0x237   : > { %vm7979_vm13 = vmor %vm598_vm1, %vm758_vm8  ;;  %vm1721_vm1 = vcmp.eq.s32.totalorder %v6599_v58, %v10754_v51  ;;  %vm757_vm8 = vcmp.eq.s32.totalorder %v6587_v63, %v6508_v28  ;;  %v8041_v28 = vpop.permute.xlu1 %3165  ;;  %5623 = vset.pattern.permute.xlu1 %v10431_v36  ;;  %v10833_v51 = vld [vmem:[#allocation14_spill] sm:$0xff] }
 0x238   : > { %vm7985_vm6 = vmor %vm7907_vm10, %vm755_vm9 }
 0x239   : > { %vm7993_vm11 = vmor %vm373_vm5, %vm533_vm12  ;;  %vm1723_vm12 = vcmp.eq.s32.totalorder %v6599_v58, %v10761_v41  ;;  %vm1563_vm5 = vcmp.eq.s32.totalorder %v6599_v58, %v10764_v29 }
 0x23a   : > { %vm4304_vm10 = vmpackc.low %vm817_vm4, %vm7936_vm7  ;;  %vm1725_vm7 = vcmp.eq.s32.totalorder %v6599_v58, %v10760_v37  ;;  %vm1947_vm4 = vcmp.eq.s32.totalorder %v6599_v58, %v7401_v8  ;;  %v8183_v42 = vpop.permute.xlu0 %2965 }
 0x23b   : > { %4305 = vmatmul.mubr.msk.bf16.gmra.mrb[24].mxu1 %vm4304_vm10, %v10516_v15  ;;  %vm4306_vm9 = vmpackc.low %vm7979_vm13, %vm7968_vm0  ;;  %vm1565_vm13 = vcmp.eq.s32.totalorder %v6599_v58, %v10765_v5  ;;  %v8086_v55 = vpop.permute.xlu1 %2787 }
 0x23c   : > { %vm8012_vm14 = vmor %vm1560_vm3, %vm1720_vm15  ;;  %4307 = vmatprep.mubr.msk.bf16.mxu1 %vm4306_vm9, %v10516_v15  ;;  %vm1944_vm15 = vcmp.eq.s32.totalorder %v6587_v63, %v10768_v43  ;;  %vm1945_vm9 = vcmp.eq.s32.totalorder %v6599_v58, %v10768_v43 }
 0x23d   : > { %vm8025_vm0 = vmor %vm1561_vm2, %vm1721_vm1 }
 0x23e   : > { %vm8037_vm3 = vmor %vm7993_vm11, %vm757_vm8  ;;  %vm1724_vm8 = vcmp.eq.s32.totalorder %v6587_v63, %v10760_v37  ;;  %v10787_v37 = vld [vmem:[#allocation6_spill] sm:$0xff] }
 0x23f   : > { %vm8045_vm2 = vmor %vm1565_vm13, %vm1725_vm7  ;;  %vm1566_vm7 = vcmp.eq.s32.totalorder %v6587_v63, %v10775_v24  ;;  %vm1567_vm13 = vcmp.eq.s32.totalorder %v6599_v58, %v10775_v24  ;;  %v8133_v1 = vpop.permute.xlu1 %2944  ;;  %v10823_v24 = vld [vmem:[#allocation42_spill] sm:$0xff] }
 0x240   : > { %vm1787_vm1 = vmor %vm1563_vm5, %vm1723_vm12  ;;  %vm1726_vm12 = vcmp.eq.s32.totalorder %v6587_v63, %v10776_v30 }
 0x241   : > { %vm8052_vm10 = vmor %vm8012_vm14, %vm1944_vm15  ;;  %vm1946_vm15 = vcmp.eq.s32.totalorder %v6587_v63, %v7401_v8  ;;  %v10777_v8 = vmov 0 }
 0x242   : > { %vm8056_vm11 = vmor %vm1787_vm1, %vm1947_vm4  ;;  %vm1722_vm4 = vcmp.eq.s32.totalorder %v6587_v63, %v10761_v41  ;;  %vm1727_vm1 = vcmp.eq.s32.totalorder %v6599_v58, %v10776_v30  ;;  %v10788_v41 = vld [vmem:[#allocation8_spill] sm:$0xff]  ;;  %v10846_v30 = vld [vmem:[#allocation79_spill] sm:$0xff] }
 0x243   : > { %vm4308_vm14 = vmpackc.low %vm8037_vm3, %vm7985_vm6  ;;  %vm1562_vm3 = vcmp.eq.s32.totalorder %v6587_v63, %v10764_v29  ;;  %2829 = vperm.xlu1 %5623, %v10788_v41   ;;  %v10790_v29 = vld [vmem:[#allocation85_spill] sm:$0xff]  ;;  %v8173_v43 = vpop.permute.xlu1 %3168 }
 0x244   : > { %vm2009_vm5 = vmor %vm8025_vm0, %vm1945_vm9  ;;  %4309 = vmatmul.mubr.msk.bf16.gmra.mrb[28].mxu1 %vm4308_vm14, %v10516_v15  ;;  %vm1564_vm0 = vcmp.eq.s32.totalorder %v6587_v63, %v10765_v5  ;;  %v10818_v5 = vld [vmem:[#allocation89_spill] sm:$0xff] }
 0x245   : > { %vm4454_vm6 = vmpackc.low %vm8056_vm11, %vm2009_vm5 }
 0x246   : > { %vm8097_vm9 = vmor %vm1566_vm7, %vm1726_vm12  ;;  %4455 = vmatprep.mubr.msk.bf16.mxu1 %vm4454_vm6, %v10516_v15  ;;  %vm1949_vm7 = vcmp.eq.s32.totalorder %v6599_v58, %v7444_v25 }
 0x247   : > { %v10778_v8 = vsel %vm8097_vm9, 4294967295, %v10777_v8  ;;  %vm8106_vm11 = vmor %vm1564_vm0, %vm1724_vm8  ;;  %vm1951_vm8 = vcmp.eq.s32.totalorder %v6599_v58, %v10783_v46  ;;  %vm1729_vm0 = vcmp.eq.s32.totalorder %v6599_v58, %v7292_v32  ;;  %vm1575_vm9 = vcmp.eq.s32.totalorder %v6599_v58, %v10789_v13  ;;  %5624 = vset.pattern.permute.xlu1 %v10466_v9 }
 0x248   : > { %v10780_v26 = vsel %vm8106_vm11, 4294967295, %v10779_v26  ;;  %vm1786_vm14 = vmor %vm1562_vm3, %vm1722_vm4  ;;  %vm1570_vm4 = vcmp.eq.s32.totalorder %v6587_v63, %v10786_v39  ;;  %2986 = vperm.xlu1 %5624, %v10799_v38  }
 0x249   : > { %vm8115_vm12 = vmor %vm1786_vm14, %vm1946_vm15  ;;  %vm1730_vm15 = vcmp.eq.s32.totalorder %v6587_v63, %v10787_v37  ;;  %vm1948_vm14 = vcmp.eq.s32.totalorder %v6587_v63, %v7444_v25  ;;  %v10795_v25 = vld [vmem:[#allocation40_spill] sm:$0xff] }
 0x24a   : > { %vm1791_vm5 = vmor %vm1567_vm13, %vm1727_vm1  ;;  %vm1571_vm13 = vcmp.eq.s32.totalorder %v6599_v58, %v10786_v39  ;;  %v8238_v39 = vpop.permute.xlu0 %2971 }
 0x24b   : > { %vm8126_vm6 = vmor %vm8045_vm2, %vm1949_vm7  ;;  %vm1731_vm2 = vcmp.eq.s32.totalorder %v6599_v58, %v10787_v37  ;;  %v10832_v37 = vld [vmem:[#allocation41_spill] sm:$0xff] }
 0x24c   : > { %vm4456_vm3 = vmpackc.low %vm8115_vm12, %vm8052_vm10  ;;  %vm1569_vm10 = vcmp.eq.s32.totalorder %v6599_v58, %v10790_v29  ;;  %5625 = vset.pattern.permute.xlu1 %v10478_v61 }
 0x24d   : > { %vm2015_vm1 = vmor %vm1791_vm5, %vm1951_vm8  ;;  %4457 = vmatmul.mubr.msk.bf16.vlgmr.msra.gmra.mrb[32].mxu1 %vm4456_vm3, %v10516_v15  ;;  %vm1735_vm5 = vcmp.eq.s32.totalorder %v6599_v58, %v10795_v25  ;;  %vm10802_vm3 = vnez %v10778_v8  ;;  %v8206_v8 = vpop.permute.xlu1 %3171  ;;  %3210 = vperm.xlu1 %5625, %v10799_v38   ;;  %v5723_v38 = vld [vmem:[%s5888_s27 + $0xf8] sm:$0xff] }
 0x24e   : > { %vm4458_vm7 = vmpackc.low %vm2015_vm1, %vm8126_vm6  ;;  %vm1953_vm6 = vcmp.eq.s32.totalorder %v6599_v58, %v7468_v2 }
 0x24f   : > { %vm8159_vm12 = vmor %vm1570_vm4, %vm1730_vm15  ;;  %4459 = vmatprep.mubr.msk.bf16.mxu1 %vm4458_vm7, %v10516_v15  ;;  %vm1950_vm4 = vcmp.eq.s32.totalorder %v6587_v63, %v10783_v46  ;;  %vm1574_vm7 = vcmp.eq.s32.totalorder %v6587_v63, %v10789_v13  ;;  %v10807_v46 = vld [vmem:[#allocation87_spill] sm:$0xff]  ;;  %v10835_v13 = vmov 0 }
 0x250   : > { %vm8163_vm11 = vmor %vm1571_vm13, %vm1731_vm2  ;;  %vm10796_vm13 = vnez %v10780_v26  ;;  %v10805_v26 = vld [vmem:[#allocation37_spill] sm:$0xff] }
 0x251   : > { %vm1793_vm8 = vmor %vm1569_vm10, %vm1729_vm0  ;;  %vm1734_vm10 = vcmp.eq.s32.totalorder %v6587_v63, %v10795_v25  ;;  %3213 = vperm.xlu1 %5625, %v10788_v41   ;;  %v8278_v41 = vpop.permute.xlu0 %2977  ;;  %v10819_v25 = vld [vmem:[#allocation59_spill] sm:$0xff] }
 0x252   : > { %vm8179_vm15 = vmor %vm10796_vm13, %vm1948_vm14  ;;  %vm1955_vm14 = vcmp.eq.s32.totalorder %v6599_v58, %v10805_v26  ;;  %vm1952_vm13 = vcmp.eq.s32.totalorder %v6587_v63, %v7468_v2  ;;  %v10810_v2 = vld [vmem:[#allocation7_spill] sm:$0xff] }
 0x253   : > { %vm8186_vm2 = vmor %vm1575_vm9, %vm1735_vm5  ;;  %vm1728_vm9 = vcmp.eq.s32.totalorder %v6587_v63, %v7292_v32  ;;  %v8251_v32 = vpop.permute.xlu1 %2793 }
 0x254   : > { %vm2014_vm0 = vmor %vm10802_vm3, %vm1950_vm4  ;;  %vm1568_vm4 = vcmp.eq.s32.totalorder %v6587_v63, %v10790_v29  ;;  %vm1579_vm3 = vcmp.eq.s32.totalorder %v6599_v58, %v10806_v6  ;;  %v10858_v29 = vld [vmem:[#allocation43_spill] sm:$0xff] }
 0x255   : > { %vm8192_vm1 = vmor %vm1793_vm8, %vm1953_vm6  ;;  %vm1733_vm8 = vcmp.eq.s32.totalorder %v6599_v58, %v7358_v59  ;;  %5626 = vset.pattern.permute.xlu1 %v10431_v36 }
 0x256   : > { %vm4460_vm5 = vmpackc.low %vm2014_vm0, %vm8179_vm15  ;;  %2835 = vperm.xlu1 %5626, %v10819_v25  }
 0x257   : > { %vm2019_vm6 = vmor %vm8163_vm11, %vm1955_vm14  ;;  %4461 = vmatmul.mubr.msk.bf16.gmra.mrb[36].mxu1 %vm4460_vm5, %v10516_v15  ;;  %vm1573_vm11 = vcmp.eq.s32.totalorder %v6599_v58, %v10807_v46  ;;  %vm1739_vm14 = vcmp.eq.s32.totalorder %v6599_v58, %v10810_v2 }
 0x258   : > { %vm4462_vm15 = vmpackc.low %vm2019_vm6, %vm8192_vm1 }
 0x259   : > { %vm8228_vm0 = vmor %vm1574_vm7, %vm1734_vm10  ;;  %4463 = vmatprep.mubr.msk.bf16.mxu1 %vm4462_vm15, %v10516_v15  ;;  %vm1957_vm7 = vcmp.eq.s32.totalorder %v6599_v58, %v7515_v4  ;;  %vm1954_vm10 = vcmp.eq.s32.totalorder %v6587_v63, %v10805_v26  ;;  %vm1732_vm15 = vcmp.eq.s32.totalorder %v6587_v63, %v7358_v59  ;;  %v8288_v59 = vpop.permute.xlu1 %2950  ;;  %v10847_v26 = vld [vmem:[#allocation9_spill] sm:$0xff] }
 0x25a   : > { %vm1792_vm1 = vmor %vm1568_vm4, %vm1728_vm9  ;;  %5627 = vset.pattern.permute.xlu1 %v10466_v9 }
 0x25b   : > { %vm1797_vm5 = vmor %vm1573_vm11, %vm1733_vm8  ;;  %vm1578_vm11 = vcmp.eq.s32.totalorder %v6587_v63, %v10806_v6  ;;  %v10828_v6 = vmov 0  ;;  %2992 = vperm.xlu1 %5627, %v10833_v51  }
 0x25c   : > { %vm8247_vm6 = vmor %vm1792_vm1, %vm1952_vm13  ;;  %vm1959_vm13 = vcmp.eq.s32.totalorder %v6599_v58, %v10817_v56 }
 0x25d   : > { %vm8253_vm9 = vmor %vm1579_vm3, %vm1739_vm14  ;;  %vm1737_vm14 = vcmp.eq.s32.totalorder %v6599_v58, %v7413_v0 }
 0x25e   : > { %vm2018_vm4 = vmor %vm8159_vm12, %vm1954_vm10  ;;  %vm1738_vm12 = vcmp.eq.s32.totalorder %v6587_v63, %v10810_v2  ;;  %v8336_v2 = vpop.permute.xlu0 %2983 }
 0x25f   : > { %vm8260_vm8 = vmor %vm1797_vm5, %vm1957_vm7  ;;  %vm1572_vm5 = vcmp.eq.s32.totalorder %v6587_v63, %v10807_v46  ;;  %vm1956_vm7 = vcmp.eq.s32.totalorder %v6587_v63, %v7515_v4  ;;  %v8339_v4 = vpop.permute.xlu1 %3174  ;;  %5628 = vset.pattern.permute.xlu1 %v10478_v61 }
 0x260   : > { %vm4464_vm3 = vmpackc.low %vm2018_vm4, %vm8247_vm6  ;;  %vm1583_vm4 = vcmp.eq.s32.totalorder %v6599_v58, %v10820_v31  ;;  %3216 = vperm.xlu1 %5628, %v10833_v51  }
 0x261   : > { %vm2023_vm1 = vmor %vm8186_vm2, %vm1959_vm13  ;;  %4465 = vmatmul.mubr.msk.bf16.gmra.mrb[40].mxu1 %vm4464_vm3, %v10516_v15  ;;  %vm1577_vm2 = vcmp.eq.s32.totalorder %v6599_v58, %v10818_v5  ;;  %vm1743_vm13 = vcmp.eq.s32.totalorder %v6599_v58, %v10823_v24  ;;  %vm1961_vm3 = vcmp.eq.s32.totalorder %v6599_v58, %v7582_v45 }
 0x262   : > { %vm4466_vm10 = vmpackc.low %vm2023_vm1, %vm8260_vm8  ;;  %vm1958_vm1 = vcmp.eq.s32.totalorder %v6587_v63, %v10817_v56  ;;  %v8416_v46 = vpop.permute.xlu0 %2989 }
 0x263   : > { %vm1796_vm6 = vmor %vm1572_vm5, %vm1732_vm15  ;;  %4467 = vmatprep.mubr.msk.bf16.mxu1 %vm4466_vm10, %v10516_v15  ;;  %vm1742_vm10 = vcmp.eq.s32.totalorder %v6587_v63, %v10823_v24  ;;  %v8382_v56 = vpop.permute.xlu1 %3177 }
 0x264   : > { %vm8302_vm8 = vmor %vm1578_vm11, %vm1738_vm12  ;;  %3219 = vperm.xlu1 %5628, %v10819_v25   ;;  %v10891_v25 = vmov 0 }
 0x265   : > { %vm1801_vm15 = vmor %vm1577_vm2, %vm1737_vm14  ;;  %vm1736_vm2 = vcmp.eq.s32.totalorder %v6587_v63, %v7413_v0  ;;  %v10834_v0 = vld [vmem:[#allocation91_spill] sm:$0xff] }
 0x266   : > { %vm8318_vm11 = vmor %vm1796_vm6, %vm1956_vm7  ;;  %vm1582_vm7 = vcmp.eq.s32.totalorder %v6587_v63, %v10820_v31  ;;  %v10841_v31 = vmov 0 }
 0x267   : > { %vm8324_vm12 = vmor %vm8228_vm0, %vm1958_vm1  ;;  %vm1963_vm0 = vcmp.eq.s32.totalorder %v6599_v58, %v10832_v37 }
 0x268   : > { %vm8328_vm14 = vmor %vm1583_vm4, %vm1743_vm13  ;;  %vm1581_vm13 = vcmp.eq.s32.totalorder %v6599_v58, %v10834_v0  ;;  %5629 = vset.pattern.permute.xlu1 %v10431_v36 }
 0x269   : > { %v10829_v6 = vsel %vm8328_vm14, 4294967295, %v10828_v6  ;;  %vm8332_vm5 = vmor %vm1801_vm15, %vm1961_vm3  ;;  %vm1576_vm3 = vcmp.eq.s32.totalorder %v6587_v63, %v10818_v5  ;;  %v10839_v5 = vld [vmem:[#allocation98_spill] sm:$0xff] }
 0x26a   : > { %vm4468_vm6 = vmpackc.low %vm8324_vm12, %vm8318_vm11  ;;  %vm3033_vm11 = vcmp.eq.s32.totalorder %v6587_v63, %v7960_v35  ;;  %vm1580_vm12 = vcmp.eq.s32.totalorder %v6587_v63, %v10834_v0 }
 0x26b   : > { %vm2027_vm15 = vmor %vm8253_vm9, %vm1963_vm0  ;;  %4469 = vmatmul.mubr.msk.bf16.gmra.mrb[44].mxu1 %vm4468_vm6, %v10516_v15  ;;  %vm2873_vm0 = vcmp.eq.s32.totalorder %v6587_v63, %v10839_v5 }
 0x26c   : > { %vm4470_vm1 = vmpackc.low %vm2027_vm15, %vm8332_vm5  ;;  %vm3035_vm15 = vcmp.eq.s32.totalorder %v6587_v63, %v7972_v12  ;;  %vm1965_vm5 = vcmp.eq.s32.totalorder %v6599_v58, %v7643_v33 }
 0x26d   : > { %vm8371_vm4 = vmor %vm1582_vm7, %vm1742_vm10  ;;  %4471 = vmatprep.mubr.msk.bf16.mxu1 %vm4470_vm1, %v10516_v15  ;;  %vm10840_vm7 = vcmp.eq.s32.totalorder %v6587_v63, %v7448_v34  ;;  %vm1587_vm1 = vcmp.eq.s32.totalorder %v6599_v58, %v10846_v30 }
 0x26e   : > { %v10836_v13 = vsel %vm8371_vm4, 4294967295, %v10835_v13  ;;  %vm8375_vm9 = vmor %vm1576_vm3, %vm1736_vm2  ;;  %vm10843_vm2 = vcmp.eq.s32.totalorder %v6599_v58, %v7448_v34  ;;  %vm2875_vm3 = vcmp.eq.s32.totalorder %v6587_v63, %v7930_v40  ;;  %v10848_v34 = vmov 0 }
 0x26f   : > { %vm8389_vm10 = vmor %vm1580_vm12, %vm10840_vm7  ;;  %vm1747_vm12 = vcmp.eq.s32.totalorder %v6599_v58, %v10847_v26  ;;  %vm1962_vm7 = vcmp.eq.s32.totalorder %v6587_v63, %v10832_v37  ;;  %vm10850_vm4 = vcmp.eq.s32.totalorder %v6587_v63, %v7582_v45  ;;  %v10855_v37 = vld [vmem:[#allocation93_spill] sm:$0xff]  ;;  %v8448_v45 = vpop.permute.xlu1 %2799 }
 0x270   : > { %v10842_v31 = vsel %vm8389_vm10, 4294967295, %v10841_v31  ;;  %vm8396_vm6 = vmor %vm1581_vm13, %vm10843_vm2  ;;  %vm1745_vm2 = vcmp.eq.s32.totalorder %v6599_v58, %v7477_v52 }
 0x271   : > { %vm8412_vm13 = vmor %vm2873_vm0, %vm3033_vm11 }
 0x272   : > { %v10849_v34 = vsel %vm8412_vm13, 4294967295, %v10848_v34  ;;  %vm8430_vm11 = vmor %vm8375_vm9, %vm10850_vm4  ;;  %vm1585_vm13 = vcmp.eq.s32.totalorder %v6599_v58, %v10855_v37  ;;  %vm1967_vm9 = vcmp.eq.s32.totalorder %v6599_v58, %v10858_v29 }
 0x273   : > { %vm8434_vm0 = vmor %vm2875_vm3, %vm3035_vm15 }
 0x274   : > { %vm2026_vm10 = vmor %vm8302_vm8, %vm1962_vm7  ;;  %vm3034_vm8 = vcmp.eq.s32.totalorder %v6599_v58, %v7960_v35  ;;  %vm10861_vm7 = vnez %v10829_v6  ;;  %v8474_v35 = vpop.permute.xlu0 %2995  ;;  %v8509_v6 = vpop.permute.xlu1 %2956 }
 0x275   : > { %vm8442_vm14 = vmor %vm1587_vm1, %vm1747_vm12  ;;  %vm3257_vm1 = vcmp.eq.s32.totalorder %v6587_v63, %v8004_v17  ;;  %vm3036_vm12 = vcmp.eq.s32.totalorder %v6599_v58, %v7972_v12  ;;  %v10890_v12 = vld [vmem:[#allocation11_spill] sm:$0xff] }
 0x276   : > { %v10857_v3 = vsel %vm8442_vm14, 4294967295, %v10856_v3  ;;  %vm4472_vm4 = vmpackc.low %vm2026_vm10, %vm8430_vm11  ;;  %vm1966_vm11 = vcmp.eq.s32.totalorder %v6587_v63, %v10858_v29  ;;  %v10913_v29 = vmov 0 }
 0x277   : > { %vm8452_vm15 = vmor %vm1585_vm13, %vm1745_vm2  ;;  %vm2876_vm13 = vcmp.eq.s32.totalorder %v6599_v58, %v7930_v40  ;;  %4473 = vmatmul.mubr.msk.bf16.gmra.mrb[48].mxu1 %vm4472_vm4, %v10516_v15  ;;  %vm10864_vm4 = vnez %v10849_v34 }
 0x278   : > { %vm2029_vm3 = vmor %vm8396_vm6, %vm1965_vm5  ;;  %vm2874_vm6 = vcmp.eq.s32.totalorder %v6599_v58, %v10839_v5  ;;  %v5721_v5 = vld [vmem:[%s5888_s27 + $0xe0] sm:$0xff]  ;;  %v8543_v0 = vpop.permute.xlu0 %3001  ;;  %v8553_v51 = vpop.permute.xlu1 %3180 }
 0x279   : > { %vm2031_vm5 = vmor %vm10861_vm7, %vm1967_vm9  ;;  %vm1586_vm9 = vcmp.eq.s32.totalorder %v6587_v63, %v10846_v30  ;;  %v8512_v24 = vadd.s32 4294966784, %v5721_v5  ;;  %v10881_v30 = vld [vmem:[#allocation45_spill] sm:$0xff]  ;;  %v8898_v5 = vadd.s32 4294966784, %v5723_v38 }
 0x27a   : > { %vm4474_vm2 = vmpackc.low %vm2031_vm5, %vm2029_vm3  ;;  %vm1746_vm3 = vcmp.eq.s32.totalorder %v6587_v63, %v10847_v26  ;;  %vm10870_vm5 = vnez %v10842_v31  ;;  %v10875_v31 = vld [vmem:[#allocation80_spill] sm:$0xff]  ;;  %v10876_v26 = vmov 0 }
 0x27b   : > { %vm8478_vm10 = vmor %vm2874_vm6, %vm3034_vm8  ;;  %4475 = vmatprep.mubr.msk.bf16.mxu1 %vm4474_vm2, %v10516_v15  ;;  %vm10869_vm8 = vcmp.eq.s32.totalorder %v6587_v63, %v7643_v33  ;;  %v10874_v33 = vld [vmem:[#allocation10_spill] sm:$0xff]  ;;  %vm1969_vm2 = vcmp.eq.s32.totalorder %v6599_v58, %v7663_v18  ;;  %3246 = vperm.xlu0 %5640, %v8512_v24  }
 0x27c   : > { %vm8485_vm14 = vmor %vm10864_vm4, %vm3257_vm1  ;;  %vm3259_vm1 = vcmp.eq.s32.totalorder %v6587_v63, %v8041_v28  ;;  %2841 = vperm.xlu1 %5629, %v10874_v33  }
 0x27d   : > { %vm8493_vm7 = vmor %vm2876_vm13, %vm3036_vm12  ;;  %vm10873_vm12 = vnez %v10836_v13  ;;  %v10878_v13 = vld [vmem:[#allocation112_spill] sm:$0xff] }
 0x27e   : > { %vm8502_vm6 = vmor %vm10870_vm5, %vm10869_vm8  ;;  %vm1591_vm8 = vcmp.eq.s32.totalorder %v6599_v58, %v10875_v31 }
 0x27f   : > { %vm2030_vm13 = vmor %vm10873_vm12, %vm1966_vm11  ;;  %vm1751_vm11 = vcmp.eq.s32.totalorder %v6599_v58, %v10878_v13  ;;  %5645 = vset.pattern.permute.xlu0 %v10431_v36 }
 0x280   : > { %vm4476_vm4 = vmpackc.low %vm2030_vm13, %vm8502_vm6  ;;  %5630 = vset.pattern.permute.xlu1 %v10466_v9  ;;  %vm3260_vm13 = vcmp.eq.s32.totalorder %v6599_v58, %v8041_v28  ;;  %vm10884_vm6 = vnez %v10857_v3  ;;  %v8587_v3 = vpop.permute.xlu1 %3183  ;;  %v10887_v28 = vld [vmem:[#allocation95_spill] sm:$0xff] }
 0x281   : > { %vm8527_vm5 = vmor %vm1586_vm9, %vm1746_vm3  ;;  %vm1971_vm9 = vcmp.eq.s32.totalorder %v6599_v58, %v10881_v30  ;;  %vm3258_vm3 = vcmp.eq.s32.totalorder %v6599_v58, %v8004_v17  ;;  %4477 = vmatmul.mubr.msk.bf16.gmra.mrb[52].mxu1 %vm4476_vm4, %v10516_v15  ;;  %2998 = vperm.xlu1 %5630, %v7202_v47   ;;  %v8595_v17 = vpop.permute.xlu0 %3004 }
 0x282   : > { %v10877_v26 = vsel %vm8527_vm5, 4294967295, %v10876_v26  ;;  %vm8535_vm12 = vmor %vm8434_vm0, %vm3259_vm1 }
 0x283   : > { %vm2033_vm0 = vmor %vm8452_vm15, %vm1969_vm2  ;;  %vm1590_vm15 = vcmp.eq.s32.totalorder %v6587_v63, %v10875_v31  ;;  %vm1750_vm2 = vcmp.eq.s32.totalorder %v6587_v63, %v10878_v13 }
 0x284   : > { %vm8555_vm1 = vmor %vm1591_vm8, %vm1751_vm11  ;;  %vm1744_vm8 = vcmp.eq.s32.totalorder %v6587_v63, %v7477_v52  ;;  %v10898_v52 = vld [vmem:[#allocation97_spill] sm:$0xff]  ;;  %v8658_v40 = vpop.permute.xlu1 %2805 }
 0x285   : > { %vm2035_vm5 = vmor %vm10884_vm6, %vm1971_vm9  ;;  %vm1749_vm6 = vcmp.eq.s32.totalorder %v6599_v58, %v7525_v23  ;;  %5631 = vset.pattern.permute.xlu1 %v10478_v61  ;;  %v8674_v31 = vpop.permute.xlu0 %3013 }
 0x286   : > { %vm4478_vm4 = vmpackc.low %vm2035_vm5, %vm2033_vm0  ;;  %vm1748_vm5 = vcmp.eq.s32.totalorder %v6587_v63, %v7525_v23  ;;  %vm1584_vm0 = vcmp.eq.s32.totalorder %v6587_v63, %v10855_v37  ;;  %v10888_v37 = vmov 0  ;;  %3222 = vperm.xlu1 %5631, %v7202_v47   ;;  %v10896_v47 = vld [vmem:[#allocation82_spill] sm:$0xff] }
 0x287   : > { %4479 = vmatprep.mubr.msk.bf16.mxu1 %vm4478_vm4, %v10516_v15  ;;  %vm8577_vm11 = vmor %vm8478_vm10, %vm3258_vm3  ;;  %vm1588_vm4 = vcmp.eq.s32.totalorder %v6587_v63, %v10887_v28 }
 0x288   : > { %vm3324_vm9 = vmor %vm8493_vm7, %vm3260_vm13  ;;  %vm1589_vm7 = vcmp.eq.s32.totalorder %v6599_v58, %v10887_v28  ;;  %v8696_v13 = vpop.permute.xlu1 %2962  ;;  %v10940_v28 = vld [vmem:[#allocation53_spill] sm:$0xff] }
 0x289   : > { %vm4662_vm3 = vmpackc.low %vm3324_vm9, %vm8577_vm11  ;;  %vm1755_vm11 = vcmp.eq.s32.totalorder %v6599_v58, %v10890_v12  ;;  %v8730_v60 = vpop.permute.xlu0 %2814 }
 0x28a   : > { %vm8608_vm13 = vmor %vm1590_vm15, %vm1750_vm2  ;;  %4663 = vmatprep.mubr.msk.bf16.mxu0 %vm4662_vm3, %v10516_v15  ;;  %vm1753_vm2 = vcmp.eq.s32.totalorder %v6599_v58, %v7598_v21  ;;  %vm10897_vm3 = vcmp.eq.s32.totalorder %v6587_v63, %v7663_v18  ;;  %3225 = vperm.xlu1 %5631, %v10874_v33   ;;  %v10904_v18 = vld [vmem:[#allocation47_spill] sm:$0xff]  ;;  %v10905_v33 = vld [vmem:[#allocation100_spill] sm:$0xff] }
 0x28b   : > { %v10889_v37 = vsel %vm8608_vm13, 4294967295, %v10888_v37  ;;  %vm1808_vm9 = vmor %vm1584_vm0, %vm1744_vm8  ;;  %vm1595_vm0 = vcmp.eq.s32.totalorder %v6599_v58, %v10896_v47 }
 0x28c   : > { %vm8622_vm10 = vmor %vm1588_vm4, %vm1748_vm5  ;;  %vm1970_vm5 = vcmp.eq.s32.totalorder %v6587_v63, %v10881_v30  ;;  %v10912_v30 = vld [vmem:[#allocation111_spill] sm:$0xff] }
 0x28d   : > { %v10892_v25 = vsel %vm8622_vm10, 4294967295, %v10891_v25  ;;  %vm8629_vm15 = vmor %vm1589_vm7, %vm1749_vm6  ;;  %vm1973_vm6 = vcmp.eq.s32.totalorder %v6599_v58, %v7701_v54  ;;  %vm1593_vm7 = vcmp.eq.s32.totalorder %v6599_v58, %v10898_v52 }
 0x28e   : > { %vm10895_vm8 = vmpackc.low %vm8535_vm12, %vm8485_vm14  ;;  %vm10901_vm14 = vnez %v10877_v26  ;;  %v10906_v26 = vmov 0  ;;  %5632 = vset.pattern.permute.xlu1 %v10431_v36 }
 0x28f   : > { %4665 = vmatmul.mubr.msk.bf16.vlgmr.msra.gmra.mrb[32].mxu0 %vm10895_vm8, %v10516_v15  ;;  %vm2032_vm4 = vmor %vm1808_vm9, %vm10897_vm3  ;;  %vm1975_vm9 = vcmp.eq.s32.totalorder %v6599_v58, %v10904_v18  ;;  %2844 = vperm.xlu1 %5632, %v10912_v30  }
 0x290   : > { %vm8652_vm13 = vmor %vm1595_vm0, %vm1755_vm11  ;;  %vm3040_vm11 = vcmp.eq.s32.totalorder %v6599_v58, %v8021_v19  ;;  %vm2880_vm0 = vcmp.eq.s32.totalorder %v6599_v58, %v8086_v55 }
 0x291   : > { %vm2034_vm12 = vmor %vm10901_vm14, %vm1970_vm5  ;;  %vm1754_vm5 = vcmp.eq.s32.totalorder %v6587_v63, %v10890_v12 }
 0x292   : > { %vm8660_vm8 = vmor %vm1593_vm7, %vm1753_vm2  ;;  %vm1752_vm7 = vcmp.eq.s32.totalorder %v6587_v63, %v7598_v21  ;;  %v10908_v21 = vmov 0 }
 0x293   : > { %vm4480_vm10 = vmpackc.low %vm2034_vm12, %vm2032_vm4  ;;  %vm3038_vm4 = vcmp.eq.s32.totalorder %v6599_v58, %v8133_v1  ;;  %2847 = vperm.xlu1 %5632, %v7471_v57  }
 0x294   : > { %4481 = vmatmul.mubr.msk.bf16.gmra.mrb[56].mxu1 %vm4480_vm10, %v10516_v15  ;;  %vm2037_vm2 = vmor %vm8629_vm15, %vm1973_vm6  ;;  %vm1972_vm10 = vcmp.eq.s32.totalorder %v6587_v63, %v7701_v54  ;;  %vm1594_vm15 = vcmp.eq.s32.totalorder %v6587_v63, %v10896_v47  ;;  %vm2878_vm6 = vcmp.eq.s32.totalorder %v6599_v58, %v10905_v33  ;;  %v10917_v54 = vld [vmem:[#allocation50_spill] sm:$0xff]  ;;  %v8777_v47 = vpop.permute.xlu0 %2820 }
 0x295   : > { %vm2039_vm3 = vmor %vm8555_vm1, %vm1975_vm9  ;;  %vm1592_vm1 = vcmp.eq.s32.totalorder %v6587_v63, %v10898_v52 }
 0x296   : > { %vm4482_vm14 = vmpackc.low %vm2039_vm3, %vm2037_vm2  ;;  %vm1977_vm3 = vcmp.eq.s32.totalorder %v6599_v58, %v7746_v48 }
 0x297   : > { %vm8690_vm12 = vmor %vm2880_vm0, %vm3040_vm11  ;;  %4483 = vmatprep.mubr.msk.bf16.mxu1 %vm4482_vm14, %v10516_v15  ;;  %vm1974_vm11 = vcmp.eq.s32.totalorder %v6587_v63, %v10904_v18  ;;  %5633 = vset.pattern.permute.xlu1 %v10466_v9 }
 0x298   : > { %v10907_v26 = vsel %vm8690_vm12, 4294967295, %v10906_v26  ;;  %vm8700_vm9 = vmor %vm1594_vm15, %vm1754_vm5  ;;  %vm3037_vm5 = vcmp.eq.s32.totalorder %v6587_v63, %v8133_v1  ;;  %vm3039_vm15 = vcmp.eq.s32.totalorder %v6587_v63, %v8021_v19  ;;  %vm1979_vm12 = vcmp.eq.s32.totalorder %v6599_v58, %v10917_v54  ;;  %v8746_v19 = vpop.permute.xlu1 %3186  ;;  %3007 = vperm.xlu1 %5633, %v7471_v57   ;;  %v5193_v57 = vpop.f32.mrb[0].mxu0  ;;  %v10958_v1 = vld [vmem:[#allocation55_spill] sm:$0xff] }
 0x299   : > { %v10909_v21 = vsel %vm8700_vm9, 4294967295, %v10908_v21  ;;  %vm8704_vm2 = vmor %vm2878_vm6, %vm3038_vm4  ;;  %vm10915_vm4 = vnez %v10892_v25  ;;  %vm10916_vm6 = vnez %v10889_v37  ;;  %vm2877_vm9 = vcmp.eq.s32.totalorder %v6587_v63, %v10905_v33  ;;  %v5722_v37 = vld [vmem:[%s5888_s27 + $0xe8] sm:$0xff]  ;;  %v10923_v25 = vld [vmem:[#allocation84_spill] sm:$0xff] }
 0x29a   : > { %vm8711_vm0 = vmor %vm1592_vm1, %vm1752_vm7  ;;  %vm2879_vm7 = vcmp.eq.s32.totalorder %v6587_v63, %v8086_v55  ;;  %v10920_v55 = vld [vmem:[#allocation12_spill] sm:$0xff]  ;;  %v8759_v12 = vadd.s32 4294966784, %v5722_v37 }
 0x29b   : > { %v10914_v29 = vsel %vm8711_vm0, 4294967295, %v10913_v29  ;;  %vm2036_vm14 = vmor %vm10915_vm4, %vm1972_vm10  ;;  %vm3262_vm4 = vcmp.eq.s32.totalorder %v6599_v58, %v8173_v43 }
 0x29c   : > { %vm2038_vm1 = vmor %vm10916_vm6, %vm1974_vm11  ;;  %v8780_v52 = vpop.permute.xlu1 %3189  ;;  %2865 = vperm.xlu0 %5645, %v8759_v12   ;;  %5634 = vset.pattern.permute.xlu1 %v10478_v61 }
 0x29d   : > { %vm4484_vm0 = vmpackc.low %vm2038_vm1, %vm2036_vm14  ;;  %vm1759_vm14 = vcmp.eq.s32.totalorder %v6599_v58, %v10920_v55  ;;  %3228 = vperm.xlu1 %5634, %v10912_v30  }
 0x29e   : > { %vm8736_vm10 = vmor %vm2877_vm9, %vm3037_vm5  ;;  %4485 = vmatmul.mubr.msk.bf16.gmra.mrb[60].mxu1 %vm4484_vm0, %v10516_v15  ;;  %vm3264_vm0 = vcmp.eq.s32.totalorder %v6599_v58, %v8206_v8 }
 0x29f   : > { %vm2041_vm11 = vmor %vm8660_vm8, %vm1977_vm3  ;;  %vm1599_vm8 = vcmp.eq.s32.totalorder %v6599_v58, %v10923_v25  ;;  %vm1976_vm3 = vcmp.eq.s32.totalorder %v6587_v63, %v7746_v48  ;;  %v10931_v48 = vld [vmem:[#allocation61_spill] sm:$0xff] }
 0x2a0   : > { %vm8750_vm6 = vmor %vm2879_vm7, %vm3039_vm15  ;;  %vm10926_vm15 = vnez %v10907_v26  ;;  %v8821_v26 = vpop.permute.xlu1 %2811  ;;  %2871 = vperm.xlu0 %5645, %v8898_v5  }
 0x2a1   : > { %vm2043_vm9 = vmor %vm8652_vm13, %vm1979_vm12 }
 0x2a2   : > { %vm4486_vm5 = vmpackc.low %vm2043_vm9, %vm2041_vm11  ;;  %vm3261_vm11 = vcmp.eq.s32.totalorder %v6587_v63, %v8173_v43  ;;  %v5194_v43 = vpop.f32.mrb[1].mxu0 }
 0x2a3   : > { %4487 = vmatprep.mubr.msk.bf16.mxu1 %vm4486_vm5, %v10516_v15  ;;  %vm3326_vm13 = vmor %vm8704_vm2, %vm3262_vm4  ;;  %vm1978_vm2 = vcmp.eq.s32.totalorder %v6587_v63, %v10917_v54  ;;  %vm1758_vm4 = vcmp.eq.s32.totalorder %v6587_v63, %v10920_v55  ;;  %vm10928_vm5 = vnez %v10909_v21  ;;  %v5195_v18 = vadd.f32 %v5194_v43, %v5193_v57  ;;  %v5196_v33 = vpop.f32.mrb[2].mxu0  ;;  %v8830_v21 = vpop.permute.xlu0 %2826  ;;  %v10935_v54 = vld [vmem:[#allocation99_spill] sm:$0xff]  ;;  %v10946_v43 = vld [vmem:[#allocation101_spill] sm:$0xff] }
 0x2a4   : > { %vm8771_vm12 = vmor %vm1599_vm8, %vm1759_vm14  ;;  %vm10927_vm14 = vnez %v10914_v29  ;;  %v5197_v34 = vpop.f32.mrb[3].mxu0  ;;  %v10934_v29 = vld [vmem:[#allocation86_spill] sm:$0xff]  ;;  %v8874_v57 = vpop.permute.xlu1 %2968  ;;  %5649 = vset.pattern.permute.xlu0 %v10478_v61 }
 0x2a5   : > { %vm3328_vm7 = vmor %vm10926_vm15, %vm3264_vm0  ;;  %vm3263_vm0 = vcmp.eq.s32.totalorder %v6587_v63, %v8206_v8  ;;  %v5198_v8 = vadd.f32 %v5197_v34, %v5196_v33  ;;  %v10949_v33 = vld [vmem:[#allocation102_spill] sm:$0xff] }
 0x2a6   : > { %vm4666_vm1 = vmpackc.low %vm3328_vm7, %vm3326_vm13  ;;  %vm1598_vm13 = vcmp.eq.s32.totalorder %v6587_v63, %v10923_v25  ;;  %v10943_v25 = vld [vmem:[#allocation66_spill] sm:$0xff] }
 0x2a7   : > { %4667 = vmatprep.mubr.msk.bf16.mxu0 %vm4666_vm1, %v10516_v15  ;;  %vm2040_vm9 = vmor %vm10927_vm14, %vm1976_vm3  ;;  %vm1763_vm3 = vcmp.eq.s32.totalorder %v6599_v58, %v10931_v48  ;;  %vm1756_vm1 = vcmp.eq.s32.totalorder %v6587_v63, %v7649_v10  ;;  %vm1596_vm14 = vcmp.eq.s32.totalorder %v6587_v63, %v10935_v54  ;;  %v4863_v55 = vpack.c.bf16 %v5198_v8, %v5195_v18 }
 0x2a8   : > { %vm2042_vm8 = vmor %vm10928_vm5, %vm1978_vm2  ;;  %1927 = vperm.xlu1 %5634, %v10943_v25  }
 0x2a9   : > { %vm4488_vm15 = vmpackc.low %vm2042_vm8, %vm2040_vm9  ;;  %vm1981_vm9 = vcmp.eq.s32.totalorder %v6599_v58, %v7770_v14  ;;  %4864 = vst [vmem:[%s8884_s23] sm:$0xff] %v4863_v55  }
 0x2aa   : > { %vm8803_vm7 = vmor %vm1598_vm13, %vm1758_vm4  ;;  %4489 = vmatmul.mubr.msk.bf16.gmra.mrb[64].mxu1 %vm4488_vm15, %v10516_v15  ;;  %vm1757_vm4 = vcmp.eq.s32.totalorder %v6599_v58, %v7649_v10  ;;  %v10944_v10 = vmov 0 }
 0x2ab   : > { %vm8814_vm2 = vmor %vm8736_vm10, %vm3261_vm11  ;;  %vm1603_vm11 = vcmp.eq.s32.totalorder %v6599_v58, %v10934_v29 }
 0x2ac   : > { %vm3327_vm10 = vmor %vm8750_vm6, %vm3263_vm0  ;;  %vm1597_vm6 = vcmp.eq.s32.totalorder %v6599_v58, %v10935_v54  ;;  %vm1762_vm0 = vcmp.eq.s32.totalorder %v6587_v63, %v10931_v48  ;;  %v8895_v48 = vpop.permute.xlu0 %2832  ;;  %v8943_v54 = vpop.permute.xlu1 %3192 }
 0x2ad   : > { %vm4668_vm5 = vmpackc.low %vm3327_vm10, %vm8814_vm2  ;;  %vm1602_vm2 = vcmp.eq.s32.totalorder %v6587_v63, %v10934_v29  ;;  %v10952_v29 = vld [vmem:[#allocation49_spill] sm:$0xff] }
 0x2ae   : > { %vm8848_vm8 = vmor %vm1603_vm11, %vm1763_vm3  ;;  %4669 = vmatmul.mubr.msk.bf16.gmra.mrb[36].mxu0 %vm4668_vm5, %v10516_v15  ;;  %vm1983_vm3 = vcmp.eq.s32.totalorder %v6599_v58, %v10940_v28  ;;  %vm1761_vm11 = vcmp.eq.s32.totalorder %v6599_v58, %v7671_v7  ;;  %vm1980_vm5 = vcmp.eq.s32.totalorder %v6587_v63, %v7770_v14  ;;  %1930 = vperm.xlu1 %5634, %v10952_v29   ;;  %v5199_v14 = vpop.f32.mrb[4].mxu0  ;;  %v10968_v29 = vld [vmem:[#allocation44_spill] sm:$0xff] }
 0x2af   : > { %vm8855_vm13 = vmor %vm1596_vm14, %vm1756_vm1  ;;  %vm1760_vm1 = vcmp.eq.s32.totalorder %v6587_v63, %v7671_v7  ;;  %v10953_v7 = vmov 0  ;;  %v5200_v8 = vpop.f32.mrb[5].mxu0 }
 0x2b0   : > { %vm1821_vm15 = vmor %vm1597_vm6, %vm1757_vm4  ;;  %v5201_v37 = vadd.f32 %v5200_v8, %v5199_v14  ;;  %v5202_v25 = vpop.f32.mrb[6].mxu0  ;;  %v8997_v14 = vpop.permute.xlu1 %3195 }
 0x2b1   : > { %vm8869_vm10 = vmor %vm1821_vm15, %vm1981_vm9  ;;  %vm1600_vm9 = vcmp.eq.s32.totalorder %v6587_v63, %v10946_v43  ;;  %v5203_v34 = vpop.f32.mrb[7].mxu0 }
 0x2b2   : > { %vm8876_vm4 = vmor %vm1602_vm2, %vm1762_vm0  ;;  %vm3042_vm0 = vcmp.eq.s32.totalorder %v6599_v58, %v8288_v59  ;;  %vm2884_vm2 = vcmp.eq.s32.totalorder %v6599_v58, %v8251_v32  ;;  %5635 = vset.pattern.permute.xlu1 %v10431_v36 }
 0x2b3   : > { %v10945_v10 = vsel %vm8876_vm4, 4294967295, %v10944_v10  ;;  %vm2047_vm14 = vmor %vm8771_vm12, %vm1983_vm3  ;;  %vm1601_vm12 = vcmp.eq.s32.totalorder %v6599_v58, %v10946_v43  ;;  %vm1987_vm3 = vcmp.eq.s32.totalorder %v6599_v58, %v10958_v1  ;;  %v5724_v43 = vld [vmem:[%s5888_s27 + $0xf0] sm:$0xff]  ;;  %2853 = vperm.xlu1 %5635, %v10968_v29   ;;  %s4859_s27 = sshll.u32 %s5795_s12, 11  ;;  %s5725_s12 = scalar_lea.vmem %s10183_s24, 2048 }
 0x2b4   : > { %vm4490_vm6 = vmpackc.low %vm2047_vm14, %vm8869_vm10  ;;  %vm2882_vm10 = vcmp.eq.s32.totalorder %v6599_v58, %v10949_v33  ;;  %v8982_v38 = vadd.s32 4294966784, %v5724_v43  ;;  %v9026_v30 = vpop.permute.xlu1 %2817  ;;  %v10978_v43 = vld [vmem:[#allocation70_spill] sm:$0xff]  ;;  %s10181_s28 = scalar_lea.hbm %s10236_s2, %s4859_s27  ;;  %p5726_p12 = scmp.ne.s32.totalorder %s10183_s24, %s5725_s12 }
 0x2b5   : > { %vm8905_vm15 = vmor %vm1600_vm9, %vm1760_vm1  ;;  %4491 = vmatprep.mubr.msk.bf16.mxu1 %vm4490_vm6, %v10516_v15  ;;  %vm1982_vm1 = vcmp.eq.s32.totalorder %v6587_v63, %v10940_v28  ;;  %vm3041_vm6 = vcmp.eq.s32.totalorder %v6587_v63, %v8288_v59  ;;  %vm1984_vm9 = vcmp.eq.s32.totalorder %v6587_v63, %v7815_v50  ;;  %v8978_v28 = vpop.permute.xlu0 %2838  ;;  %p5733_p2 = scmp.lt.s32.totalorder %s5731_s4, %s5725_s12 }
 0x2b6   : > { %vm8919_vm14 = vmor %vm1601_vm12, %vm1761_vm11  ;;  %3252 = vperm.xlu0 %5649, %v8982_v38   ;;  %p5727_p13 = pnand %p5726_p12, %p5867_p4 }
 0x2b7   : > { %vm8934_vm11 = vmor %vm2882_vm10, %vm3042_vm0  ;;  %vm10955_vm0 = vcmp.eq.s32.totalorder %v6599_v58, %v8077_v11  ;;  %5636 = vset.pattern.permute.xlu1 %v10466_v9  ;;  %p5734_p3 = por %p5733_p2, %p5732_p1 }
 0x2b8   : > { %v10954_v7 = vsel %vm8934_vm11, 4294967295, %v10953_v7  ;;  %vm2044_vm12 = vmor %vm8855_vm13, %vm1980_vm5  ;;  %vm2881_vm13 = vcmp.eq.s32.totalorder %v6587_v63, %v10949_v33  ;;  %3010 = vperm.xlu1 %5636, %v7256_v49   ;;  %p5728_p0 = pneg %p5727_p13 }
 0x2b9   : > { %vm8952_vm10 = vmor %vm2884_vm2, %vm10955_vm0  ;;  %vm1986_vm0 = vcmp.eq.s32.totalorder %v6587_v63, %v10958_v1  ;;  %v10973_v1 = vld [vmem:[#allocation104_spill] sm:$0xff] }
 0x2ba   : > { %vm2046_vm11 = vmor %vm8803_vm7, %vm1982_vm1  ;;  %vm10961_vm7 = vcmp.eq.s32.totalorder %v6599_v58, %v7815_v50  ;;  %vm10964_vm1 = vcmp.eq.s32.totalorder %v6587_v63, %v8077_v11  ;;  %v5204_v11 = vadd.f32 %v5203_v34, %v5202_v25  ;;  %v9022_v50 = vpop.permute.xlu0 %2850  ;;  %v10977_v25 = vld [vmem:[#allocation103_spill] sm:$0xff]  ;;  %p5735_p5 = pnand %p5734_p3, %p5728_p0 }
 0x2bb   : > { %vm4492_vm5 = vmpackc.low %vm2046_vm11, %vm2044_vm12 }
 0x2bc   : > { %vm8964_vm4 = vmor %vm2881_vm13, %vm3041_vm6  ;;  %4493 = vmatmul.mubr.msk.bf16.gmra.mrb[68].mxu1 %vm4492_vm5, %v10516_v15  ;;  %vm10965_vm6 = vcmp.eq.s32.totalorder %v6587_v63, %v8251_v32  ;;  %vm3268_vm13 = vcmp.eq.s32.totalorder %v6599_v58, %v8382_v56  ;;  %vm10969_vm5 = vnez %v10945_v10  ;;  %v4868_v32 = vpack.c.bf16 %v5204_v11, %v5201_v37  ;;  %5638 = vset.pattern.permute.xlu1 %v10478_v61  ;;  %v9050_v10 = vpop.permute.xlu1 %2974  ;;  %v10976_v37 = vld [vmem:[#allocation52_spill] sm:$0xff] }
 0x2bd   : > { %vm8974_vm2 = vmor %vm8919_vm14, %vm10961_vm7  ;;  %3234 = vperm.xlu1 %5638, %v7256_v49  }
 0x2be   : > { %vm8990_vm11 = vmor %vm10965_vm6, %vm10964_vm1  ;;  %vm3265_vm1 = vcmp.eq.s32.totalorder %v6587_v63, %v8339_v4  ;;  %vm10970_vm6 = vnez %v10954_v7  ;;  %5100 = vst [vmem:[%s8884_s23 + $0x8] sm:$0xff] %v4868_v32   ;;  %v9062_v7 = vpop.permute.xlu0 %2859  ;;  %v10979_v32 = vld [vmem:[#allocation88_spill] sm:$0xff] }
 0x2bf   : > { %vm2051_vm14 = vmor %vm8848_vm8, %vm1987_vm3  ;;  %vm3266_vm8 = vcmp.eq.s32.totalorder %v6599_v58, %v8339_v4  ;;  %v5205_v4 = vpop.f32.mrb[8].mxu0 }
 0x2c0   : > { %vm4494_vm12 = vmpackc.low %vm2051_vm14, %vm8974_vm2  ;;  %v9088_v23 = vpop.permute.xlu1 %3198 }
 0x2c1   : > { %4495 = vmatprep.mubr.msk.bf16.mxu1 %vm4494_vm12, %v10516_v15  ;;  %vm2048_vm3 = vmor %vm8905_vm15, %vm1984_vm9  ;;  %vm3267_vm15 = vcmp.eq.s32.totalorder %v6587_v63, %v8382_v56  ;;  %v5206_v56 = vpop.f32.mrb[9].mxu0  ;;  %3237 = vperm.xlu1 %5638, %v10968_v29  }
 0x2c2   : > { %vm2050_vm7 = vmor %vm10969_vm5, %vm1986_vm0  ;;  %vm3047_vm0 = vcmp.eq.s32.totalorder %v6587_v63, %v8130_v20  ;;  %vm3048_vm5 = vcmp.eq.s32.totalorder %v6599_v58, %v8130_v20  ;;  %v5207_v59 = vadd.f32 %v5206_v56, %v5205_v4  ;;  %v5208_v8 = vpop.f32.mrb[10].mxu0  ;;  %v11075_v56 = vld [vmem:[#allocation72_spill] sm:$0xff] }
 0x2c3   : > { %vm4496_vm2 = vmpackc.low %vm2050_vm7, %vm2048_vm3  ;;  %vm2887_vm3 = vcmp.eq.s32.totalorder %v6587_v63, %v8448_v45  ;;  %v5209_v49 = vpop.f32.mrb[11].mxu0 }
 0x2c4   : > { %vm3330_vm14 = vmor %vm10970_vm6, %vm3266_vm8  ;;  %4497 = vmatmul.mubr.msk.bf16.gmra.mrb[72].mxu1 %vm4496_vm2, %v10516_v15  ;;  %vm3045_vm2 = vcmp.eq.s32.totalorder %v6587_v63, %v8509_v6  ;;  %v5210_v20 = vadd.f32 %v5209_v49, %v5208_v8  ;;  %v10984_v8 = vld [vmem:[#allocation105_spill] sm:$0xff] }
 0x2c5   : > { %vm3332_vm9 = vmor %vm8952_vm10, %vm3268_vm13  ;;  %vm2888_vm13 = vcmp.eq.s32.totalorder %v6599_v58, %v8448_v45  ;;  %1936 = vperm.xlu1 %5638, %v10976_v37  }
 0x2c6   : > { %vm4670_vm12 = vmpackc.low %vm3332_vm9, %vm3330_vm14  ;;  %vm3270_vm14 = vcmp.eq.s32.totalorder %v6599_v58, %v8553_v51  ;;  %v4873_v45 = vpack.c.bf16 %v5210_v20, %v5207_v59 }
 0x2c7   : > { %4671 = vmatprep.mubr.msk.bf16.mxu0 %vm4670_vm12, %v10516_v15  ;;  %vm3329_vm8 = vmor %vm8964_vm4, %vm3265_vm1  ;;  %vm2885_vm1 = vcmp.eq.s32.totalorder %v6587_v63, %v10973_v1  ;;  %vm3272_vm12 = vcmp.eq.s32.totalorder %v6599_v58, %v8587_v3 }
 0x2c8   : > { %vm3331_vm10 = vmor %vm8990_vm11, %vm3267_vm15  ;;  %vm3046_vm11 = vcmp.eq.s32.totalorder %v6599_v58, %v8509_v6  ;;  %vm2886_vm15 = vcmp.eq.s32.totalorder %v6599_v58, %v10973_v1  ;;  %v1919_v6 = vpop.permute.xlu0 %1918  ;;  %5101 = vst [vmem:[%s8884_s23 + $0x10] sm:$0xff] %v4873_v45   ;;  %v10985_v1 = vld [vmem:[#allocation46_spill] sm:$0xff] }
 0x2c9   : > { %vm4672_vm7 = vmpackc.low %vm3331_vm10, %vm3329_vm8  ;;  %vm3269_vm8 = vcmp.eq.s32.totalorder %v6587_v63, %v8553_v51  ;;  %v9099_v51 = vpop.permute.xlu1 %3201  ;;  %5639 = vset.pattern.permute.xlu1 %v10431_v36  ;;  %v10990_v45 = vld [vmem:[#allocation90_spill] sm:$0xff] }
 0x2ca   : > { %4673 = vmatmul.mubr.msk.bf16.gmra.mrb[40].mxu0 %vm4672_vm7, %v10516_v15  ;;  %vm9056_vm4 = vmor %vm2887_vm3, %vm3047_vm0  ;;  %2856 = vperm.xlu1 %5639, %v7585_v27  }
 0x2cb   : > { %vm3112_vm6 = vmor %vm2888_vm13, %vm3048_vm5  ;;  %vm3271_vm5 = vcmp.eq.s32.totalorder %v6587_v63, %v8587_v3  ;;  %v5211_v3 = vpop.f32.mrb[12].mxu0 }
 0x2cc   : > { %vm9079_vm9 = vmor %vm2885_vm1, %vm3045_vm2  ;;  %vm1764_vm1 = vcmp.eq.s32.totalorder %v6587_v63, %v7735_v16  ;;  %v5212_v33 = vpop.f32.mrb[13].mxu0  ;;  %v9117_v34 = vpop.permute.xlu0 %1924 }
 0x2cd   : > { %vm3110_vm0 = vmor %vm2886_vm15, %vm3046_vm11  ;;  %vm1766_vm15 = vcmp.eq.s32.totalorder %v6587_v63, %v10978_v43  ;;  %v5213_v29 = vadd.f32 %v5212_v33, %v5211_v3  ;;  %v5214_v11 = vpop.f32.mrb[14].mxu0  ;;  %v9137_v59 = vpop.permute.xlu1 %2823  ;;  %v10996_v3 = vld [vmem:[#allocation106_spill] sm:$0xff] }
 0x2ce   : > { %vm3334_vm3 = vmor %vm3110_vm0, %vm3270_vm14  ;;  %vm1604_vm14 = vcmp.eq.s32.totalorder %v6587_v63, %v10977_v25  ;;  %vm1606_vm0 = vcmp.eq.s32.totalorder %v6587_v63, %v10979_v32  ;;  %v5215_v18 = vpop.f32.mrb[15].mxu0  ;;  %5641 = vset.pattern.permute.xlu1 %v10466_v9 }
 0x2cf   : > { %vm3336_vm10 = vmor %vm3112_vm6, %vm3272_vm12  ;;  %vm1765_vm6 = vcmp.eq.s32.totalorder %v6599_v58, %v7735_v16  ;;  %vm1769_vm12 = vcmp.eq.s32.totalorder %v6599_v58, %v7778_v62  ;;  %v5216_v16 = vadd.f32 %v5215_v18, %v5214_v11  ;;  %3016 = vperm.xlu1 %5641, %v7585_v27   ;;  %v10993_v27 = vld [vmem:[#allocation63_spill] sm:$0xff] }
 0x2d0   : > { %vm4674_vm13 = vmpackc.low %vm3336_vm10, %vm3334_vm3  ;;  %vm1607_vm10 = vcmp.eq.s32.totalorder %v6599_v58, %v10979_v32 }
 0x2d1   : > { %4675 = vmatprep.mubr.msk.bf16.mxu0 %vm4674_vm13, %v10516_v15  ;;  %vm3333_vm7 = vmor %vm9079_vm9, %vm3269_vm8  ;;  %vm1767_vm9 = vcmp.eq.s32.totalorder %v6599_v58, %v10978_v43  ;;  %vm1609_vm13 = vcmp.eq.s32.totalorder %v6599_v58, %v10984_v8  ;;  %v4878_v20 = vpack.c.bf16 %v5216_v16, %v5213_v29  ;;  %v5241_v29 = vpop.f32.mrb[0].mxu1 }
 0x2d2   : > { %vm3335_vm2 = vmor %vm9056_vm4, %vm3271_vm5  ;;  %vm1605_vm4 = vcmp.eq.s32.totalorder %v6599_v58, %v10977_v25  ;;  %vm1990_vm5 = vcmp.eq.s32.totalorder %v6587_v63, %v1919_v6  ;;  %v5217_v25 = vpop.f32.mrb[16].mxu0  ;;  %v5242_v18 = vpop.f32.mrb[1].mxu1 }
 0x2d3   : > { %vm4676_vm11 = vmpackc.low %vm3335_vm2, %vm3333_vm7  ;;  %vm1991_vm2 = vcmp.eq.s32.totalorder %v6599_v58, %v1919_v6  ;;  %5102 = vst [vmem:[%s8884_s23 + $0x18] sm:$0xff] %v4878_v20   ;;  %v9172_v6 = vpop.permute.xlu1 %2980  ;;  %3019 = vperm.xlu1 %5641, %v10993_v27   ;;  %v5218_v33 = vpop.f32.mrb[17].mxu0  ;;  %v11005_v20 = vld [vmem:[#allocation71_spill] sm:$0xff] }
 0x2d4   : > { %4677 = vmatmul.mubr.msk.bf16.gmra.mrb[44].mxu0 %vm4676_vm11, %v10516_v15  ;;  %vm9125_vm8 = vmor %vm1604_vm14, %vm1764_vm1  ;;  %vm1771_vm11 = vcmp.eq.s32.totalorder %v6599_v58, %v10985_v1  ;;  %v5219_v11 = vadd.f32 %v5218_v33, %v5217_v25  ;;  %v5220_v32 = vpop.f32.mrb[18].mxu0 }
 0x2d5   : > { %vm9132_vm3 = vmor %vm1605_vm4, %vm1765_vm6  ;;  %vm1611_vm4 = vcmp.eq.s32.totalorder %v6599_v58, %v10990_v45 }
 0x2d6   : > { %vm1830_vm7 = vmor %vm1606_vm0, %vm1766_vm15  ;;  %vm1995_vm15 = vcmp.eq.s32.totalorder %v6599_v58, %v9117_v34 }
 0x2d7   : > { %vm9152_vm1 = vmor %vm1609_vm13, %vm1769_vm12  ;;  %vm1989_vm12 = vcmp.eq.s32.totalorder %v6599_v58, %v7854_v22  ;;  %vm1768_vm13 = vcmp.eq.s32.totalorder %v6587_v63, %v7778_v62  ;;  %5642 = vset.pattern.permute.xlu1 %v10478_v61 }
 0x2d8   : > { %vm1831_vm6 = vmor %vm1607_vm10, %vm1767_vm9  ;;  %3243 = vperm.xlu1 %5642, %v10993_v27  }
 0x2d9   : > { %vm9159_vm14 = vmor %vm1830_vm7, %vm1990_vm5  ;;  %vm1988_vm5 = vcmp.eq.s32.totalorder %v6587_v63, %v7854_v22  ;;  %v9202_v22 = vpop.permute.xlu1 %3204 }
 0x2da   : > { %vm2055_vm0 = vmor %vm1831_vm6, %vm1991_vm2  ;;  %vm1993_vm2 = vcmp.eq.s32.totalorder %v6599_v58, %v7894_v53  ;;  %vm1608_vm6 = vcmp.eq.s32.totalorder %v6587_v63, %v10984_v8  ;;  %v5221_v8 = vpop.f32.mrb[19].mxu0 }
 0x2db   : > { %vm1835_vm9 = vmor %vm1611_vm4, %vm1771_vm11  ;;  %v5222_v16 = vadd.f32 %v5221_v8, %v5220_v32 }
 0x2dc   : > { %vm9176_vm10 = vmor %vm1835_vm9, %vm1995_vm15  ;;  %vm3050_vm15 = vcmp.eq.s32.totalorder %v6599_v58, %v8696_v13  ;;  %vm2890_vm9 = vcmp.eq.s32.totalorder %v6599_v58, %v10996_v3  ;;  %1939 = vperm.xlu1 %5642, %v11005_v20  }
 0x2dd   : > { %vm2053_vm7 = vmor %vm9132_vm3, %vm1989_vm12  ;;  %vm1770_vm3 = vcmp.eq.s32.totalorder %v6587_v63, %v10985_v1  ;;  %v9264_v1 = vpop.permute.xlu1 %3207  ;;  %v4883_v55 = vpack.c.bf16 %v5222_v16, %v5219_v11 }
 0x2de   : > { %vm4498_vm11 = vmpackc.low %vm2055_vm0, %vm2053_vm7  ;;  %vm3049_vm7 = vcmp.eq.s32.totalorder %v6587_v63, %v8696_v13  ;;  %v5243_v13 = vadd.f32 %v5242_v18, %v5241_v29 }
 0x2df   : > { %4499 = vmatprep.mubr.msk.bf16.mxu1 %vm4498_vm11, %v10516_v15  ;;  %vm2052_vm4 = vmor %vm9125_vm8, %vm1988_vm5  ;;  %vm1994_vm8 = vcmp.eq.s32.totalorder %v6587_v63, %v9117_v34  ;;  %v5244_v34 = vpop.f32.mrb[2].mxu1  ;;  %5103 = vst [vmem:[%s8884_s23 + $0x20] sm:$0xff] %v4883_v55  }
 0x2e0   : > { %vm9196_vm12 = vmor %vm1608_vm6, %vm1768_vm13  ;;  %vm2891_vm13 = vcmp.eq.s32.totalorder %v6587_v63, %v8658_v40  ;;  %5643 = vset.pattern.permute.xlu1 %v10431_v36 }
 0x2e1   : > { %vm4500_vm0 = vmpackc.low %vm9159_vm14, %vm2052_vm4  ;;  %vm1610_vm14 = vcmp.eq.s32.totalorder %v6587_v63, %v10990_v45  ;;  %2862 = vperm.xlu1 %5643, %v8512_v24   ;;  %v5223_v45 = vpop.f32.mrb[20].mxu0 }
 0x2e2   : > { %4501 = vmatmul.mubr.msk.bf16.gmra.mrb[76].mxu1 %vm4500_vm0, %v10516_v15  ;;  %vm2057_vm5 = vmor %vm9152_vm1, %vm1993_vm2  ;;  %vm2889_vm1 = vcmp.eq.s32.totalorder %v6587_v63, %v10996_v3  ;;  %vm2892_vm2 = vcmp.eq.s32.totalorder %v6599_v58, %v8658_v40  ;;  %vm3275_vm0 = vcmp.eq.s32.totalorder %v6587_v63, %v8780_v52  ;;  %v9281_v40 = vpop.permute.xlu1 %2829  ;;  %v5224_v37 = vpop.f32.mrb[21].mxu0  ;;  %v11008_v3 = vld [vmem:[#allocation108_spill] sm:$0xff] }
 0x2e3   : > { %vm9223_vm11 = vmor %vm2890_vm9, %vm3050_vm15  ;;  %vm3052_vm9 = vcmp.eq.s32.totalorder %v6599_v58, %v8183_v42  ;;  %v5225_v62 = vadd.f32 %v5224_v37, %v5223_v45  ;;  %v11060_v45 = vmov 0 }
 0x2e4   : > { %vm4502_vm6 = vmpackc.low %vm9176_vm10, %vm2057_vm5  ;;  %vm3051_vm10 = vcmp.eq.s32.totalorder %v6587_v63, %v8183_v42  ;;  %vm3276_vm5 = vcmp.eq.s32.totalorder %v6599_v58, %v8780_v52  ;;  %v5245_v42 = vpop.f32.mrb[3].mxu1 }
 0x2e5   : > { %vm1834_vm4 = vmor %vm1610_vm14, %vm1770_vm3  ;;  %4503 = vmatprep.mubr.msk.bf16.mxu1 %vm4502_vm6, %v10516_v15  ;;  %v5246_v52 = vadd.f32 %v5245_v42, %v5244_v34  ;;  %5644 = vset.pattern.permute.xlu1 %v10466_v9 }
 0x2e6   : > { %vm9244_vm15 = vmor %vm2889_vm1, %vm3049_vm7  ;;  %3022 = vperm.xlu1 %5644, %v8512_v24   ;;  %v5226_v24 = vpop.f32.mrb[22].mxu0 }
 0x2e7   : > { %vm9251_vm3 = vmor %vm1834_vm4, %vm1994_vm8  ;;  %vm1992_vm8 = vcmp.eq.s32.totalorder %v6587_v63, %v7894_v53  ;;  %v4903_v53 = vpack.c.bf16 %v5246_v52, %v5243_v13  ;;  %v5227_v43 = vpop.f32.mrb[23].mxu0 }
 0x2e8   : > { %vm3115_vm7 = vmor %vm2891_vm13, %vm3051_vm10  ;;  %vm3274_vm13 = vcmp.eq.s32.totalorder %v6599_v58, %v8746_v19  ;;  %v5228_v11 = vadd.f32 %v5227_v43, %v5226_v24 }
 0x2e9   : > { %vm3116_vm14 = vmor %vm2892_vm2, %vm3052_vm9  ;;  %vm3273_vm2 = vcmp.eq.s32.totalorder %v6587_v63, %v8746_v19  ;;  %5107 = vst [vmem:[%s8884_s23 + $0x40] sm:$0xff] %v4903_v53   ;;  %v9299_v19 = vpop.permute.xlu1 %2986 }
 0x2ea   : > { %vm9271_vm6 = vmor %vm3115_vm7, %vm3275_vm0  ;;  %3025 = vperm.xlu1 %5644, %v8759_v12  }
 0x2eb   : > { %vm3340_vm1 = vmor %vm3116_vm14, %vm3276_vm5  ;;  %vm3053_vm5 = vcmp.eq.s32.totalorder %v6587_v63, %v8874_v57 }
 0x2ec   : > { %vm2056_vm4 = vmor %vm9196_vm12, %vm1992_vm8  ;;  %vm3056_vm8 = vcmp.eq.s32.totalorder %v6599_v58, %v8238_v39 }
 0x2ed   : > { %vm4504_vm10 = vmpackc.low %vm9251_vm3, %vm2056_vm4  ;;  %vm2896_vm3 = vcmp.eq.s32.totalorder %v6599_v58, %v8821_v26  ;;  %vm3277_vm4 = vcmp.eq.s32.totalorder %v6587_v63, %v8943_v54  ;;  %v9331_v32 = vpop.permute.xlu1 %3210 }
 0x2ee   : > { %4505 = vmatmul.mubr.msk.bf16.gmra.mrb[80].mxu1 %vm4504_vm10, %v10516_v15  ;;  %vm3338_vm0 = vmor %vm9223_vm11, %vm3274_vm13  ;;  %vm2895_vm11 = vcmp.eq.s32.totalorder %v6587_v63, %v8821_v26  ;;  %v5247_v26 = vpop.f32.mrb[4].mxu1  ;;  %vm2893_vm13 = vcmp.eq.s32.totalorder %v6587_v63, %v11008_v3  ;;  %5646 = vset.pattern.permute.xlu1 %v10478_v61 }
 0x2ef   : > { %vm4678_vm9 = vmpackc.low %vm3340_vm1, %vm3338_vm0  ;;  %vm3278_vm0 = vcmp.eq.s32.totalorder %v6599_v58, %v8943_v54  ;;  %v4888_v54 = vpack.c.bf16 %v5228_v11, %v5225_v62  ;;  %3249 = vperm.xlu1 %5646, %v8759_v12  }
 0x2f0   : > { %4679 = vmatprep.mubr.msk.bf16.mxu0 %vm4678_vm9, %v10516_v15  ;;  %vm3337_vm12 = vmor %vm9244_vm15, %vm3273_vm2  ;;  %vm3055_vm15 = vcmp.eq.s32.totalorder %v6587_v63, %v8238_v39  ;;  %v5248_v39 = vpop.f32.mrb[5].mxu1  ;;  %vm2894_vm2 = vcmp.eq.s32.totalorder %v6599_v58, %v11008_v3 }
 0x2f1   : > { %vm4680_vm7 = vmpackc.low %vm9271_vm6, %vm3337_vm12  ;;  %vm3054_vm6 = vcmp.eq.s32.totalorder %v6599_v58, %v8874_v57  ;;  %v5249_v33 = vadd.f32 %v5248_v39, %v5247_v26  ;;  %v5250_v29 = vpop.f32.mrb[6].mxu1  ;;  %vm3279_vm12 = vcmp.eq.s32.totalorder %v6587_v63, %v8997_v14  ;;  %5104 = vst [vmem:[%s8884_s23 + $0x28] sm:$0xff] %v4888_v54   ;;  %v9352_v13 = vpop.permute.xlu1 %3213 }
 0x2f2   : > { %4681 = vmatmul.mubr.msk.bf16.gmra.mrb[48].mxu0 %vm4680_vm7, %v10516_v15  ;;  %vm9313_vm14 = vmor %vm2895_vm11, %vm3055_vm15  ;;  %v5251_v4 = vpop.f32.mrb[7].mxu1  ;;  %vm3280_vm11 = vcmp.eq.s32.totalorder %v6599_v58, %v8997_v14 }
 0x2f3   : > { %vm9321_vm1 = vmor %vm2896_vm3, %vm3056_vm8  ;;  %v5252_v18 = vadd.f32 %v5251_v4, %v5250_v29  ;;  %vm2899_vm8 = vcmp.eq.s32.totalorder %v6587_v63, %v9026_v30  ;;  %5647 = vset.pattern.permute.xlu1 %v10431_v36 }
 0x2f4   : > { %vm3117_vm10 = vmor %vm2893_vm13, %vm3053_vm5  ;;  %vm3059_vm13 = vcmp.eq.s32.totalorder %v6587_v63, %v8278_v41  ;;  %2868 = vperm.xlu1 %5647, %v8982_v38  }
 0x2f5   : > { %vm3118_vm9 = vmor %vm2894_vm2, %vm3054_vm6  ;;  %v4908_v8 = vpack.c.bf16 %v5252_v18, %v5249_v33  ;;  %vm3057_vm2 = vcmp.eq.s32.totalorder %v6587_v63, %v9050_v10  ;;  %v9385_v14 = vpop.permute.xlu1 %2835 }
 0x2f6   : > { %vm9339_vm7 = vmor %vm3117_vm10, %vm3277_vm4  ;;  %vm2897_vm4 = vcmp.eq.s32.totalorder %v6587_v63, %v8730_v60  ;;  %vm3060_vm10 = vcmp.eq.s32.totalorder %v6599_v58, %v8278_v41 }
 0x2f7   : > { %vm3342_vm3 = vmor %vm3118_vm9, %vm3278_vm0  ;;  %5108 = vst [vmem:[%s8884_s23 + $0x48] sm:$0xff] %v4908_v8   ;;  %vm2898_vm0 = vcmp.eq.s32.totalorder %v6599_v58, %v8730_v60 }
 0x2f8   : > { %vm9347_vm15 = vmor %vm9313_vm14, %vm3279_vm12  ;;  %vm2900_vm14 = vcmp.eq.s32.totalorder %v6599_v58, %v9026_v30  ;;  %vm3058_vm12 = vcmp.eq.s32.totalorder %v6599_v58, %v9050_v10  ;;  %5648 = vset.pattern.permute.xlu1 %v10466_v9  ;;  %v5229_v30 = vpop.f32.mrb[24].mxu0 }
 0x2f9   : > { %vm3344_vm5 = vmor %vm9321_vm1, %vm3280_vm11  ;;  %vm3281_vm11 = vcmp.eq.s32.totalorder %v6587_v63, %v9088_v23  ;;  %v9401_v60 = vpop.permute.xlu1 %2992  ;;  %3028 = vperm.xlu1 %5648, %v8982_v38   ;;  %v5230_v9 = vpop.f32.mrb[25].mxu0 }
 0x2fa   : > { %vm4682_vm6 = vmpackc.low %vm3344_vm5, %vm3342_vm3  ;;  %v5232_v34 = vpop.f32.mrb[26].mxu0 }
 0x2fb   : > { %4683 = vmatprep.mubr.msk.bf16.mxu0 %vm4682_vm6, %v10516_v15  ;;  %vm4684_vm1 = vmpackc.low %vm9347_vm15, %vm9339_vm7  ;;  %vm3282_vm15 = vcmp.eq.s32.totalorder %v6599_v58, %v9088_v23  ;;  %v5253_v23 = vpop.f32.mrb[8].mxu1  ;;  %v5233_v42 = vpop.f32.mrb[27].mxu0 }
 0x2fc   : > { %4685 = vmatmul.mubr.msk.bf16.gmra.mrb[52].mxu0 %vm4684_vm1, %v10516_v15  ;;  %vm9379_vm9 = vmor %vm2899_vm8, %vm3059_vm13  ;;  %vm3283_vm8 = vcmp.eq.s32.totalorder %v6587_v63, %v9099_v51  ;;  %v5254_v16 = vpop.f32.mrb[9].mxu1  ;;  %v5234_v55 = vadd.f32 %v5233_v42, %v5232_v34 }
 0x2fd   : > { %vm3124_vm7 = vmor %vm2900_vm14, %vm3060_vm10  ;;  %vm3284_vm14 = vcmp.eq.s32.totalorder %v6599_v58, %v9099_v51  ;;  %v9426_v38 = vpop.permute.xlu1 %3216  ;;  %v5231_v51 = vadd.f32 %v5230_v9, %v5229_v30  ;;  %3031 = vperm.xlu1 %5648, %v8898_v5   ;;  %v5255_v49 = vadd.f32 %v5254_v16, %v5253_v23  ;;  %v11082_v9 = vld [vmem:[#allocation94_spill] sm:$0xff] }
 0x2fe   : > { %vm3121_vm3 = vmor %vm2897_vm4, %vm3057_vm2  ;;  %vm2903_vm2 = vcmp.eq.s32.totalorder %v6587_v63, %v9137_v59 }
 0x2ff   : > { %vm3122_vm5 = vmor %vm2898_vm0, %vm3058_vm12  ;;  %vm2904_vm0 = vcmp.eq.s32.totalorder %v6599_v58, %v9137_v59  ;;  %vm3063_vm12 = vcmp.eq.s32.totalorder %v6587_v63, %v8336_v2  ;;  %v5256_v59 = vpop.f32.mrb[10].mxu1 }
 0x300   : > { %vm9395_vm6 = vmor %vm3121_vm3, %vm3281_vm11  ;;  %vm3061_vm11 = vcmp.eq.s32.totalorder %v6587_v63, %v9172_v6  ;;  %vm3064_vm3 = vcmp.eq.s32.totalorder %v6599_v58, %v8336_v2  ;;  %v5257_v52 = vpop.f32.mrb[11].mxu1 }
 0x301   : > { %vm3346_vm13 = vmor %vm3122_vm5, %vm3282_vm15  ;;  %vm2902_vm15 = vcmp.eq.s32.totalorder %v6599_v58, %v8777_v47  ;;  %v9465_v20 = vpop.permute.xlu1 %3219  ;;  %v5258_v53 = vadd.f32 %v5257_v52, %v5256_v59  ;;  %5650 = vset.pattern.permute.xlu1 %v10478_v61  ;;  %v5259_v27 = vpop.f32.mrb[12].mxu1 }
 0x302   : > { %vm9405_vm4 = vmor %vm9379_vm9, %vm3283_vm8  ;;  %vm2901_vm9 = vcmp.eq.s32.totalorder %v6587_v63, %v8777_v47  ;;  %vm3062_vm8 = vcmp.eq.s32.totalorder %v6599_v58, %v9172_v6  ;;  %v4893_v6 = vpack.c.bf16 %v5234_v55, %v5231_v51  ;;  %3255 = vperm.xlu1 %5650, %v8898_v5   ;;  %v5260_v3 = vpop.f32.mrb[13].mxu1  ;;  %v11055_v55 = vld [vmem:[#allocation107_spill] sm:$0xff] }
 0x303   : > { %vm3348_vm1 = vmor %vm3124_vm7, %vm3284_vm14  ;;  %vm3285_vm14 = vcmp.eq.s32.totalorder %v6587_v63, %v9202_v22  ;;  %v4913_v47 = vpack.c.bf16 %v5258_v53, %v5255_v49  ;;  %v5261_v39 = vadd.f32 %v5260_v3, %v5259_v27  ;;  %v5262_v43 = vpop.f32.mrb[14].mxu1  ;;  %v11068_v27 = vld [vmem:[#allocation13_spill] sm:$0xff] }
 0x304   : > { %vm4686_vm10 = vmpackc.low %vm3348_vm1, %vm3346_vm13  ;;  %5105 = vst [vmem:[%s8884_s23 + $0x30] sm:$0xff] %v4893_v6   ;;  %v5263_v11 = vpop.f32.mrb[15].mxu1 }
 0x305   : > { %4687 = vmatprep.mubr.msk.bf16.mxu0 %vm4686_vm10, %v10516_v15  ;;  %vm4688_vm7 = vmpackc.low %vm9405_vm4, %vm9395_vm6  ;;  %vm3286_vm4 = vcmp.eq.s32.totalorder %v6599_v58, %v9202_v22  ;;  %5109 = vst [vmem:[%s8884_s23 + $0x50] sm:$0xff] %v4913_v47   ;;  %v9489_v61 = vpop.permute.xlu1 %2841  ;;  %v5265_v57 = vpop.f32.mrb[16].mxu1 }
 0x306   : > { %4689 = vmatmul.mubr.msk.bf16.gmra.mrb[56].mxu0 %vm4688_vm7, %v10516_v15  ;;  %vm9436_vm5 = vmor %vm2903_vm2, %vm3063_vm12  ;;  %vm3287_vm2 = vcmp.eq.s32.totalorder %v6587_v63, %v9264_v1 }
 0x307   : > { %vm9445_vm6 = vmor %vm2904_vm0, %vm3064_vm3  ;;  %vm3288_vm0 = vcmp.eq.s32.totalorder %v6599_v58, %v9264_v1 }
 0x308   : > { %vm3125_vm13 = vmor %vm2901_vm9, %vm3061_vm11  ;;  %vm2907_vm11 = vcmp.eq.s32.totalorder %v6587_v63, %v9281_v40 }
 0x309   : > { %vm3126_vm1 = vmor %vm2902_vm15, %vm3062_vm8  ;;  %vm2908_vm15 = vcmp.eq.s32.totalorder %v6599_v58, %v9281_v40  ;;  %vm2905_vm8 = vcmp.eq.s32.totalorder %v6587_v63, %v8830_v21 }
 0x30a   : > { %vm9467_vm10 = vmor %vm3125_vm13, %vm3285_vm14  ;;  %vm3065_vm14 = vcmp.eq.s32.totalorder %v6587_v63, %v9299_v19  ;;  %vm3068_vm13 = vcmp.eq.s32.totalorder %v6599_v58, %v8416_v46 }
 0x30b   : > { %vm3350_vm12 = vmor %vm3126_vm1, %vm3286_vm4  ;;  %vm2906_vm4 = vcmp.eq.s32.totalorder %v6599_v58, %v8830_v21  ;;  %v5235_v21 = vpop.f32.mrb[28].mxu0 }
 0x30c   : > { %vm9477_vm9 = vmor %vm9436_vm5, %vm3287_vm2  ;;  %vm3067_vm5 = vcmp.eq.s32.totalorder %v6587_v63, %v8416_v46  ;;  %vm3066_vm2 = vcmp.eq.s32.totalorder %v6599_v58, %v9299_v19  ;;  %v9523_v46 = vpop.permute.xlu1 %2998  ;;  %v5236_v19 = vpop.f32.mrb[29].mxu0 }
 0x30d   : > { %vm3352_vm7 = vmor %vm9445_vm6, %vm3288_vm0  ;;  %v5237_v26 = vadd.f32 %v5236_v19, %v5235_v21  ;;  %v5238_v62 = vpop.f32.mrb[30].mxu0 }
 0x30e   : > { %vm4690_vm3 = vmpackc.low %vm3352_vm7, %vm3350_vm12  ;;  %v5239_v25 = vpop.f32.mrb[31].mxu0 }
 0x30f   : > { %4691 = vmatprep.mubr.msk.bf16.mxu0 %vm4690_vm3, %v10516_v15  ;;  %vm4692_vm6 = vmpackc.low %vm9477_vm9, %vm9467_vm10  ;;  %vm3289_vm10 = vcmp.eq.s32.totalorder %v6587_v63, %v9331_v32  ;;  %vm3290_vm9 = vcmp.eq.s32.totalorder %v6599_v58, %v9331_v32  ;;  %v5240_v33 = vadd.f32 %v5239_v25, %v5238_v62 }
 0x310   : > { %4693 = vmatmul.mubr.msk.bf16.gmra.mrb[60].mxu0 %vm4692_vm6, %v10516_v15  ;;  %vm9507_vm1 = vmor %vm2907_vm11, %vm3067_vm5  ;;  %vm3291_vm11 = vcmp.eq.s32.totalorder %v6587_v63, %v9352_v13  ;;  %v9549_v29 = vpop.permute.xlu1 %3222 }
 0x311   : > { %vm9513_vm0 = vmor %vm2908_vm15, %vm3068_vm13  ;;  %vm3292_vm15 = vcmp.eq.s32.totalorder %v6599_v58, %v9352_v13  ;;  %v4898_v32 = vpack.c.bf16 %v5240_v33, %v5237_v26  ;;  %v5266_v13 = vpop.f32.mrb[17].mxu1 }
 0x312   : > { %vm3129_vm12 = vmor %vm2905_vm8, %vm3065_vm14  ;;  %vm2911_vm14 = vcmp.eq.s32.totalorder %v6587_v63, %v9385_v14  ;;  %v5268_v12 = vpop.f32.mrb[18].mxu1 }
 0x313   : > { %vm3130_vm7 = vmor %vm2906_vm4, %vm3066_vm2  ;;  %vm2912_vm4 = vcmp.eq.s32.totalorder %v6599_v58, %v9385_v14  ;;  %vm3072_vm2 = vcmp.eq.s32.totalorder %v6599_v58, %v8474_v35  ;;  %5106 = vst [vmem:[%s8884_s23 + $0x38] sm:$0xff] %v4898_v32   ;;  %v5269_v41 = vpop.f32.mrb[19].mxu1  ;;  %v11077_v14 = vld [vmem:[#allocation56_spill] sm:$0xff] }
 0x314   : > { %vm9525_vm3 = vmor %vm3129_vm12, %vm3289_vm10  ;;  %vm3069_vm12 = vcmp.eq.s32.totalorder %v6587_v63, %v9401_v60  ;;  %v3226_v18 = vpop.permute.xlu1 %3225  ;;  %v5270_v36 = vadd.f32 %v5269_v41, %v5268_v12  ;;  %v5271_v10 = vpop.f32.mrb[20].mxu1 }
 0x315   : > { %vm9531_vm5 = vmor %vm3130_vm7, %vm3290_vm9  ;;  %vm2910_vm9 = vcmp.eq.s32.totalorder %v6599_v58, %v8895_v48  ;;  %v5272_v23 = vpop.f32.mrb[21].mxu1 }
 0x316   : > { %vm9537_vm8 = vmor %vm9507_vm1, %vm3291_vm11  ;;  %vm3071_vm1 = vcmp.eq.s32.totalorder %v6587_v63, %v8474_v35  ;;  %v5264_v35 = vadd.f32 %v5263_v11, %v5262_v43  ;;  %vm3070_vm11 = vcmp.eq.s32.totalorder %v6599_v58, %v9401_v60  ;;  %v5273_v51 = vadd.f32 %v5272_v23, %v5271_v10  ;;  %v5274_v34 = vpop.f32.mrb[22].mxu1  ;;  %v11074_v43 = vld [vmem:[#allocation92_spill] sm:$0xff] }
 0x317   : > { %vm3356_vm6 = vmor %vm9513_vm0, %vm3292_vm15  ;;  %vm2909_vm0 = vcmp.eq.s32.totalorder %v6587_v63, %v8895_v48  ;;  %vm3293_vm15 = vcmp.eq.s32.totalorder %v6587_v63, %v9426_v38  ;;  %v5267_v48 = vadd.f32 %v5266_v13, %v5265_v57  ;;  %v5275_v16 = vpop.f32.mrb[23].mxu1  ;;  %v11076_v13 = vld [vmem:[#allocation109_spill] sm:$0xff]  ;;  %v2527_v10 = vld [vmem:[%s8884_s23 + $0x18] sm:$0xf] }
 0x318   : > { %vm4694_vm13 = vmpackc.low %vm3356_vm6, %vm9531_vm5  ;;  %v4918_v54 = vpack.c.bf16 %v5264_v35, %v5261_v39  ;;  %v2845_v60 = vpop.permute.xlu1 %2844  ;;  %v5276_v42 = vadd.f32 %v5275_v16, %v5274_v34  ;;  %v5277_v6 = vpop.f32.mrb[24].mxu1 }
 0x319   : > { %4695 = vmatprep.mubr.msk.bf16.mxu0 %vm4694_vm13, %v10516_v15  ;;  %vm4696_vm10 = vmpackc.low %vm9537_vm8, %vm9525_vm3  ;;  %vm3294_vm8 = vcmp.eq.s32.totalorder %v6599_v58, %v9426_v38  ;;  %v4923_v30 = vpack.c.bf16 %v5270_v36, %v5267_v48  ;;  %v2521_v38 = vld [vmem:[%s8884_s23] sm:$0xf] }
 0x31a   : > { %4697 = vmatmul.mubr.msk.bf16.gmra.mrb[64].mxu0 %vm4696_vm10, %v10516_v15  ;;  %vm9570_vm7 = vmor %vm2911_vm14, %vm3071_vm1  ;;  %vm3295_vm14 = vcmp.eq.s32.totalorder %v6587_v63, %v9465_v20  ;;  %5110 = vst [vmem:[%s8884_s23 + $0x58] sm:$0xff] %v4918_v54   ;;  %vm2915_vm10 = vcmp.eq.s32.totalorder %v6587_v63, %v9489_v61  ;;  %v4928_v59 = vpack.c.bf16 %v5276_v42, %v5273_v51  ;;  %v2540_v42 = vld [vmem:[%s8884_s23 + $0x4c] sm:$0xf] }
 0x31b   : > { %vm9579_vm3 = vmor %vm2912_vm4, %vm3072_vm2  ;;  %vm3296_vm4 = vcmp.eq.s32.totalorder %v6599_v58, %v9465_v20  ;;  %5111 = vst [vmem:[%s8884_s23 + $0x60] sm:$0xff] %v4923_v30   ;;  %v3232_v20 = vpop.permute.xlu0 %3231 }
 0x31c   : > { %vm3133_vm5 = vmor %vm2909_vm0, %vm3069_vm12  ;;  %5112 = vst [vmem:[%s8884_s23 + $0x68] sm:$0xff] %v4928_v59  }
 0x31d   : > { %vm3134_vm6 = vmor %vm2910_vm9, %vm3070_vm11  ;;  %vm2916_vm9 = vcmp.eq.s32.totalorder %v6599_v58, %v9489_v61  ;;  %vm2913_vm11 = vcmp.eq.s32.totalorder %v6587_v63, %v8978_v28 }
 0x31e   : > { %vm9594_vm13 = vmor %vm3133_vm5, %vm3293_vm15  ;;  %vm3073_vm15 = vcmp.eq.s32.totalorder %v6587_v63, %v9523_v46  ;;  %vm3076_vm5 = vcmp.eq.s32.totalorder %v6599_v58, %v8543_v0 }
 0x31f   : > { %vm3358_vm1 = vmor %vm3134_vm6, %vm3294_vm8  ;;  %vm2914_vm8 = vcmp.eq.s32.totalorder %v6599_v58, %v8978_v28 }
 0x320   : > { %vm9602_vm2 = vmor %vm9570_vm7, %vm3295_vm14  ;;  %vm3075_vm7 = vcmp.eq.s32.totalorder %v6587_v63, %v8543_v0  ;;  %vm3074_vm14 = vcmp.eq.s32.totalorder %v6599_v58, %v9523_v46  ;;  %v2848_v0 = vpop.permute.xlu1 %2847 }
 0x321   : > { %vm3360_vm0 = vmor %vm9579_vm3, %vm3296_vm4  ;;  %vm3297_vm4 = vcmp.eq.s32.totalorder %v6587_v63, %v9549_v29 }
 0x322   : > { %vm4698_vm12 = vmpackc.low %vm3360_vm0, %vm3358_vm1 }
 0x323   : > { %4699 = vmatprep.mubr.msk.bf16.mxu0 %vm4698_vm12, %v10516_v15  ;;  %vm4700_vm3 = vmpackc.low %vm9602_vm2, %vm9594_vm13  ;;  %vm3298_vm2 = vcmp.eq.s32.totalorder %v6599_v58, %v9549_v29 }
 0x324   : > { %4701 = vmatmul.mubr.msk.bf16.gmra.mrb[68].mxu0 %vm4700_vm3, %v10516_v15  ;;  %vm9628_vm6 = vmor %vm2915_vm10, %vm3075_vm7  ;;  %vm3299_vm10 = vcmp.eq.s32.totalorder %v6587_v63, %v3226_v18  ;;  %v3008_v49 = vpop.permute.xlu1 %3007  ;;  %vm1772_vm3 = vcmp.eq.s32.totalorder %v6587_v63, %v7845_v44 }
 0x325   : > { %vm9634_vm13 = vmor %vm2916_vm9, %vm3076_vm5  ;;  %vm3300_vm9 = vcmp.eq.s32.totalorder %v6599_v58, %v3226_v18  ;;  %vm2917_vm5 = vcmp.eq.s32.totalorder %v6587_v63, %v2845_v60 }
 0x326   : > { %vm3137_vm1 = vmor %vm2913_vm11, %vm3073_vm15 }
 0x327   : > { %vm3138_vm0 = vmor %vm2914_vm8, %vm3074_vm14  ;;  %vm1773_vm8 = vcmp.eq.s32.totalorder %v6599_v58, %v7845_v44 }
 0x328   : > { %vm9647_vm12 = vmor %vm3137_vm1, %vm3297_vm4  ;;  %vm1612_vm4 = vcmp.eq.s32.totalorder %v6587_v63, %v11055_v55  ;;  %vm3077_vm1 = vcmp.eq.s32.totalorder %v6587_v63, %v8595_v17  ;;  %v3229_v22 = vpop.permute.xlu1 %3228 }
 0x329   : > { %vm3362_vm7 = vmor %vm3138_vm0, %vm3298_vm2  ;;  %vm3079_vm2 = vcmp.eq.s32.totalorder %v6587_v63, %v3008_v49  ;;  %vm1613_vm0 = vcmp.eq.s32.totalorder %v6599_v58, %v11055_v55 }
 0x32a   : > { %vm9654_vm11 = vmor %vm9628_vm6, %vm3299_vm10  ;;  %vm2918_vm6 = vcmp.eq.s32.totalorder %v6599_v58, %v2845_v60  ;;  %v1934_v60 = vpop.permute.xlu0 %1933 }
 0x32b   : > { %vm3364_vm15 = vmor %vm9634_vm13, %vm3300_vm9  ;;  %vm3078_vm9 = vcmp.eq.s32.totalorder %v6599_v58, %v8595_v17  ;;  %v5278_v17 = vpop.f32.mrb[25].mxu1 }
 0x32c   : > { %vm4702_vm14 = vmpackc.low %vm3364_vm15, %vm3362_vm7  ;;  %vm3080_vm7 = vcmp.eq.s32.totalorder %v6599_v58, %v3008_v49  ;;  %v5279_v61 = vadd.f32 %v5278_v17, %v5277_v6  ;;  %v5280_v44 = vpop.f32.mrb[26].mxu1  ;;  %v1928_v21 = vpop.permute.xlu1 %1927 }
 0x32d   : > { %4703 = vmatprep.mubr.msk.bf16.mxu0 %vm4702_vm14, %v10516_v15  ;;  %vm4704_vm13 = vmpackc.low %vm9654_vm11, %vm9647_vm12  ;;  %vm3304_vm14 = vcmp.eq.s32.totalorder %v6599_v58, %v3232_v20  ;;  %v5281_v5 = vpop.f32.mrb[27].mxu1 }
 0x32e   : > { %vm9678_vm10 = vmor %vm1612_vm4, %vm1772_vm3  ;;  %4705 = vmatmul.mubr.msk.bf16.gmra.mrb[72].mxu0 %vm4704_vm13, %v10516_v15  ;;  %vm3303_vm3 = vcmp.eq.s32.totalorder %v6587_v63, %v3232_v20  ;;  %v5282_v1 = vadd.f32 %v5281_v5, %v5280_v44  ;;  %v5283_v37 = vpop.f32.mrb[28].mxu1  ;;  %v2523_v44 = vld [vmem:[%s8884_s23 + $0x8] sm:$0xf]  ;;  %v2524_v5 = vld [vmem:[%s8884_s23 + $0xc] sm:$0xf]  ;;  %v3241_v39 = vpop.permute.xlu0 %3240 }
 0x32f   : > { %vm9688_vm12 = vmor %vm2917_vm5, %vm3077_vm1  ;;  %vm2919_vm5 = vcmp.eq.s32.totalorder %v6587_v63, %v2848_v0  ;;  %v5284_v26 = vpop.f32.mrb[29].mxu1 }
 0x330   : > { %vm9696_vm11 = vmor %vm1613_vm0, %vm1773_vm8  ;;  %vm2920_vm8 = vcmp.eq.s32.totalorder %v6599_v58, %v2848_v0  ;;  %vm3302_vm0 = vcmp.eq.s32.totalorder %v6599_v58, %v3229_v22  ;;  %v4933_v40 = vpack.c.bf16 %v5282_v1, %v5279_v61  ;;  %v1931_v24 = vpop.permute.xlu1 %1930  ;;  %v5285_v3 = vadd.f32 %v5284_v26, %v5283_v37  ;;  %v5286_v25 = vpop.f32.mrb[30].mxu1  ;;  %v2522_v0 = vld [vmem:[%s8884_s23 + $0x4] sm:$0xf]  ;;  %v2529_v61 = vld [vmem:[%s8884_s23 + $0x20] sm:$0xf] }
 0x331   : > { %v11061_v45 = vsel %vm9696_vm11, 4294967295, %v11060_v45  ;;  %vm9703_vm15 = vmor %vm2918_vm6, %vm3078_vm9  ;;  %vm3301_vm6 = vcmp.eq.s32.totalorder %v6587_v63, %v3229_v22  ;;  %v5287_v33 = vpop.f32.mrb[31].mxu1 }
 0x332   : > { %vm3143_vm4 = vmor %vm2919_vm5, %vm3079_vm2  ;;  %vm1996_vm2 = vcmp.eq.s32.totalorder %v6587_v63, %v1928_v21  ;;  %5113 = vst [vmem:[%s8884_s23 + $0x70] sm:$0xff] %v4933_v40   ;;  %v5288_v29 = vadd.f32 %v5287_v33, %v5286_v25  ;;  %v5305_v35 = vpop.f32.mrb[32].mxu1  ;;  %v2525_v33 = vld [vmem:[%s8884_s23 + $0x10] sm:$0xf] }
 0x333   : > { %vm3144_vm1 = vmor %vm2920_vm8, %vm3080_vm7  ;;  %vm11071_vm8 = vnez %v11061_v45  ;;  %v5306_v4 = vpop.f32.mrb[33].mxu1 }
 0x334   : > { %vm9713_vm13 = vmor %vm3143_vm4, %vm3303_vm3  ;;  %vm1997_vm3 = vcmp.eq.s32.totalorder %v6599_v58, %v1928_v21  ;;  %v4938_v11 = vpack.c.bf16 %v5288_v29, %v5285_v3  ;;  %v2854_v32 = vpop.permute.xlu1 %2853  ;;  %v5307_v54 = vadd.f32 %v5306_v4, %v5305_v35  ;;  %v5308_v18 = vpop.f32.mrb[34].mxu1  ;;  %v2526_v29 = vld [vmem:[%s8884_s23 + $0x14] sm:$0xf] }
 0x335   : > { %vm3368_vm9 = vmor %vm3144_vm1, %vm3304_vm14  ;;  %vm1774_vm14 = vcmp.eq.s32.totalorder %v6587_v63, %v11068_v27  ;;  %vm1614_vm1 = vcmp.eq.s32.totalorder %v6587_v63, %v11074_v43  ;;  %v5309_v57 = vpop.f32.mrb[35].mxu1 }
 0x336   : > { %vm9720_vm11 = vmor %vm9688_vm12, %vm3301_vm6  ;;  %vm1998_vm6 = vcmp.eq.s32.totalorder %v6587_v63, %v1931_v24  ;;  %5114 = vst [vmem:[%s8884_s23 + $0x78] sm:$0xff] %v4938_v11   ;;  %v4795_v48 = vpack.c.bf16 %v5307_v54, %v5307_v54  ;;  %v5310_v12 = vadd.f32 %v5309_v57, %v5308_v18  ;;  %v5311_v51 = vpop.f32.mrb[36].mxu1 }
 0x337   : > { %vm3366_vm7 = vmor %vm9703_vm15, %vm3302_vm0  ;;  %vm1775_vm15 = vcmp.eq.s32.totalorder %v6599_v58, %v11068_v27  ;;  %vm1615_vm0 = vcmp.eq.s32.totalorder %v6599_v58, %v11074_v43  ;;  %v5312_v16 = vpop.f32.mrb[37].mxu1 }
 0x338   : > { %vm4706_vm5 = vmpackc.low %vm3368_vm9, %vm3366_vm7  ;;  %v3011_v8 = vpop.permute.xlu1 %3010  ;;  %v4796_v30 = vpack.c.bf16 %v5310_v12, %v5310_v12  ;;  %v2681_v23 = vadd.bf16 %v4795_v48, %v2521_v38  ;;  %v5313_v59 = vadd.f32 %v5312_v16, %v5311_v51  ;;  %v5314_v55 = vpop.f32.mrb[38].mxu1  ;;  %v11104_v48 = vld [vmem:[#allocation96_spill] sm:$0xff] }
 0x339   : > { %4707 = vmatprep.mubr.msk.bf16.mxu0 %vm4706_vm5, %v10516_v15  ;;  %vm9734_vm12 = vmor %vm9678_vm10, %vm1996_vm2  ;;  %vm1999_vm2 = vcmp.eq.s32.totalorder %v6599_v58, %v1931_v24  ;;  %v5315_v20 = vpop.f32.mrb[39].mxu1  ;;  %v1943_v12 = vpop.permute.xlu0 %1942 }
 0x33a   : > { %vm9742_vm4 = vmor %vm11071_vm8, %vm1997_vm3  ;;  %vm1616_vm8 = vcmp.eq.s32.totalorder %v6587_v63, %v11076_v13  ;;  %v4797_v53 = vpack.c.bf16 %v5313_v59, %v5313_v59  ;;  %v5316_v45 = vadd.f32 %v5315_v20, %v5314_v55  ;;  %v5317_v21 = vpop.f32.mrb[40].mxu1  ;;  %v11119_v59 = vmov 0 }
 0x33b   : > { %vm4708_vm10 = vmpackc.low %vm9713_vm13, %vm9720_vm11  ;;  %v5318_v19 = vpop.f32.mrb[41].mxu1 }
 0x33c   : > { %4709 = vmatmul.mubr.msk.bf16.gmra.mrb[76].mxu0 %vm4708_vm10, %v10516_v15  ;;  %vm1838_vm9 = vmor %vm1614_vm1, %vm1774_vm14  ;;  %vm1776_vm14 = vcmp.eq.s32.totalorder %v6587_v63, %v11075_v56  ;;  %vm1778_vm1 = vcmp.eq.s32.totalorder %v6587_v63, %v11077_v14  ;;  %v3235_v2 = vpop.permute.xlu1 %3234  ;;  %v4798_v22 = vpack.c.bf16 %v5316_v45, %v5316_v45  ;;  %v2683_v1 = vadd.bf16 %v4797_v53, %v2523_v44  ;;  %v5320_v26 = vpop.f32.mrb[42].mxu1  ;;  %v2530_v44 = vld [vmem:[%s8884_s23 + $0x24] sm:$0xf] }
 0x33d   : > { %vm1839_vm7 = vmor %vm1615_vm0, %vm1775_vm15  ;;  %vm1777_vm15 = vcmp.eq.s32.totalorder %v6599_v58, %v11075_v56  ;;  %v5319_v27 = vadd.f32 %v5318_v19, %v5317_v21  ;;  %v5321_v62 = vpop.f32.mrb[43].mxu1  ;;  %v11103_v56 = vld [vmem:[#allocation22_spill] sm:$0xff] }
 0x33e   : > { %vm2062_vm3 = vmor %vm1838_vm9, %vm1998_vm6  ;;  %vm2924_vm6 = vcmp.eq.s32.totalorder %v6599_v58, %v2854_v32  ;;  %vm3083_vm9 = vcmp.eq.s32.totalorder %v6587_v63, %v8674_v31  ;;  %v2684_v46 = vadd.bf16 %v4798_v22, %v2524_v5  ;;  %v5322_v3 = vadd.f32 %v5321_v62, %v5320_v26  ;;  %v5323_v35 = vpop.f32.mrb[44].mxu1 }
 0x33f   : > { %vm2063_vm5 = vmor %vm1839_vm7, %vm1999_vm2  ;;  %vm2921_vm2 = vcmp.eq.s32.totalorder %v6587_v63, %v9022_v50  ;;  %vm3081_vm7 = vcmp.eq.s32.totalorder %v6587_v63, %v3011_v8  ;;  %v4799_v24 = vpack.c.bf16 %v5319_v27, %v5319_v27  ;;  %v5324_v4 = vpop.f32.mrb[45].mxu1 }
 0x340   : > { %vm4506_vm11 = vmpackc.low %vm2063_vm5, %vm9742_vm4  ;;  %vm1617_vm4 = vcmp.eq.s32.totalorder %v6599_v58, %v11076_v13  ;;  %vm3084_vm5 = vcmp.eq.s32.totalorder %v6599_v58, %v8674_v31  ;;  %v2682_v31 = vadd.bf16 %v4796_v30, %v2522_v0  ;;  %v3238_v47 = vpop.permute.xlu1 %3237  ;;  %v5116_v37 = vcombine.low %v2683_v1, %v2684_v46  ;;  %v5326_v57 = vpop.f32.mrb[46].mxu1  ;;  %v11110_v0 = vld [vmem:[#allocation110_spill] sm:$0xff] }
 0x341   : > { %4507 = vmatprep.mubr.msk.bf16.mxu1 %vm4506_vm11, %v10516_v15  ;;  %vm4508_vm13 = vmpackc.low %vm2062_vm3, %vm9734_vm12  ;;  %vm2923_vm12 = vcmp.eq.s32.totalorder %v6587_v63, %v2854_v32  ;;  %vm1618_vm3 = vcmp.eq.s32.totalorder %v6587_v63, %v11082_v9  ;;  %vm2922_vm11 = vcmp.eq.s32.totalorder %v6599_v58, %v9022_v50  ;;  %v4800_v43 = vpack.c.bf16 %v5322_v3, %v5322_v3  ;;  %v5327_v13 = vpop.f32.mrb[47].mxu1 }
 0x342   : > { %4509 = vmatmul.mubr.msk.bf16.gmra.mrb[84].mxu1 %vm4508_vm13, %v10516_v15  ;;  %vm9778_vm10 = vmor %vm1616_vm8, %vm1776_vm14  ;;  %vm3082_vm14 = vcmp.eq.s32.totalorder %v6599_v58, %v3011_v8  ;;  %vm2001_vm8 = vcmp.eq.s32.totalorder %v6599_v58, %v1934_v60  ;;  %v5115_v49 = vcombine.low %v2681_v23, %v2682_v31  ;;  %5117 = vst [vmem:[%s8884_s23 + $0x8] sm:$0xff] %v5116_v37   ;;  %v2528_v23 = vld [vmem:[%s8884_s23 + $0x1c] sm:$0xf] }
 0x343   : > { %vm9783_vm0 = vmor %vm1617_vm4, %vm1777_vm15  ;;  %v2685_v11 = vadd.bf16 %v4799_v24, %v2525_v33  ;;  %v2686_v32 = vadd.bf16 %v4800_v43, %v2526_v29  ;;  %v5325_v18 = vadd.f32 %v5324_v4, %v5323_v35  ;;  %v5328_v41 = vadd.f32 %v5327_v13, %v5326_v57  ;;  %v2532_v43 = vld [vmem:[%s8884_s23 + $0x2c] sm:$0xf]  ;;  %v3247_v29 = vpop.permute.xlu0 %3246 }
 0x344   : > { %vm9802_vm13 = vmor %vm2923_vm12, %vm3083_vm9  ;;  %vm2000_vm12 = vcmp.eq.s32.totalorder %v6587_v63, %v1934_v60  ;;  %4944 = vst [vmem:[%s8884_s23] sm:$0xff] %v5115_v49   ;;  %v1937_v40 = vpop.permute.xlu1 %1936  ;;  %v11105_v60 = vld [vmem:[#allocation21_spill] sm:$0xff]  ;;  %v2534_v49 = vld [vmem:[%s8884_s23 + $0x34] sm:$0xf] }
 0x345   : > { %vm9812_vm4 = vmor %vm2924_vm6, %vm3084_vm5  ;;  %vm1619_vm5 = vcmp.eq.s32.totalorder %v6599_v58, %v11082_v9  ;;  %v5118_v54 = vcombine.low %v2685_v11, %v2686_v32  ;;  %v4802_v30 = vpack.c.bf16 %v5328_v41, %v5328_v41 }
 0x346   : > { %vm9822_vm9 = vmor %vm2921_vm2, %vm3081_vm7  ;;  %vm3306_vm7 = vcmp.eq.s32.totalorder %v6599_v58, %v3235_v2 }
 0x347   : > { %vm9833_vm6 = vmor %vm1618_vm3, %vm1778_vm1  ;;  %vm11093_vm3 = vcmp.eq.s32.totalorder %v6599_v58, %v11077_v14  ;;  %5119 = vst [vmem:[%s8884_s23 + $0x10] sm:$0xff] %v5118_v54   ;;  %v4801_v14 = vpack.c.bf16 %v5325_v18, %v5325_v18 }
 0x348   : > { %vm3146_vm2 = vmor %vm2922_vm11, %vm3082_vm14 }
 0x349   : > { %vm9849_vm1 = vmor %vm9783_vm0, %vm2001_vm8  ;;  %vm11098_vm0 = vcmp.eq.s32.totalorder %v6587_v63, %v3235_v2  ;;  %v2857_v25 = vpop.permute.xlu1 %2856  ;;  %v2687_v34 = vadd.bf16 %v4801_v14, %v2527_v10  ;;  %v2688_v2 = vadd.bf16 %v4802_v30, %v2528_v23 }
 0x34a   : > { %vm9856_vm15 = vmor %vm1619_vm5, %vm11093_vm3  ;;  %vm3307_vm5 = vcmp.eq.s32.totalorder %v6587_v63, %v3238_v47  ;;  %v5329_v16 = vpop.f32.mrb[48].mxu1 }
 0x34b   : > { %vm9862_vm11 = vmor %vm9778_vm10, %vm2000_vm12  ;;  %vm3308_vm10 = vcmp.eq.s32.totalorder %v6599_v58, %v3238_v47  ;;  %v5330_v28 = vpop.f32.mrb[49].mxu1  ;;  %v5120_v55 = vcombine.low %v2687_v34, %v2688_v2  ;;  %v3834_v41 = vld [vmem:[%s8884_s23] sm:$0xf] }
 0x34c   : > { %vm9871_vm14 = vmor %vm9822_vm9, %vm11098_vm0  ;;  %v5331_v52 = vadd.f32 %v5330_v28, %v5329_v16  ;;  %v5332_v20 = vpop.f32.mrb[50].mxu1  ;;  %v2533_v28 = vld [vmem:[%s8884_s23 + $0x30] sm:$0xf] }
 0x34d   : > { %vm3370_vm8 = vmor %vm3146_vm2, %vm3306_vm7  ;;  %vm2002_vm7 = vcmp.eq.s32.totalorder %v6587_v63, %v1937_v40  ;;  %v5333_v53 = vpop.f32.mrb[51].mxu1  ;;  %5121 = vst [vmem:[%s8884_s23 + $0x18] sm:$0xff] %v5120_v55  }
 0x34e   : > { %vm9879_vm12 = vmor %vm9802_vm13, %vm3307_vm5  ;;  %vm2003_vm13 = vcmp.eq.s32.totalorder %v6599_v58, %v1937_v40  ;;  %v3017_v8 = vpop.permute.xlu1 %3016  ;;  %vm1623_vm5 = vcmp.eq.s32.totalorder %v6599_v58, %v11104_v48  ;;  %v4803_v17 = vpack.c.bf16 %v5331_v52, %v5331_v52  ;;  %v5334_v47 = vadd.f32 %v5333_v53, %v5332_v20 }
 0x34f   : > { %vm3372_vm9 = vmor %vm9812_vm4, %vm3308_vm10  ;;  %vm1783_vm10 = vcmp.eq.s32.totalorder %v6599_v58, %v11103_v56 }
 0x350   : > { %vm4710_vm2 = vmpackc.low %vm3372_vm9, %vm3370_vm8  ;;  %v4804_v22 = vpack.c.bf16 %v5334_v47, %v5334_v47  ;;  %v2689_v1 = vadd.bf16 %v4803_v17, %v2529_v61 }
 0x351   : > { %4711 = vmatprep.mubr.msk.bf16.mxu0 %vm4710_vm2, %v10516_v15  ;;  %vm4712_vm3 = vmpackc.low %vm9879_vm12, %vm9871_vm14  ;;  %vm1780_vm12 = vcmp.eq.s32.totalorder %v6587_v63, %v11105_v60  ;;  %vm2925_vm2 = vcmp.eq.s32.totalorder %v6587_v63, %v2857_v25 }
 0x352   : > { %vm2066_vm4 = vmor %vm9833_vm6, %vm2002_vm7  ;;  %4713 = vmatmul.mubr.msk.bf16.gmra.mrb[80].mxu0 %vm4712_vm3, %v10516_v15  ;;  %vm3085_vm6 = vcmp.eq.s32.totalorder %v6587_v63, %v3017_v8  ;;  %vm1781_vm7 = vcmp.eq.s32.totalorder %v6599_v58, %v11105_v60  ;;  %vm2926_vm3 = vcmp.eq.s32.totalorder %v6599_v58, %v2857_v25  ;;  %v3020_v38 = vpop.permute.xlu1 %3019  ;;  %v2690_v46 = vadd.bf16 %v4804_v22, %v2530_v44 }
 0x353   : > { %vm2067_vm0 = vmor %vm9856_vm15, %vm2003_vm13  ;;  %vm1782_vm15 = vcmp.eq.s32.totalorder %v6587_v63, %v11103_v56  ;;  %vm3309_vm13 = vcmp.eq.s32.totalorder %v6587_v63, %v3241_v39 }
 0x354   : > { %vm4510_vm14 = vmpackc.low %vm2067_vm0, %vm9849_vm1  ;;  %vm1622_vm1 = vcmp.eq.s32.totalorder %v6587_v63, %v11104_v48  ;;  %vm1620_vm0 = vcmp.eq.s32.totalorder %v6587_v63, %v11110_v0  ;;  %v5335_v21 = vpop.f32.mrb[52].mxu1  ;;  %v5122_v19 = vcombine.low %v2689_v1, %v2690_v46  ;;  %v2536_v1 = vld [vmem:[%s8884_s23 + $0x3c] sm:$0xf] }
 0x355   : > { %4511 = vmatprep.mubr.msk.bf16.mxu1 %vm4510_vm14, %v10516_v15  ;;  %vm4512_vm8 = vmpackc.low %vm2066_vm4, %vm9862_vm11  ;;  %vm3086_vm11 = vcmp.eq.s32.totalorder %v6599_v58, %v3017_v8  ;;  %vm1621_vm14 = vcmp.eq.s32.totalorder %v6599_v58, %v11110_v0  ;;  %v5336_v40 = vpop.f32.mrb[53].mxu1  ;;  %v3835_v0 = vld [vmem:[%s8884_s23 + $0x4] sm:$0xf] }
 0x356   : > { %4513 = vmatmul.mubr.msk.bf16.gmra.mrb[88].mxu1 %vm4512_vm8, %v10516_v15  ;;  %vm9924_vm9 = vmor %vm1622_vm1, %vm1782_vm15  ;;  %vm2007_vm15 = vcmp.eq.s32.totalorder %v6599_v58, %v1943_v12  ;;  %vm2006_vm8 = vcmp.eq.s32.totalorder %v6587_v63, %v1943_v12  ;;  %v5337_v37 = vadd.f32 %v5336_v40, %v5335_v21  ;;  %v5338_v27 = vpop.f32.mrb[54].mxu1  ;;  %5123 = vst [vmem:[%s8884_s23 + $0x20] sm:$0xff] %v5122_v19   ;;  %v2866_v12 = vpop.permute.xlu0 %2865 }
 0x357   : > { %vm9935_vm4 = vmor %vm2925_vm2, %vm3085_vm6  ;;  %v3244_v45 = vpop.permute.xlu1 %3243  ;;  %v5339_v26 = vpop.f32.mrb[55].mxu1 }
 0x358   : > { %vm9949_vm1 = vmor %vm2926_vm3, %vm3086_vm11  ;;  %vm3087_vm11 = vcmp.eq.s32.totalorder %v6587_v63, %v3020_v38  ;;  %vm2927_vm3 = vcmp.eq.s32.totalorder %v6587_v63, %v9062_v7  ;;  %v4805_v62 = vpack.c.bf16 %v5337_v37, %v5337_v37  ;;  %v5340_v24 = vadd.f32 %v5339_v26, %v5338_v27 }
 0x359   : > { %vm9956_vm6 = vmor %vm1620_vm0, %vm1780_vm12  ;;  %vm11121_vm0 = vcmp.eq.s32.totalorder %v6599_v58, %v3241_v39  ;;  %v2531_v39 = vld [vmem:[%s8884_s23 + $0x28] sm:$0xf] }
 0x35a   : > { %vm1847_vm2 = vmor %vm1623_vm5, %vm1783_vm10  ;;  %vm3088_vm10 = vcmp.eq.s32.totalorder %v6599_v58, %v3020_v38  ;;  %v4806_v25 = vpack.c.bf16 %v5340_v24, %v5340_v24  ;;  %v2691_v11 = vadd.bf16 %v4805_v62, %v2531_v39  ;;  %v2872_v61 = vpop.permute.xlu0 %2871 }
 0x35b   : > { %vm9971_vm12 = vmor %vm1621_vm14, %vm1781_vm7  ;;  %v1940_v5 = vpop.permute.xlu1 %1939 }
 0x35c   : > { %vm9979_vm5 = vmor %vm9935_vm4, %vm3309_vm13  ;;  %vm2928_vm4 = vcmp.eq.s32.totalorder %v6599_v58, %v9062_v7  ;;  %v2692_v32 = vadd.bf16 %v4806_v25, %v2532_v43 }
 0x35d   : > { %vm9988_vm7 = vmor %vm1847_vm2, %vm2007_vm15  ;;  %vm3311_vm2 = vcmp.eq.s32.totalorder %v6587_v63, %v3244_v45 }
 0x35e   : > { %v11120_v59 = vsel %vm9988_vm7, 4294967295, %v11119_v59  ;;  %vm9996_vm13 = vmor %vm9949_vm1, %vm11121_vm0  ;;  %vm3312_vm0 = vcmp.eq.s32.totalorder %v6599_v58, %v3244_v45  ;;  %v5124_v18 = vcombine.low %v2691_v11, %v2692_v32  ;;  %v3253_v26 = vpop.permute.xlu0 %3252 }
 0x35f   : > { %vm10006_vm14 = vmor %vm9924_vm9, %vm2006_vm8 }
 0x360   : > { %vm3151_vm15 = vmor %vm2927_vm3, %vm3087_vm11  ;;  %vm2004_vm11 = vcmp.eq.s32.totalorder %v6587_v63, %v1940_v5  ;;  %v2863_v3 = vpop.permute.xlu1 %2862  ;;  %5125 = vst [vmem:[%s8884_s23 + $0x28] sm:$0xff] %v5124_v18   ;;  %v2538_v18 = vld [vmem:[%s8884_s23 + $0x44] sm:$0xf] }
 0x361   : > { %vm3152_vm1 = vmor %vm2928_vm4, %vm3088_vm10  ;;  %vm2005_vm10 = vcmp.eq.s32.totalorder %v6599_v58, %v1940_v5  ;;  %v2535_v5 = vld [vmem:[%s8884_s23 + $0x38] sm:$0xf] }
 0x362   : > { %vm10015_vm7 = vmor %vm3151_vm15, %vm3311_vm2  ;;  %vm11128_vm15 = vnez %v11120_v59  ;;  %v5417_v33 = vpop.f32.mrb[32].mxu0 }
 0x363   : > { %vm3376_vm9 = vmor %vm3152_vm1, %vm3312_vm0  ;;  %v5418_v35 = vpop.f32.mrb[33].mxu0  ;;  %vm3313_vm0 = vcmp.eq.s32.totalorder %v6587_v63, %v3247_v29 }
 0x364   : > { %vm4714_vm8 = vmpackc.low %vm3376_vm9, %vm9996_vm13  ;;  %v5419_v4 = vadd.f32 %v5418_v35, %v5417_v33  ;;  %v5420_v56 = vpop.f32.mrb[34].mxu0 }
 0x365   : > { %4715 = vmatprep.mubr.msk.bf16.mxu0 %vm4714_vm8, %v10516_v15  ;;  %vm4716_vm3 = vmpackc.low %vm10015_vm7, %vm9979_vm5  ;;  %v3023_v54 = vpop.permute.xlu1 %3022  ;;  %v5421_v57 = vpop.f32.mrb[35].mxu0  ;;  %vm2929_vm7 = vcmp.eq.s32.totalorder %v6587_v63, %v2863_v3  ;;  %vm2931_vm8 = vcmp.eq.s32.totalorder %v6587_v63, %v2866_v12 }
 0x366   : > { %vm2068_vm13 = vmor %vm9956_vm6, %vm2004_vm11  ;;  %4717 = vmatmul.mubr.msk.bf16.gmra.mrb[84].mxu0 %vm4716_vm3, %v10516_v15  ;;  %v4827_v8 = vpack.c.bf16 %v5419_v4, %v5419_v4  ;;  %v5422_v48 = vadd.f32 %v5421_v57, %v5420_v56  ;;  %vm3090_vm5 = vcmp.eq.s32.totalorder %v6599_v58, %v3023_v54  ;;  %v2537_v56 = vld [vmem:[%s8884_s23 + $0x40] sm:$0xf] }
 0x367   : > { %vm2069_vm4 = vmor %vm9971_vm12, %vm2005_vm10  ;;  %vm3089_vm12 = vcmp.eq.s32.totalorder %v6587_v63, %v3023_v54  ;;  %v5341_v13 = vpop.f32.mrb[56].mxu1  ;;  %vm3314_vm10 = vcmp.eq.s32.totalorder %v6599_v58, %v3247_v29 }
 0x368   : > { %vm4514_vm1 = vmpackc.low %vm11128_vm15, %vm2069_vm4  ;;  %v5342_v14 = vpop.f32.mrb[57].mxu1  ;;  %v4828_v60 = vpack.c.bf16 %v5422_v48, %v5422_v48  ;;  %v3994_v38 = vadd.bf16 %v4827_v8, %v3834_v41 }
 0x369   : > { %4515 = vmatprep.mubr.msk.bf16.mxu1 %vm4514_vm1, %v10516_v15  ;;  %vm4516_vm6 = vmpackc.low %vm10006_vm14, %vm2068_vm13  ;;  %v5343_v36 = vadd.f32 %v5342_v14, %v5341_v13  ;;  %v5344_v30 = vpop.f32.mrb[58].mxu1  ;;  %vm2930_vm14 = vcmp.eq.s32.totalorder %v6599_v58, %v2863_v3  ;;  %v3026_v9 = vpop.permute.xlu1 %3025  ;;  %vm2932_vm13 = vcmp.eq.s32.totalorder %v6599_v58, %v2866_v12 }
 0x36a   : > { %4517 = vmatmul.mubr.msk.bf16.gmra.mrb[92].mxu1 %vm4516_vm6, %v10516_v15  ;;  %vm3153_vm2 = vmor %vm2929_vm7, %vm3089_vm12  ;;  %v5345_v10 = vpop.f32.mrb[59].mxu1  ;;  %v3995_v23 = vadd.bf16 %v4828_v60, %v3835_v0  ;;  %vm3091_vm11 = vcmp.eq.s32.totalorder %v6587_v63, %v3026_v9  ;;  %vm3092_vm4 = vcmp.eq.s32.totalorder %v6599_v58, %v3026_v9  ;;  %v3836_v60 = vld [vmem:[%s8884_s23 + $0x8] sm:$0xf] }
 0x36b   : > { %vm3154_vm9 = vmor %vm2930_vm14, %vm3090_vm5  ;;  %v4807_v31 = vpack.c.bf16 %v5343_v36, %v5343_v36  ;;  %v5346_v51 = vadd.f32 %v5345_v10, %v5344_v30  ;;  %v3837_v30 = vld [vmem:[%s8884_s23 + $0xc] sm:$0xf] }
 0x36c   : > { %vm10057_vm3 = vmor %vm3153_vm2, %vm3313_vm0  ;;  %v5146_v2 = vcombine.low %v3994_v38, %v3995_v23 }
 0x36d   : > { %v4808_v16 = vpack.c.bf16 %v5346_v51, %v5346_v51  ;;  %vm10063_vm15 = vmor %vm3154_vm9, %vm3314_vm10  ;;  %v2693_v55 = vadd.bf16 %v4807_v31, %v2533_v28 }
 0x36e   : > { %vm3155_vm1 = vmor %vm2931_vm8, %vm3091_vm11  ;;  %v3250_v59 = vpop.permute.xlu1 %3249  ;;  %5024 = vst [vmem:[%s8884_s23] sm:$0xff] %v5146_v2  }
 0x36f   : > { %v2694_v52 = vadd.bf16 %v4808_v16, %v2534_v49  ;;  %vm3156_vm6 = vmor %vm2932_vm13, %vm3092_vm4  ;;  %vm3315_vm12 = vcmp.eq.s32.totalorder %v6587_v63, %v3250_v59  ;;  %vm3316_vm5 = vcmp.eq.s32.totalorder %v6599_v58, %v3250_v59  ;;  %vm3317_vm13 = vcmp.eq.s32.totalorder %v6587_v63, %v3253_v26  ;;  %v2539_v16 = vld [vmem:[%s8884_s23 + $0x48] sm:$0xf] }
 0x370   : > { %vm3379_vm7 = vmor %vm3155_vm1, %vm3315_vm12 }
 0x371   : > { %v5347_v20 = vpop.f32.mrb[60].mxu1  ;;  %v5126_v50 = vcombine.low %v2693_v55, %v2694_v52  ;;  %vm3380_vm14 = vmor %vm3156_vm6, %vm3316_vm5  ;;  %vm2935_vm5 = vcmp.eq.s32.totalorder %v6587_v63, %v2872_v61 }
 0x372   : > { %v5348_v6 = vpop.f32.mrb[61].mxu1  ;;  %vm4718_vm2 = vmpackc.low %vm3380_vm14, %vm10063_vm15  ;;  %vm3318_vm15 = vcmp.eq.s32.totalorder %v6599_v58, %v3253_v26  ;;  %vm2936_vm14 = vcmp.eq.s32.totalorder %v6599_v58, %v2872_v61  ;;  %v2541_v61 = vld [vmem:[%s8884_s23 + $0x50] sm:$0xf]  ;;  %v3839_v26 = vld [vmem:[%s8884_s23 + $0x14] sm:$0xf] }
 0x373   : > { %v5349_v53 = vadd.f32 %v5348_v6, %v5347_v20  ;;  %v5350_v45 = vpop.f32.mrb[62].mxu1  ;;  %5127 = vst [vmem:[%s8884_s23 + $0x30] sm:$0xff] %v5126_v50   ;;  %4719 = vmatprep.mubr.msk.bf16.mxu0 %vm4718_vm2, %v10516_v15  ;;  %vm4720_vm0 = vmpackc.low %vm3379_vm7, %vm10057_vm3  ;;  %v2869_v22 = vpop.permute.xlu1 %2868 }
 0x374   : > { %v5351_v17 = vpop.f32.mrb[63].mxu1  ;;  %4721 = vmatmul.mubr.msk.bf16.gmra.mrb[88].mxu0 %vm4720_vm0, %v10516_v15  ;;  %vm2933_vm11 = vcmp.eq.s32.totalorder %v6587_v63, %v2869_v22  ;;  %vm2934_vm10 = vcmp.eq.s32.totalorder %v6599_v58, %v2869_v22 }
 0x375   : > { %v4809_v47 = vpack.c.bf16 %v5349_v53, %v5349_v53  ;;  %v5352_v7 = vadd.f32 %v5351_v17, %v5350_v45 }
 0x377   : > { %v4810_v44 = vpack.c.bf16 %v5352_v7, %v5352_v7  ;;  %v2695_v46 = vadd.bf16 %v4809_v47, %v2535_v5 }
 0x378   : > { %v3029_v19 = vpop.permute.xlu1 %3028 }
 0x379   : > { %v2696_v21 = vadd.bf16 %v4810_v44, %v2536_v1  ;;  %vm3093_vm9 = vcmp.eq.s32.totalorder %v6587_v63, %v3029_v19  ;;  %vm3094_vm8 = vcmp.eq.s32.totalorder %v6599_v58, %v3029_v19  ;;  %v2542_v44 = vld [vmem:[%s8884_s23 + $0x54] sm:$0xf] }
 0x37a   : > { %vm3157_vm3 = vmor %vm2933_vm11, %vm3093_vm9 }
 0x37b   : > { %v5128_v37 = vcombine.low %v2695_v46, %v2696_v21  ;;  %vm3158_vm4 = vmor %vm2934_vm10, %vm3094_vm8 }
 0x37c   : > { %v3032_v29 = vpop.permute.xlu1 %3031  ;;  %vm10091_vm6 = vmor %vm3157_vm3, %vm3317_vm13 }
 0x37d   : > { %v5353_v40 = vpop.f32.mrb[64].mxu1  ;;  %5129 = vst [vmem:[%s8884_s23 + $0x38] sm:$0xff] %v5128_v37   ;;  %vm3095_vm1 = vcmp.eq.s32.totalorder %v6587_v63, %v3032_v29  ;;  %vm3096_vm12 = vcmp.eq.s32.totalorder %v6599_v58, %v3032_v29  ;;  %vm10097_vm7 = vmor %vm3158_vm4, %vm3318_vm15 }
 0x37e   : > { %v5354_v27 = vpop.f32.mrb[65].mxu1  ;;  %vm3159_vm2 = vmor %vm2935_vm5, %vm3095_vm1 }
 0x37f   : > { %v5355_v62 = vadd.f32 %v5354_v27, %v5353_v40  ;;  %v5356_v24 = vpop.f32.mrb[66].mxu1  ;;  %vm3160_vm0 = vmor %vm2936_vm14, %vm3096_vm12  ;;  %v3838_v27 = vld [vmem:[%s8884_s23 + $0x10] sm:$0xf] }
 0x380   : > { %v5357_v25 = vpop.f32.mrb[67].mxu1 }
 0x381   : > { %v5423_v3 = vpop.f32.mrb[36].mxu0  ;;  %v4811_v39 = vpack.c.bf16 %v5355_v62, %v5355_v62  ;;  %v5358_v33 = vadd.f32 %v5357_v25, %v5356_v24  ;;  %v3256_v41 = vpop.permute.xlu1 %3255 }
 0x382   : > { %v5424_v43 = vpop.f32.mrb[37].mxu0  ;;  %vm3319_vm9 = vcmp.eq.s32.totalorder %v6587_v63, %v3256_v41  ;;  %vm3320_vm8 = vcmp.eq.s32.totalorder %v6599_v58, %v3256_v41 }
 0x383   : > { %v5425_v11 = vadd.f32 %v5424_v43, %v5423_v3  ;;  %v5426_v32 = vpop.f32.mrb[38].mxu0  ;;  %v4812_v35 = vpack.c.bf16 %v5358_v33, %v5358_v33  ;;  %v2697_v13 = vadd.bf16 %v4811_v39, %v2537_v56  ;;  %vm3383_vm11 = vmor %vm3159_vm2, %vm3319_vm9  ;;  %v3841_v56 = vld [vmem:[%s8884_s23 + $0x1c] sm:$0xf] }
 0x384   : > { %v5427_v4 = vpop.f32.mrb[39].mxu0  ;;  %vm3384_vm10 = vmor %vm3160_vm0, %vm3320_vm8 }
 0x385   : > { %v4829_v54 = vpack.c.bf16 %v5425_v11, %v5425_v11  ;;  %v5428_v57 = vadd.f32 %v5427_v4, %v5426_v32  ;;  %v2698_v48 = vadd.bf16 %v4812_v35, %v2538_v18  ;;  %vm4722_vm3 = vmpackc.low %vm3384_vm10, %vm10097_vm7  ;;  %v3840_v4 = vld [vmem:[%s8884_s23 + $0x18] sm:$0xf] }
 0x386   : > { %vm4724_vm13 = vmpackc.low %vm3383_vm11, %vm10091_vm6  ;;  %4723 = vmatprep.mubr.msk.bf16.mxu0 %vm4722_vm3, %v10516_v15 }
 0x387   : > { %v4830_v14 = vpack.c.bf16 %v5428_v57, %v5428_v57  ;;  %v5130_v36 = vcombine.low %v2697_v13, %v2698_v48  ;;  %v3996_v9 = vadd.bf16 %v4829_v54, %v3836_v60  ;;  %4725 = vmatmul.mubr.msk.bf16.gmra.mrb[92].mxu0 %vm4724_vm13, %v10516_v15 }
 0x389   : > { %v3997_v38 = vadd.bf16 %v4830_v14, %v3837_v30  ;;  %5131 = vst [vmem:[%s8884_s23 + $0x40] sm:$0xff] %v5130_v36   ;;  %v2543_v30 = vld [vmem:[%s8884_s23 + $0x58] sm:$0xf] }
 0x38b   : > { %v5147_v0 = vcombine.low %v3996_v9, %v3997_v38  ;;  %v2544_v9 = vld [vmem:[%s8884_s23 + $0x5c] sm:$0xf] }
 0x38d   : > { %5148 = vst [vmem:[%s8884_s23 + $0x8] sm:$0xff] %v5147_v0  }
 0x38f   : > { %v5359_v10 = vpop.f32.mrb[68].mxu1 }
 0x390   : > { %v5360_v23 = vpop.f32.mrb[69].mxu1 }
 0x391   : > { %v5361_v58 = vadd.f32 %v5360_v23, %v5359_v10  ;;  %v5362_v63 = vpop.f32.mrb[70].mxu1 }
 0x392   : > { %v5363_v31 = vpop.f32.mrb[71].mxu1 }
 0x393   : > { %v4813_v51 = vpack.c.bf16 %v5361_v58, %v5361_v58  ;;  %v5364_v34 = vadd.f32 %v5363_v31, %v5362_v63 }
 0x395   : > { %v4814_v2 = vpack.c.bf16 %v5364_v34, %v5364_v34  ;;  %v2699_v28 = vadd.bf16 %v4813_v51, %v2539_v16 }
 0x397   : > { %v2700_v49 = vadd.bf16 %v4814_v2, %v2540_v42  ;;  %v5365_v59 = vpop.f32.mrb[72].mxu1 }
 0x398   : > { %v5366_v55 = vpop.f32.mrb[73].mxu1 }
 0x399   : > { %v5132_v52 = vcombine.low %v2699_v28, %v2700_v49  ;;  %v5367_v20 = vadd.f32 %v5366_v55, %v5365_v59  ;;  %v5368_v6 = vpop.f32.mrb[74].mxu1  ;;  %v2545_v55 = vld [vmem:[%s8884_s23 + $0x60] sm:$0xf] }
 0x39a   : > { %v5369_v50 = vpop.f32.mrb[75].mxu1 }
 0x39b   : > { %5133 = vst [vmem:[%s8884_s23 + $0x48] sm:$0xff] %v5132_v52   ;;  %v4815_v53 = vpack.c.bf16 %v5367_v20, %v5367_v20  ;;  %v5370_v15 = vadd.f32 %v5369_v50, %v5368_v6  ;;  %v2546_v52 = vld [vmem:[%s8884_s23 + $0x64] sm:$0xf] }
 0x39d   : > { %v5429_v45 = vpop.f32.mrb[40].mxu0  ;;  %v4816_v47 = vpack.c.bf16 %v5370_v15, %v5370_v15  ;;  %v2701_v1 = vadd.bf16 %v4815_v53, %v2541_v61 }
 0x39e   : > { %v5430_v17 = vpop.f32.mrb[41].mxu0 }
 0x39f   : > { %v5431_v7 = vadd.f32 %v5430_v17, %v5429_v45  ;;  %v5432_v22 = vpop.f32.mrb[42].mxu0  ;;  %v2702_v46 = vadd.bf16 %v4816_v47, %v2542_v44  ;;  %v3842_v47 = vld [vmem:[%s8884_s23 + $0x20] sm:$0xf] }
 0x3a0   : > { %v5433_v5 = vpop.f32.mrb[43].mxu0 }
 0x3a1   : > { %v4831_v21 = vpack.c.bf16 %v5431_v7, %v5431_v7  ;;  %v5434_v40 = vadd.f32 %v5433_v5, %v5432_v22  ;;  %v5134_v19 = vcombine.low %v2701_v1, %v2702_v46  ;;  %v3843_v7 = vld [vmem:[%s8884_s23 + $0x24] sm:$0xf] }
 0x3a3   : > { %v4832_v37 = vpack.c.bf16 %v5434_v40, %v5434_v40  ;;  %5135 = vst [vmem:[%s8884_s23 + $0x50] sm:$0xff] %v5134_v19   ;;  %v3998_v62 = vadd.bf16 %v4831_v21, %v3838_v27 }
 0x3a5   : > { %v3999_v24 = vadd.bf16 %v4832_v37, %v3839_v26  ;;  %v3844_v26 = vld [vmem:[%s8884_s23 + $0x28] sm:$0xf] }
 0x3a7   : > { %v5149_v3 = vcombine.low %v3998_v62, %v3999_v24  ;;  %v5435_v25 = vpop.f32.mrb[44].mxu0  ;;  %v3845_v62 = vld [vmem:[%s8884_s23 + $0x2c] sm:$0xf] }
 0x3a8   : > { %v5436_v39 = vpop.f32.mrb[45].mxu0 }
 0x3a9   : > { %5150 = vst [vmem:[%s8884_s23 + $0x10] sm:$0xff] %v5149_v3   ;;  %v5437_v43 = vadd.f32 %v5436_v39, %v5435_v25  ;;  %v5438_v33 = vpop.f32.mrb[46].mxu0 }
 0x3aa   : > { %v5439_v29 = vpop.f32.mrb[47].mxu0 }
 0x3ab   : > { %v4833_v11 = vpack.c.bf16 %v5437_v43, %v5437_v43  ;;  %v5440_v32 = vadd.f32 %v5439_v29, %v5438_v33 }
 0x3ad   : > { %v4834_v35 = vpack.c.bf16 %v5440_v32, %v5440_v32  ;;  %v4000_v54 = vadd.bf16 %v4833_v11, %v3840_v4 }
 0x3af   : > { %v4001_v18 = vadd.bf16 %v4834_v35, %v3841_v56  ;;  %v3846_v56 = vld [vmem:[%s8884_s23 + $0x30] sm:$0xf] }
 0x3b1   : > { %v5151_v57 = vcombine.low %v4000_v54, %v4001_v18  ;;  %v3847_v54 = vld [vmem:[%s8884_s23 + $0x34] sm:$0xf] }
 0x3b3   : > { %5152 = vst [vmem:[%s8884_s23 + $0x18] sm:$0xff] %v5151_v57  }
 0x3b5   : > { %v5371_v8 = vpop.f32.mrb[76].mxu1 }
 0x3b6   : > { %v5372_v13 = vpop.f32.mrb[77].mxu1 }
 0x3b7   : > { %v5373_v48 = vadd.f32 %v5372_v13, %v5371_v8  ;;  %v5374_v12 = vpop.f32.mrb[78].mxu1 }
 0x3b8   : > { %v5375_v14 = vpop.f32.mrb[79].mxu1 }
 0x3b9   : > { %v4817_v41 = vpack.c.bf16 %v5373_v48, %v5373_v48  ;;  %v5376_v60 = vadd.f32 %v5375_v14, %v5374_v12 }
 0x3bb   : > { %v4818_v36 = vpack.c.bf16 %v5376_v60, %v5376_v60  ;;  %v2703_v38 = vadd.bf16 %v4817_v41, %v2543_v30 }
 0x3bd   : > { %v2704_v0 = vadd.bf16 %v4818_v36, %v2544_v9  ;;  %v3848_v9 = vld [vmem:[%s8884_s23 + $0x38] sm:$0xf] }
 0x3bf   : > { %v5136_v10 = vcombine.low %v2703_v38, %v2704_v0  ;;  %v3849_v38 = vld [vmem:[%s8884_s23 + $0x3c] sm:$0xf] }
 0x3c1   : > { %v5377_v23 = vpop.f32.mrb[80].mxu1  ;;  %5137 = vst [vmem:[%s8884_s23 + $0x58] sm:$0xff] %v5136_v10  }
 0x3c2   : > { %v5378_v58 = vpop.f32.mrb[81].mxu1 }
 0x3c3   : > { %v5379_v63 = vadd.f32 %v5378_v58, %v5377_v23  ;;  %v5380_v31 = vpop.f32.mrb[82].mxu1 }
 0x3c4   : > { %v5381_v51 = vpop.f32.mrb[83].mxu1 }
 0x3c5   : > { %v4819_v34 = vpack.c.bf16 %v5379_v63, %v5379_v63  ;;  %v5382_v2 = vadd.f32 %v5381_v51, %v5380_v31  ;;  %v5441_v16 = vpop.f32.mrb[48].mxu0 }
 0x3c6   : > { %v5442_v42 = vpop.f32.mrb[49].mxu0 }
 0x3c7   : > { %v4820_v28 = vpack.c.bf16 %v5382_v2, %v5382_v2  ;;  %v5443_v49 = vadd.f32 %v5442_v42, %v5441_v16  ;;  %v5444_v59 = vpop.f32.mrb[50].mxu0  ;;  %v2705_v6 = vadd.bf16 %v4819_v34, %v2545_v55 }
 0x3c8   : > { %v5445_v20 = vpop.f32.mrb[51].mxu0 }
 0x3c9   : > { %v2706_v50 = vadd.bf16 %v4820_v28, %v2546_v52  ;;  %v4835_v53 = vpack.c.bf16 %v5443_v49, %v5443_v49  ;;  %v5446_v15 = vadd.f32 %v5445_v20, %v5444_v59  ;;  %v3850_v28 = vld [vmem:[%s8884_s23 + $0x40] sm:$0xf]  ;;  %v3851_v49 = vld [vmem:[%s8884_s23 + $0x44] sm:$0xf] }
 0x3cb   : > { %v5138_v45 = vcombine.low %v2705_v6, %v2706_v50  ;;  %v4836_v17 = vpack.c.bf16 %v5446_v15, %v5446_v15  ;;  %v4002_v22 = vadd.bf16 %v4835_v53, %v3842_v47 }
 0x3cd   : > { %5139 = vst [vmem:[%s8884_s23 + $0x60] sm:$0xff] %v5138_v45   ;;  %v4003_v61 = vadd.bf16 %v4836_v17, %v3843_v7  ;;  %v3852_v7 = vld [vmem:[%s8884_s23 + $0x48] sm:$0xf] }
 0x3cf   : > { %v5153_v44 = vcombine.low %v4002_v22, %v4003_v61  ;;  %v5447_v5 = vpop.f32.mrb[52].mxu0  ;;  %v3853_v22 = vld [vmem:[%s8884_s23 + $0x4c] sm:$0xf] }
 0x3d0   : > { %v5448_v1 = vpop.f32.mrb[53].mxu0 }
 0x3d1   : > { %5154 = vst [vmem:[%s8884_s23 + $0x20] sm:$0xff] %v5153_v44   ;;  %v5449_v46 = vadd.f32 %v5448_v1, %v5447_v5  ;;  %v5450_v21 = vpop.f32.mrb[54].mxu0 }
 0x3d2   : > { %v5451_v40 = vpop.f32.mrb[55].mxu0 }
 0x3d3   : > { %v4837_v19 = vpack.c.bf16 %v5449_v46, %v5449_v46  ;;  %v5452_v37 = vadd.f32 %v5451_v40, %v5450_v21 }
 0x3d5   : > { %v4838_v27 = vpack.c.bf16 %v5452_v37, %v5452_v37  ;;  %v4004_v24 = vadd.bf16 %v4837_v19, %v3844_v26 }
 0x3d7   : > { %v4005_v3 = vadd.bf16 %v4838_v27, %v3845_v62  ;;  %v3854_v62 = vld [vmem:[%s8884_s23 + $0x50] sm:$0xf] }
 0x3d9   : > { %v5155_v25 = vcombine.low %v4004_v24, %v4005_v3  ;;  %v5453_v39 = vpop.f32.mrb[56].mxu0  ;;  %v3855_v24 = vld [vmem:[%s8884_s23 + $0x54] sm:$0xf] }
 0x3da   : > { %v5454_v43 = vpop.f32.mrb[57].mxu0 }
 0x3db   : > { %5156 = vst [vmem:[%s8884_s23 + $0x28] sm:$0xff] %v5155_v25   ;;  %v5455_v33 = vadd.f32 %v5454_v43, %v5453_v39  ;;  %v5456_v29 = vpop.f32.mrb[58].mxu0 }
 0x3dc   : > { %v5457_v11 = vpop.f32.mrb[59].mxu0 }
 0x3dd   : > { %v4839_v32 = vpack.c.bf16 %v5455_v33, %v5455_v33  ;;  %v5458_v35 = vadd.f32 %v5457_v11, %v5456_v29 }
 0x3df   : > { %v4840_v4 = vpack.c.bf16 %v5458_v35, %v5458_v35  ;;  %v4006_v18 = vadd.bf16 %v4839_v32, %v3846_v56 }
 0x3e1   : > { %v4007_v57 = vadd.bf16 %v4840_v4, %v3847_v54 }
 0x3e3   : > { %v5157_v8 = vcombine.low %v4006_v18, %v4007_v57  ;;  %v5459_v13 = vpop.f32.mrb[60].mxu0  ;;  %v3856_v18 = vld [vmem:[%s8884_s23 + $0x58] sm:$0xf]  ;;  %v3857_v57 = vld [vmem:[%s8884_s23 + $0x5c] sm:$0xf] }
 0x3e4   : > { %v5460_v48 = vpop.f32.mrb[61].mxu0 }
 0x3e5   : > { %5158 = vst [vmem:[%s8884_s23 + $0x30] sm:$0xff] %v5157_v8   ;;  %v5461_v12 = vadd.f32 %v5460_v48, %v5459_v13  ;;  %v5462_v14 = vpop.f32.mrb[62].mxu0 }
 0x3e6   : > { %v5463_v41 = vpop.f32.mrb[63].mxu0 }
 0x3e7   : > { %v4841_v60 = vpack.c.bf16 %v5461_v12, %v5461_v12  ;;  %v5464_v36 = vadd.f32 %v5463_v41, %v5462_v14 }
 0x3e9   : > { %v4842_v30 = vpack.c.bf16 %v5464_v36, %v5464_v36  ;;  %v4008_v0 = vadd.bf16 %v4841_v60, %v3848_v9 }
 0x3eb   : > { %v4009_v10 = vadd.bf16 %v4842_v30, %v3849_v38  ;;  %v2547_v38 = vld [vmem:[%s8884_s23 + $0x68] sm:$0xf] }
 0x3ed   : > { %v5159_v23 = vcombine.low %v4008_v0, %v4009_v10  ;;  %v5465_v58 = vpop.f32.mrb[64].mxu0  ;;  %v2548_v0 = vld [vmem:[%s8884_s23 + $0x6c] sm:$0xf] }
 0x3ee   : > { %v5466_v63 = vpop.f32.mrb[65].mxu0 }
 0x3ef   : > { %5160 = vst [vmem:[%s8884_s23 + $0x38] sm:$0xff] %v5159_v23   ;;  %v5467_v31 = vadd.f32 %v5466_v63, %v5465_v58  ;;  %v5468_v51 = vpop.f32.mrb[66].mxu0 }
 0x3f0   : > { %v5469_v34 = vpop.f32.mrb[67].mxu0 }
 0x3f1   : > { %v4843_v2 = vpack.c.bf16 %v5467_v31, %v5467_v31  ;;  %v5470_v16 = vadd.f32 %v5469_v34, %v5468_v51 }
 0x3f3   : > { %v4844_v42 = vpack.c.bf16 %v5470_v16, %v5470_v16  ;;  %v4010_v59 = vadd.bf16 %v4843_v2, %v3850_v28 }
 0x3f5   : > { %v4011_v55 = vadd.bf16 %v4844_v42, %v3851_v49 }
 0x3f7   : > { %v5161_v52 = vcombine.low %v4010_v59, %v4011_v55  ;;  %v5471_v20 = vpop.f32.mrb[68].mxu0 }
 0x3f8   : > { %v5472_v6 = vpop.f32.mrb[69].mxu0 }
 0x3f9   : > { %5162 = vst [vmem:[%s8884_s23 + $0x40] sm:$0xff] %v5161_v52   ;;  %v5473_v50 = vadd.f32 %v5472_v6, %v5471_v20  ;;  %v5474_v53 = vpop.f32.mrb[70].mxu0  ;;  %v3858_v20 = vld [vmem:[%s8884_s23 + $0x60] sm:$0xf]  ;;  %v3859_v6 = vld [vmem:[%s8884_s23 + $0x64] sm:$0xf] }
 0x3fa   : > { %v5475_v15 = vpop.f32.mrb[71].mxu0 }
 0x3fb   : > { %v4845_v45 = vpack.c.bf16 %v5473_v50, %v5473_v50  ;;  %v5476_v17 = vadd.f32 %v5475_v15, %v5474_v53 }
 0x3fd   : > { %v4846_v47 = vpack.c.bf16 %v5476_v17, %v5476_v17  ;;  %v4012_v61 = vadd.bf16 %v4845_v45, %v3852_v7 }
 0x3ff   : > { %v4013_v44 = vadd.bf16 %v4846_v47, %v3853_v22  ;;  %v2549_v22 = vld [vmem:[%s8884_s23 + $0x70] sm:$0xf] }
 0x401   : > { %v5163_v5 = vcombine.low %v4012_v61, %v4013_v44  ;;  %v5477_v1 = vpop.f32.mrb[72].mxu0  ;;  %v2550_v61 = vld [vmem:[%s8884_s23 + $0x74] sm:$0xf] }
 0x402   : > { %v5478_v46 = vpop.f32.mrb[73].mxu0 }
 0x403   : > { %5164 = vst [vmem:[%s8884_s23 + $0x48] sm:$0xff] %v5163_v5   ;;  %v5479_v21 = vadd.f32 %v5478_v46, %v5477_v1  ;;  %v5480_v40 = vpop.f32.mrb[74].mxu0 }
 0x404   : > { %v5481_v19 = vpop.f32.mrb[75].mxu0 }
 0x405   : > { %v4847_v37 = vpack.c.bf16 %v5479_v21, %v5479_v21  ;;  %v5482_v27 = vadd.f32 %v5481_v19, %v5480_v40 }
 0x407   : > { %v4848_v26 = vpack.c.bf16 %v5482_v27, %v5482_v27  ;;  %v4014_v3 = vadd.bf16 %v4847_v37, %v3854_v62 }
 0x409   : > { %v4015_v25 = vadd.bf16 %v4848_v26, %v3855_v24 }
 0x40b   : > { %v5165_v39 = vcombine.low %v4014_v3, %v4015_v25 }
 0x40d   : > { %5166 = vst [vmem:[%s8884_s23 + $0x50] sm:$0xff] %v5165_v39  }
 0x40f   : > { %v5483_v43 = vpop.f32.mrb[76].mxu0 }
 0x410   : > { %v5484_v33 = vpop.f32.mrb[77].mxu0 }
 0x411   : > { %v5485_v29 = vadd.f32 %v5484_v33, %v5483_v43  ;;  %v5486_v11 = vpop.f32.mrb[78].mxu0 }
 0x412   : > { %v5487_v32 = vpop.f32.mrb[79].mxu0 }
 0x413   : > { %v4849_v35 = vpack.c.bf16 %v5485_v29, %v5485_v29  ;;  %v5488_v4 = vadd.f32 %v5487_v32, %v5486_v11 }
 0x415   : > { %v4850_v56 = vpack.c.bf16 %v5488_v4, %v5488_v4  ;;  %v5383_v54 = vpop.f32.mrb[84].mxu1  ;;  %v4016_v13 = vadd.bf16 %v4849_v35, %v3856_v18  ;;  %v2551_v18 = vld [vmem:[%s8884_s23 + $0x78] sm:$0xf] }
 0x416   : > { %v5384_v8 = vpop.f32.mrb[85].mxu1 }
 0x417   : > { %v4017_v48 = vadd.bf16 %v4850_v56, %v3857_v57  ;;  %v5385_v12 = vadd.f32 %v5384_v8, %v5383_v54  ;;  %v5386_v14 = vpop.f32.mrb[86].mxu1  ;;  %v2552_v57 = vld [vmem:[%s8884_s23 + $0x7c] sm:$0xf] }
 0x418   : > { %v5387_v41 = vpop.f32.mrb[87].mxu1 }
 0x419   : > { %v5167_v60 = vcombine.low %v4016_v13, %v4017_v48  ;;  %v4821_v36 = vpack.c.bf16 %v5385_v12, %v5385_v12  ;;  %v5388_v30 = vadd.f32 %v5387_v41, %v5386_v14 }
 0x41b   : > { %5168 = vst [vmem:[%s8884_s23 + $0x58] sm:$0xff] %v5167_v60   ;;  %v4822_v9 = vpack.c.bf16 %v5388_v30, %v5388_v30  ;;  %v2707_v10 = vadd.bf16 %v4821_v36, %v2547_v38 }
 0x41d   : > { %v2708_v23 = vadd.bf16 %v4822_v9, %v2548_v0 }
 0x41f   : > { %v5140_v58 = vcombine.low %v2707_v10, %v2708_v23 }
 0x421   : > { %5141 = vst [vmem:[%s8884_s23 + $0x68] sm:$0xff] %v5140_v58  }
 0x425   : > { %v5489_v63 = vpop.f32.mrb[80].mxu0 }
 0x426   : > { %v5490_v31 = vpop.f32.mrb[81].mxu0 }
 0x427   : > { %v5491_v51 = vadd.f32 %v5490_v31, %v5489_v63  ;;  %v5492_v34 = vpop.f32.mrb[82].mxu0 }
 0x428   : > { %v5493_v2 = vpop.f32.mrb[83].mxu0  ;;  %v3860_v43 = vld [vmem:[%s8884_s23 + $0x68] sm:$0xf]  ;;  %v3861_v33 = vld [vmem:[%s8884_s23 + $0x6c] sm:$0xf] }
 0x429   : > { %v4851_v16 = vpack.c.bf16 %v5491_v51, %v5491_v51  ;;  %v5494_v42 = vadd.f32 %v5493_v2, %v5492_v34  ;;  %v5389_v28 = vpop.f32.mrb[88].mxu1 }
 0x42a   : > { %v5390_v49 = vpop.f32.mrb[89].mxu1 }
 0x42b   : > { %v4852_v59 = vpack.c.bf16 %v5494_v42, %v5494_v42  ;;  %v5391_v55 = vadd.f32 %v5390_v49, %v5389_v28  ;;  %v5392_v52 = vpop.f32.mrb[90].mxu1  ;;  %v4018_v53 = vadd.bf16 %v4851_v16, %v3858_v20 }
 0x42c   : > { %v5393_v50 = vpop.f32.mrb[91].mxu1 }
 0x42d   : > { %v4019_v15 = vadd.bf16 %v4852_v59, %v3859_v6  ;;  %v4823_v45 = vpack.c.bf16 %v5391_v55, %v5391_v55  ;;  %v5394_v17 = vadd.f32 %v5393_v50, %v5392_v52 }
 0x42f   : > { %v5169_v47 = vcombine.low %v4018_v53, %v4019_v15  ;;  %v4824_v7 = vpack.c.bf16 %v5394_v17, %v5394_v17  ;;  %v2709_v44 = vadd.bf16 %v4823_v45, %v2549_v22 }
 0x431   : > { %5170 = vst [vmem:[%s8884_s23 + $0x60] sm:$0xff] %v5169_v47   ;;  %v2710_v5 = vadd.bf16 %v4824_v7, %v2550_v61 }
 0x433   : > { %v5142_v1 = vcombine.low %v2709_v44, %v2710_v5 }
 0x435   : > { %5143 = vst [vmem:[%s8884_s23 + $0x70] sm:$0xff] %v5142_v1  }
 0x439   : > { %v5495_v46 = vpop.f32.mrb[84].mxu0 }
 0x43a   : > { %v5496_v21 = vpop.f32.mrb[85].mxu0 }
 0x43b   : > { %v5497_v40 = vadd.f32 %v5496_v21, %v5495_v46  ;;  %v5498_v19 = vpop.f32.mrb[86].mxu0 }
 0x43c   : > { %v5499_v37 = vpop.f32.mrb[87].mxu0  ;;  %v3862_v0 = vld [vmem:[%s8884_s23 + $0x70] sm:$0xf]  ;;  %v3863_v10 = vld [vmem:[%s8884_s23 + $0x74] sm:$0xf] }
 0x43d   : > { %v4853_v27 = vpack.c.bf16 %v5497_v40, %v5497_v40  ;;  %v5500_v26 = vadd.f32 %v5499_v37, %v5498_v19  ;;  %v5395_v62 = vpop.f32.mrb[92].mxu1 }
 0x43e   : > { %v5396_v24 = vpop.f32.mrb[93].mxu1 }
 0x43f   : > { %v4854_v3 = vpack.c.bf16 %v5500_v26, %v5500_v26  ;;  %v5397_v25 = vadd.f32 %v5396_v24, %v5395_v62  ;;  %v5398_v39 = vpop.f32.mrb[94].mxu1  ;;  %v4020_v11 = vadd.bf16 %v4853_v27, %v3860_v43 }
 0x440   : > { %v5399_v29 = vpop.f32.mrb[95].mxu1 }
 0x441   : > { %v4021_v32 = vadd.bf16 %v4854_v3, %v3861_v33  ;;  %v4825_v35 = vpack.c.bf16 %v5397_v25, %v5397_v25  ;;  %v5400_v4 = vadd.f32 %v5399_v29, %v5398_v39 }
 0x443   : > { %v5171_v56 = vcombine.low %v4020_v11, %v4021_v32  ;;  %v4826_v54 = vpack.c.bf16 %v5400_v4, %v5400_v4  ;;  %v2711_v8 = vadd.bf16 %v4825_v35, %v2551_v18 }
 0x445   : > { %5172 = vst [vmem:[%s8884_s23 + $0x68] sm:$0xff] %v5171_v56   ;;  %v2712_v13 = vadd.bf16 %v4826_v54, %v2552_v57 }
 0x447   : > { %v5144_v48 = vcombine.low %v2711_v8, %v2712_v13  ;;  %v5501_v12 = vpop.f32.mrb[88].mxu0 }
 0x448   : > { %v5502_v14 = vpop.f32.mrb[89].mxu0 }
 0x449   : > { %5145 = vst [vmem:[%s8884_s23 + $0x78] sm:$0xff] %v5144_v48   ;;  %v5503_v41 = vadd.f32 %v5502_v14, %v5501_v12  ;;  %v5504_v60 = vpop.f32.mrb[90].mxu0 }
 0x44a   : > { %v5505_v36 = vpop.f32.mrb[91].mxu0 }
 0x44b   : > { %v4855_v30 = vpack.c.bf16 %v5503_v41, %v5503_v41  ;;  %v5506_v9 = vadd.f32 %v5505_v36, %v5504_v60 }
 0x44d   : > { %v4856_v38 = vpack.c.bf16 %v5506_v9, %v5506_v9  ;;  %v4022_v23 = vadd.bf16 %v4855_v30, %v3862_v0 }
 0x44f   : > { %v4023_v58 = vadd.bf16 %v4856_v38, %v3863_v10 }
 0x450   : > { %v3864_v59 = vld [vmem:[%s8884_s23 + $0x78] sm:$0xf]  ;;  %v3865_v55 = vld [vmem:[%s8884_s23 + $0x7c] sm:$0xf] }
 0x451   : > { %v5173_v63 = vcombine.low %v4022_v23, %v4023_v58 }
 0x453   : > { %5174 = vst [vmem:[%s8884_s23 + $0x70] sm:$0xff] %v5173_v63  }
 0x45a   : > { %v5507_v31 = vpop.f32.mrb[92].mxu0 }
 0x45b   : > { %v5508_v51 = vpop.f32.mrb[93].mxu0 }
 0x45c   : > { %v5509_v34 = vadd.f32 %v5508_v51, %v5507_v31  ;;  %v5510_v2 = vpop.f32.mrb[94].mxu0 }
 0x45d   : > { %v5511_v16 = vpop.f32.mrb[95].mxu0 }
 0x45e   : > { %v4857_v42 = vpack.c.bf16 %v5509_v34, %v5509_v34  ;;  %v5512_v28 = vadd.f32 %v5511_v16, %v5510_v2 }
 0x460   : > { %v4858_v49 = vpack.c.bf16 %v5512_v28, %v5512_v28  ;;  %v4024_v52 = vadd.bf16 %v4857_v42, %v3864_v59 }
 0x462   : > { %v4025_v20 = vadd.bf16 %v4858_v49, %v3865_v55 }
 0x464   : > { %v5175_v6 = vcombine.low %v4024_v52, %v4025_v20 }
 0x466   : > { %5176 = vst [vmem:[%s8884_s23 + $0x78] sm:$0xff] %v5175_v6  }
 0x467   : > { %5738 = shalt.err (!%p5735_p5)
}
 0x468   : > { %s5739_s5 = scalar_lea.hbm %s10181_s28, 2048  ;;  %s5743_s8 = scalar_lea.hbm %s10236_s2, 6144 }
 0x469   : > { %p5740_p6 = scmp.ne.s32.totalorder %s10181_s28, %s5739_s5  ;;  %p5744_p10 = scmp.lt.u32.totalorder %s10181_s28, %s10236_s2 }
 0x46a   : > { %p5745_p11 = scmp.lt.u32.totalorder %s5743_s8, %s5739_s5  ;;  %p5747_p13 = scmp.lt.u32.totalorder %s5739_s5, %s10181_s28 }
 0x46b   : > { %p5741_p7 = pnand %p5740_p6, %p5867_p4 }
 0x46c   : > { %p5746_p12 = por %p5745_p11, %p5744_p10 }
 0x46d   : > { %p5742_p9 = pneg %p5741_p7 }
 0x46e   : > { %p5748_p0 = por %p5747_p13, %p5746_p12 }
 0x470   : > { %p5749_p1 = pnand %p5748_p0, %p5742_p9 }
 0x472   : > { %5752 = shalt.err (!%p5749_p1)
}
 0x473   : > { %s5810_s18 = smov 64   ;;  %s5811_s20 = smov 4  }
 0x474   : > { %5529 = dma.vmem_to_hbm [thread:$0]  (%p5867_p4), %s10183_s24, 2048, %s10181_s28, %s10188_s29, %s5810_s18, %s5810_s18, %s5811_s20  }
 0x475 PF: > { %p5535_p2 = scmp.ge.s32.totalorder %s5803_s14, 2  ;;  %s4087_s23 = sand.u32 1, %s5783_s9  }
 0x476   : > { %s4088_s27 = scalar_lea.sflag [#allocation3], %s4087_s23 }
 0x477   : > { %p5532_p3 = pnand %p5535_p2, %p5874_p8 }
 0x479   : > { %5778 = dma.done.wait (!%p5532_p3), %s4088_s27, 2048  }
 0x47a   : > { %5780 = vsyncadd (!%p5532_p3), %s4088_s27, 4294965248  ;;  %s15_s14 = sadd.s32 1, %s5803_s14   ;;  %s11137_s9 = smov %s5787_s10 }
 0x47b   : > { %p12_p5 = scmp.ge.s32.totalorder %s15_s14, 5   ;;  %s11138_s10 = smov %s5791_s11 }
 0x47c   : > { %s11139_s11 = smov %s5880_s22  ;;  %s11140_s12 = smov %s5799_s13 }
 0x47d   : > { %s11141_s13 = smov %s11143_s17  ;;  %14 = sbr.rel (!%p12_p5) target bundleno = 4 (0x4), region = 66 }
 0x484   :  { %4093 = vsyncpa [#allocation3], 1 }
 0x485   :  { %4095 = vsyncpa [#allocation3 + $0x1], 1 }

</bundles_post_ra>
